<compile_context>
chip_gen: v7x
topology: tpu7x:2x2x1
jax: 0.10.0
libtpu: 0.0.40
codegen_flags: <defaults>
</compile_context>

<pallas_src>
import jax
import jax.numpy as jnp
import numpy as np
from jax.experimental import pallas as pl
from jax.experimental.pallas import tpu as pltpu

LEAKY_SLOPE = 0.01   # nn.LeakyReLU() default
LN_EPS = 1e-5        # nn.LayerNorm default eps


def _round_up(x, m):
    return ((x + m - 1) // m) * m


# ----------------------------------------------------------------------------
# Kernel
# ----------------------------------------------------------------------------
def _make_encoder_kernel(n_hidden, bias_offsets, bias_sizes):
    """Fused kernel: n_hidden x (Linear + LeakyReLU + LayerNorm) + fused latent head.

    refs layout:
      [x (bt, in),
       W_0 ... W_{n_hidden-1}, W_head       (bf16, gamma-folded),
       bias_pack (1, sum(out_i))            (f32, beta-folded),
       z_out (bt, 2*latent)]
    """

    def kernel(*refs):
        x_ref = refs[0]
        w_refs = refs[1:2 + n_hidden]          # n_hidden + 1 weight refs
        bias_ref = refs[2 + n_hidden]
        z_ref = refs[3 + n_hidden]

        h = x_ref[...]                          # f32 activations
        for li in range(n_hidden):
            w_ref = w_refs[li]
            off, n = bias_offsets[li], bias_sizes[li]
            # Linear (MXU, bf16 inputs, f32 accumulation).
            y = jnp.dot(h.astype(w_ref.dtype), w_ref[...],
                        preferred_element_type=jnp.float32)
            y = y + bias_ref[:, off:off + n]
            # LeakyReLU: 2 VALU ops.
            y = jnp.maximum(y, LEAKY_SLOPE * y)
            # LayerNorm (biased variance, like torch); affine folded into the
            # next matmul's weights/bias on the host. Two-pass (no cancellation).
            mu = jnp.mean(y, axis=-1, keepdims=True)
            d = y - mu
            var = jnp.mean(d * d, axis=-1, keepdims=True)
            h = d * jax.lax.rsqrt(var + LN_EPS)
            # Dropout: identity in eval mode.
            # TODO(synk): training-mode dropout (pltpu.prng_* masking) not emitted.

        # Fused z_mean | z_log_var head: one wide matmul, one lane-dense store.
        w_ref = w_refs[n_hidden]
        off, n = bias_offsets[n_hidden], bias_sizes[n_hidden]
        z = jnp.dot(h.astype(w_ref.dtype), w_ref[...],
                    preferred_element_type=jnp.float32) + bias_ref[:, off:off + n]
        z_ref[...] = z.astype(z_ref.dtype)

    return kernel


# ----------------------------------------------------------------------------
# One-time parameter preparation (fold LN affine, cast weights, pack biases)
# ----------------------------------------------------------------------------
def prepare_params(params, matmul_dtype=jnp.bfloat16):
    """Fold each LayerNorm's (gamma, beta) into the FOLLOWING Linear layer,
    cast weights to `matmul_dtype` once, and pack all biases into one array.

    Returns (weights, bias_pack, meta).
    """
    hidden = params["hidden"]
    wm, bm = params["z_mean"]
    wv, bv = params["z_log_var"]

    weights, biases = [], []
    g_prev = be_prev = None
    for (w, b, g, be) in hidden:
        w = w.astype(jnp.float32)
        b = b.astype(jnp.float32)
        if g_prev is not None:
            b = b + be_prev @ w           # beta fold into this layer's bias
            w = w * g_prev.T              # gamma fold into this layer's weight rows
        weights.append(w.astype(matmul_dtype))
        biases.append(b)
        g_prev, be_prev = g.astype(jnp.float32), be.astype(jnp.float32)

    w_head = jnp.concatenate([wm, wv], axis=1).astype(jnp.float32)
    b_head = jnp.concatenate([bm, bv], axis=1).astype(jnp.float32)
    if g_prev is not None:
        b_head = b_head + be_prev @ w_head
        w_head = w_head * g_prev.T
    weights.append(w_head.astype(matmul_dtype))
    biases.append(b_head)

    bias_pack = jnp.concatenate(biases, axis=1)
    sizes = [int(b.shape[1]) for b in biases]
    offsets = [0]
    for s in sizes[:-1]:
        offsets.append(offsets[-1] + s)

    meta = {
        "n_hidden": len(hidden),
        "input_dim": int(hidden[0][0].shape[0]) if hidden else int(wm.shape[0]),
        "latent_dim": int(wm.shape[1]),
        "bias_offsets": tuple(offsets),
        "bias_sizes": tuple(sizes),
    }
    return weights, bias_pack, meta


# ----------------------------------------------------------------------------
# Wrapper
# ----------------------------------------------------------------------------
def _pick_batch_tile(B, device_kind):
    if "v5" in device_kind:          # v5e: 4x(128x128) MXU -> 128 rows fill it
        target = 128
    elif "v7" in device_kind:        # v7x: 2 TCs share grid; want >=2 steps/TC
        target = 256 if B >= 512 else 128
    else:                            # v6e / unknown: 256x256 MXU
        target = 256 if B >= 256 else 128
    bt = min(target, _round_up(max(B, 1), 8))
    return _round_up(bt, 8)


def encoder_forward(x, weights, bias_pack, meta):
    """Run the fused encoder kernel on prepared parameters.

    x: (B, input_dim) float32.
    Returns (z_mean, z_log_var), each (B, latent_dim) float32.
    """
    B, input_dim = x.shape
    n_hidden = meta["n_hidden"]
    latent_dim = meta["latent_dim"]
    out_dim = 2 * latent_dim

    try:
        kind = jax.devices()[0].device_kind.lower()
    except Exception:
        kind = ""

    # --- batch tiling (generation-aware); x stays f32, batch zero-padded ---
    bt = _pick_batch_tile(B, kind)
    B_pad = _round_up(B, bt)
    x_in = x if B_pad == B else jnp.pad(x, ((0, B_pad - B), (0, 0)))
    grid = (B_pad // bt,)

    flat_params = list(weights) + [bias_pack]
    param_bytes = sum(int(np.prod(p.shape)) * p.dtype.itemsize for p in flat_params)

    # --- cost estimate ---
    dims = [input_dim] + [int(w.shape[1]) for w in weights]
    flops = 2 * B_pad * sum(a * b for a, b in zip(dims[:-1], dims[1:]))
    bytes_accessed = int(x_in.size * 4 + param_bytes + B_pad * out_dim * 4)
    cost = pl.CostEstimate(flops=int(flops),
                           transcendentals=int(B_pad * max(n_hidden, 1)),
                           bytes_accessed=bytes_accessed)

    # --- VMEM budget: always set explicitly; cap at 3/4 of physical capacity
    #     (-> ~48 MiB on v7x, ~96 MiB on v6e / v5e). Params are single-buffered.
    try:
        vmem_cap = int(pltpu.get_tpu_info().vmem_capacity_bytes)
    except Exception:
        vmem_cap = (64 << 20) if "v7" in kind else (128 << 20)
    tile_bytes = bt * input_dim * 4 + bt * out_dim * 4
    est_vmem = 2 * tile_bytes + param_bytes + (4 << 20)
    vmem_limit = int(min(max(est_vmem, 32 << 20), (vmem_cap * 3) // 4))

    kernel = _make_encoder_kernel(n_hidden, meta["bias_offsets"], meta["bias_sizes"])
    x_spec = pl.BlockSpec((bt, input_dim), lambda i: (i, 0))
    out_spec = pl.BlockSpec((bt, out_dim), lambda i: (i, 0))
    out_shape = jax.ShapeDtypeStruct((B_pad, out_dim), jnp.float32)

    def build(single_buffer_params):
        if single_buffer_params:
            # Params are grid-invariant: one resident copy is enough.
            p_specs = [pl.BlockSpec(p.shape, lambda i: (0, 0),
                                    pipeline_mode=pl.Buffered(1))
                       for p in flat_params]
        else:
            p_specs = [pl.BlockSpec(p.shape, lambda i: (0, 0)) for p in flat_params]
        return pl.pallas_call(
            kernel,
            out_shape=out_shape,
            grid_spec=pltpu.PrefetchScalarGridSpec(
                num_scalar_prefetch=0,
                grid=grid,
                in_specs=[x_spec] + p_specs,
                out_specs=out_spec,
            ),
            compiler_params=pltpu.CompilerParams(
                dimension_semantics=("parallel",),   # shards grid across TCs on v7x
                vmem_limit_bytes=vmem_limit,
            ),
            cost_estimate=cost,
        )

    try:
        z = build(True)(x_in, *flat_params)
    except Exception:
        # Fallback if single-buffered pipeline_mode is unsupported on this jax.
        z = build(False)(x_in, *flat_params)

    z = z[:B]
    return z[:, :latent_dim], z[:, latent_dim:]


# ----------------------------------------------------------------------------
# Synthetic params + pure-JAX reference (spec semantics)
# ----------------------------------------------------------------------------
def init_params(key, input_dim, encoder_layers, latent_dim):
    """Deterministic synthetic init matching nn.Linear / nn.LayerNorm shapes."""
    params = {"hidden": []}
    prev = input_dim
    for units in encoder_layers:
        key, kw, kb, kg, kbe = jax.random.split(key, 5)
        w = (jax.random.normal(kw, (prev, units), jnp.float32)
             * (1.0 / np.sqrt(prev)))                       # (in, out) = W^T
        b = jax.random.normal(kb, (1, units), jnp.float32) * 0.01
        gamma = 1.0 + 0.1 * jax.random.normal(kg, (1, units), jnp.float32)
        beta = 0.02 * jax.random.normal(kbe, (1, units), jnp.float32)
        params["hidden"].append((w, b, gamma, beta))
        prev = units
    key, kwm, kbm, kwv, kbv = jax.random.split(key, 5)
    params["z_mean"] = (
        jax.random.normal(kwm, (prev, latent_dim), jnp.float32) * (1.0 / np.sqrt(prev)),
        jax.random.normal(kbm, (1, latent_dim), jnp.float32) * 0.01,
    )
    params["z_log_var"] = (
        jax.random.normal(kwv, (prev, latent_dim), jnp.float32) * (1.0 / np.sqrt(prev)),
        jax.random.normal(kbv, (1, latent_dim), jnp.float32) * 0.01,
    )
    return params


def encoder_reference(x, params, *, matmul_dtype=jnp.bfloat16):
    """Pure-JAX reference of the unfused forward pass (same matmul dtype)."""
    h = x
    for (w, b, g, be) in params["hidden"]:
        y = jnp.dot(h.astype(matmul_dtype), w.astype(matmul_dtype),
                    preferred_element_type=jnp.float32) + b
        y = jnp.maximum(y, LEAKY_SLOPE * y)
        mu = jnp.mean(y, axis=-1, keepdims=True)
        var = jnp.mean((y - mu) ** 2, axis=-1, keepdims=True)
        h = (y - mu) / jnp.sqrt(var + LN_EPS) * g + be
    wm, bm = params["z_mean"]
    wv, bv = params["z_log_var"]
    hd = h.astype(matmul_dtype)
    zm = jnp.dot(hd, wm.astype(matmul_dtype), preferred_element_type=jnp.float32) + bm
    zv = jnp.dot(hd, wv.astype(matmul_dtype), preferred_element_type=jnp.float32) + bv
    return zm, zv


if __name__ == "__main__":
    # Lane/MXU-friendly small shapes (feature dims multiples of 128,
    # 2*latent = 128 so the fused head store is fully lane-dense).
    batch = 512
    input_dim = 128
    encoder_layers = [256, 128]
    latent_dim = 64

    key = jax.random.PRNGKey(0)
    key_x, key_p = jax.random.split(key)
    x = jax.random.normal(key_x, (batch, input_dim), jnp.float32)
    params = init_params(key_p, input_dim, encoder_layers, latent_dim)

    # One-time prep: LN-affine folding, bf16 weight cast, bias packing.
    weights, bias_pack, meta = prepare_params(params)

    z_mean, z_log_var = encoder_forward(x, weights, bias_pack, meta)
    jax.block_until_ready((z_mean, z_log_var))

    # Sanity check against the unfused pure-JAX reference (same bf16 matmul
    # dtype; tolerance absorbs the different bf16 rounding points of the fold).
    zm_ref, zv_ref = encoder_reference(x, params)
    assert z_mean.shape == (batch, latent_dim) and z_log_var.shape == (batch, latent_dim)
    assert np.allclose(np.asarray(z_mean), np.asarray(zm_ref), atol=2e-2, rtol=2e-2)
    assert np.allclose(np.asarray(z_log_var), np.asarray(zv_ref), atol=2e-2, rtol=2e-2)

    print("KERNEL_OK")
</pallas_src>

<mosaic_0001>
module attributes {stable_mosaic.version = 11 : i64} {
  func.func @kernel(%arg0: i32, %arg1: memref<256x128xf32, #tpu.memory_space<vmem>>, %arg2: memref<128x256xbf16, #tpu.memory_space<vmem>>, %arg3: memref<256x128xbf16, #tpu.memory_space<vmem>>, %arg4: memref<128x128xbf16, #tpu.memory_space<vmem>>, %arg5: memref<1x512xf32, #tpu.memory_space<vmem>>, %arg6: memref<256x128xf32, #tpu.memory_space<vmem>>) attributes {dimension_semantics = [#tpu.dimension_semantics<parallel>], iteration_bounds = array<i64: 2>, scalar_prefetch = 0 : i64, scratch_operands = 0 : i64, tpu.core_type = #tpu.core_type<tc>, window_params = [{transform_indices = @transform_0, window_bounds = array<i64: 256, 128>}, {pipeline_mode = #tpu.pipeline_mode<synchronous>, transform_indices = @transform_1, window_bounds = array<i64: 128, 256>}, {pipeline_mode = #tpu.pipeline_mode<synchronous>, transform_indices = @transform_2, window_bounds = array<i64: 256, 128>}, {pipeline_mode = #tpu.pipeline_mode<synchronous>, transform_indices = @transform_3, window_bounds = array<i64: 128, 128>}, {pipeline_mode = #tpu.pipeline_mode<synchronous>, transform_indices = @transform_4, window_bounds = array<i64: 1, 512>}, {transform_indices = @transform_5, window_bounds = array<i64: 256, 128>}]} {
    %c0 = arith.constant 0 : index
    %c0_0 = arith.constant 0 : index
    %0 = vector.load %arg1[%c0, %c0_0] : memref<256x128xf32, #tpu.memory_space<vmem>>, vector<256x128xf32>
    %1 = arith.truncf %0 : vector<256x128xf32> to vector<256x128xbf16>
    %c0_1 = arith.constant 0 : index
    %c0_2 = arith.constant 0 : index
    %2 = vector.load %arg2[%c0_1, %c0_2] : memref<128x256xbf16, #tpu.memory_space<vmem>>, vector<128x256xbf16>
    %cst = arith.constant dense<0.000000e+00> : vector<256x256xf32>
    %3 = tpu.matmul %1, %2, %cst {dimension_numbers = #tpu.dot_dimension_numbers<[1], [0], [0], [1], [0, 0, 1, 1], [], []>} : vector<256x128xbf16>, vector<128x256xbf16>, vector<256x256xf32> -> vector<256x256xf32>
    %c0_3 = arith.constant 0 : index
    %c0_4 = arith.constant 0 : index
    %4 = vector.load %arg5[%c0_3, %c0_4] : memref<1x512xf32, #tpu.memory_space<vmem>>, vector<1x256xf32>
    %5 = vector.broadcast %4 : vector<1x256xf32> to vector<256x256xf32>
    %6 = arith.addf %3, %5 : vector<256x256xf32>
    %cst_5 = arith.constant 0.00999999977 : f32
    %7 = vector.broadcast %cst_5 : f32 to vector<256x256xf32>
    %8 = arith.mulf %7, %6 : vector<256x256xf32>
    %9 = arith.maximumf %6, %8 : vector<256x256xf32>
    %cst_6 = arith.constant dense<0.000000e+00> : vector<256xf32>
    %10 = vector.multi_reduction <add>, %9, %cst_6 [1] : vector<256x256xf32> to vector<256xf32>
    %11 = vector.shape_cast %10 : vector<256xf32> to vector<256x1xf32>
    %cst_7 = arith.constant 2.560000e+02 : f32
    %12 = vector.broadcast %cst_7 : f32 to vector<256x1xf32>
    %13 = arith.divf %11, %12 : vector<256x1xf32>
    %14 = vector.broadcast %13 : vector<256x1xf32> to vector<256x256xf32>
    %15 = arith.subf %9, %14 : vector<256x256xf32>
    %16 = arith.mulf %15, %15 : vector<256x256xf32>
    %cst_8 = arith.constant dense<0.000000e+00> : vector<256xf32>
    %17 = vector.multi_reduction <add>, %16, %cst_8 [1] : vector<256x256xf32> to vector<256xf32>
    %18 = vector.shape_cast %17 : vector<256xf32> to vector<256x1xf32>
    %cst_9 = arith.constant 2.560000e+02 : f32
    %19 = vector.broadcast %cst_9 : f32 to vector<256x1xf32>
    %20 = arith.divf %18, %19 : vector<256x1xf32>
    %cst_10 = arith.constant 9.99999974E-6 : f32
    %21 = vector.broadcast %cst_10 : f32 to vector<256x1xf32>
    %22 = arith.addf %20, %21 : vector<256x1xf32>
    %23 = math.rsqrt %22 : vector<256x1xf32>
    %24 = vector.broadcast %23 : vector<256x1xf32> to vector<256x256xf32>
    %25 = arith.mulf %15, %24 : vector<256x256xf32>
    %26 = arith.truncf %25 : vector<256x256xf32> to vector<256x256xbf16>
    %c0_11 = arith.constant 0 : index
    %c0_12 = arith.constant 0 : index
    %27 = vector.load %arg3[%c0_11, %c0_12] : memref<256x128xbf16, #tpu.memory_space<vmem>>, vector<256x128xbf16>
    %cst_13 = arith.constant dense<0.000000e+00> : vector<256x128xf32>
    %28 = tpu.matmul %26, %27, %cst_13 {dimension_numbers = #tpu.dot_dimension_numbers<[1], [0], [0], [1], [0, 0, 1, 1], [], []>} : vector<256x256xbf16>, vector<256x128xbf16>, vector<256x128xf32> -> vector<256x128xf32>
    %c0_14 = arith.constant 0 : index
    %c256 = arith.constant 256 : index
    %29 = vector.load %arg5[%c0_14, %c256] : memref<1x512xf32, #tpu.memory_space<vmem>>, vector<1x128xf32>
    %30 = vector.broadcast %29 : vector<1x128xf32> to vector<256x128xf32>
    %31 = arith.addf %28, %30 : vector<256x128xf32>
    %cst_15 = arith.constant 0.00999999977 : f32
    %32 = vector.broadcast %cst_15 : f32 to vector<256x128xf32>
    %33 = arith.mulf %32, %31 : vector<256x128xf32>
    %34 = arith.maximumf %31, %33 : vector<256x128xf32>
    %cst_16 = arith.constant dense<0.000000e+00> : vector<256xf32>
    %35 = vector.multi_reduction <add>, %34, %cst_16 [1] : vector<256x128xf32> to vector<256xf32>
    %36 = vector.shape_cast %35 : vector<256xf32> to vector<256x1xf32>
    %cst_17 = arith.constant 1.280000e+02 : f32
    %37 = vector.broadcast %cst_17 : f32 to vector<256x1xf32>
    %38 = arith.divf %36, %37 : vector<256x1xf32>
    %39 = vector.broadcast %38 : vector<256x1xf32> to vector<256x128xf32>
    %40 = arith.subf %34, %39 : vector<256x128xf32>
    %41 = arith.mulf %40, %40 : vector<256x128xf32>
    %cst_18 = arith.constant dense<0.000000e+00> : vector<256xf32>
    %42 = vector.multi_reduction <add>, %41, %cst_18 [1] : vector<256x128xf32> to vector<256xf32>
    %43 = vector.shape_cast %42 : vector<256xf32> to vector<256x1xf32>
    %cst_19 = arith.constant 1.280000e+02 : f32
    %44 = vector.broadcast %cst_19 : f32 to vector<256x1xf32>
    %45 = arith.divf %43, %44 : vector<256x1xf32>
    %cst_20 = arith.constant 9.99999974E-6 : f32
    %46 = vector.broadcast %cst_20 : f32 to vector<256x1xf32>
    %47 = arith.addf %45, %46 : vector<256x1xf32>
    %48 = math.rsqrt %47 : vector<256x1xf32>
    %49 = vector.broadcast %48 : vector<256x1xf32> to vector<256x128xf32>
    %50 = arith.mulf %40, %49 : vector<256x128xf32>
    %51 = arith.truncf %50 : vector<256x128xf32> to vector<256x128xbf16>
    %c0_21 = arith.constant 0 : index
    %c0_22 = arith.constant 0 : index
    %52 = vector.load %arg4[%c0_21, %c0_22] : memref<128x128xbf16, #tpu.memory_space<vmem>>, vector<128x128xbf16>
    %cst_23 = arith.constant dense<0.000000e+00> : vector<256x128xf32>
    %53 = tpu.matmul %51, %52, %cst_23 {dimension_numbers = #tpu.dot_dimension_numbers<[1], [0], [0], [1], [0, 0, 1, 1], [], []>} : vector<256x128xbf16>, vector<128x128xbf16>, vector<256x128xf32> -> vector<256x128xf32>
    %c0_24 = arith.constant 0 : index
    %c384 = arith.constant 384 : index
    %54 = vector.load %arg5[%c0_24, %c384] : memref<1x512xf32, #tpu.memory_space<vmem>>, vector<1x128xf32>
    %55 = vector.broadcast %54 : vector<1x128xf32> to vector<256x128xf32>
    %56 = arith.addf %53, %55 : vector<256x128xf32>
    %c0_25 = arith.constant 0 : index
    %c0_26 = arith.constant 0 : index
    %57 = vector.load %arg6[%c0_25, %c0_26] : memref<256x128xf32, #tpu.memory_space<vmem>>, vector<256x128xf32>
    tpu.vector_store %arg6[%c0_25, %c0_26], %56 {strides = array<i32>} : memref<256x128xf32, #tpu.memory_space<vmem>>, vector<256x128xf32>,
    return
  }
  func.func @transform_0(%arg0: i32) -> (i32, i32) {
    %c0_i32 = arith.constant 0 : i32
    %c0_i32_0 = arith.constant 0 : i32
    return %arg0, %c0_i32 : i32, i32
  }
  func.func @transform_1(%arg0: i32) -> (i32, i32) {
    %c0_i32 = arith.constant 0 : i32
    %c0_i32_0 = arith.constant 0 : i32
    %c0_i32_1 = arith.constant 0 : i32
    return %c0_i32, %c0_i32_0 : i32, i32
  }
  func.func @transform_2(%arg0: i32) -> (i32, i32) {
    %c0_i32 = arith.constant 0 : i32
    %c0_i32_0 = arith.constant 0 : i32
    %c0_i32_1 = arith.constant 0 : i32
    return %c0_i32, %c0_i32_0 : i32, i32
  }
  func.func @transform_3(%arg0: i32) -> (i32, i32) {
    %c0_i32 = arith.constant 0 : i32
    %c0_i32_0 = arith.constant 0 : i32
    %c0_i32_1 = arith.constant 0 : i32
    return %c0_i32, %c0_i32_0 : i32, i32
  }
  func.func @transform_4(%arg0: i32) -> (i32, i32) {
    %c0_i32 = arith.constant 0 : i32
    %c0_i32_0 = arith.constant 0 : i32
    %c0_i32_1 = arith.constant 0 : i32
    return %c0_i32, %c0_i32_0 : i32, i32
  }
  func.func @transform_5(%arg0: i32) -> (i32, i32) {
    %c0_i32 = arith.constant 0 : i32
    %c0_i32_0 = arith.constant 0 : i32
    return %arg0, %c0_i32 : i32, i32
  }
}

module attributes {stable_mosaic.version = 11 : i64} {
  func.func @kernel(%arg0: i32, %arg1: memref<256x128xf32, #tpu.memory_space<vmem>>, %arg2: memref<128x256xbf16, #tpu.memory_space<vmem>>, %arg3: memref<256x128xbf16, #tpu.memory_space<vmem>>, %arg4: memref<128x128xbf16, #tpu.memory_space<vmem>>, %arg5: memref<1x512xf32, #tpu.memory_space<vmem>>, %arg6: memref<256x128xf32, #tpu.memory_space<vmem>>) attributes {dimension_semantics = [#tpu.dimension_semantics<parallel>], iteration_bounds = array<i64: 2>, scalar_prefetch = 0 : i64, scratch_operands = 0 : i64, tpu.core_type = #tpu.core_type<tc>, window_params = [{transform_indices = @transform_0, window_bounds = array<i64: 256, 128>}, {pipeline_mode = #tpu.pipeline_mode<synchronous>, transform_indices = @transform_1, window_bounds = array<i64: 128, 256>}, {pipeline_mode = #tpu.pipeline_mode<synchronous>, transform_indices = @transform_2, window_bounds = array<i64: 256, 128>}, {pipeline_mode = #tpu.pipeline_mode<synchronous>, transform_indices = @transform_3, window_bounds = array<i64: 128, 128>}, {pipeline_mode = #tpu.pipeline_mode<synchronous>, transform_indices = @transform_4, window_bounds = array<i64: 1, 512>}, {transform_indices = @transform_5, window_bounds = array<i64: 256, 128>}]} {
    %c0 = arith.constant 0 : index
    %c0_0 = arith.constant 0 : index
    %0 = vector.load %arg1[%c0, %c0_0] : memref<256x128xf32, #tpu.memory_space<vmem>>, vector<256x128xf32>
    %1 = arith.truncf %0 : vector<256x128xf32> to vector<256x128xbf16>
    %c0_1 = arith.constant 0 : index
    %c0_2 = arith.constant 0 : index
    %2 = vector.load %arg2[%c0_1, %c0_2] : memref<128x256xbf16, #tpu.memory_space<vmem>>, vector<128x256xbf16>
    %cst = arith.constant dense<0.000000e+00> : vector<256x256xf32>
    %3 = tpu.matmul %1, %2, %cst {dimension_numbers = #tpu.dot_dimension_numbers<[1], [0], [0], [1], [0, 0, 1, 1], [], []>} : vector<256x128xbf16>, vector<128x256xbf16>, vector<256x256xf32> -> vector<256x256xf32>
    %c0_3 = arith.constant 0 : index
    %c0_4 = arith.constant 0 : index
    %4 = vector.load %arg5[%c0_3, %c0_4] : memref<1x512xf32, #tpu.memory_space<vmem>>, vector<1x256xf32>
    %5 = vector.broadcast %4 : vector<1x256xf32> to vector<256x256xf32>
    %6 = arith.addf %3, %5 : vector<256x256xf32>
    %cst_5 = arith.constant 0.00999999977 : f32
    %7 = vector.broadcast %cst_5 : f32 to vector<256x256xf32>
    %8 = arith.mulf %7, %6 : vector<256x256xf32>
    %9 = arith.maximumf %6, %8 : vector<256x256xf32>
    %cst_6 = arith.constant dense<0.000000e+00> : vector<256xf32>
    %10 = vector.multi_reduction <add>, %9, %cst_6 [1] : vector<256x256xf32> to vector<256xf32>
    %11 = vector.shape_cast %10 : vector<256xf32> to vector<256x1xf32>
    %cst_7 = arith.constant 2.560000e+02 : f32
    %12 = vector.broadcast %cst_7 : f32 to vector<256x1xf32>
    %13 = arith.divf %11, %12 : vector<256x1xf32>
    %14 = vector.broadcast %13 : vector<256x1xf32> to vector<256x256xf32>
    %15 = arith.subf %9, %14 : vector<256x256xf32>
    %16 = arith.mulf %15, %15 : vector<256x256xf32>
    %cst_8 = arith.constant dense<0.000000e+00> : vector<256xf32>
    %17 = vector.multi_reduction <add>, %16, %cst_8 [1] : vector<256x256xf32> to vector<256xf32>
    %18 = vector.shape_cast %17 : vector<256xf32> to vector<256x1xf32>
    %cst_9 = arith.constant 2.560000e+02 : f32
    %19 = vector.broadcast %cst_9 : f32 to vector<256x1xf32>
    %20 = arith.divf %18, %19 : vector<256x1xf32>
    %cst_10 = arith.constant 9.99999974E-6 : f32
    %21 = vector.broadcast %cst_10 : f32 to vector<256x1xf32>
    %22 = arith.addf %20, %21 : vector<256x1xf32>
    %23 = math.rsqrt %22 : vector<256x1xf32>
    %24 = vector.broadcast %23 : vector<256x1xf32> to vector<256x256xf32>
    %25 = arith.mulf %15, %24 : vector<256x256xf32>
    %26 = arith.truncf %25 : vector<256x256xf32> to vector<256x256xbf16>
    %c0_11 = arith.constant 0 : index
    %c0_12 = arith.constant 0 : index
    %27 = vector.load %arg3[%c0_11, %c0_12] : memref<256x128xbf16, #tpu.memory_space<vmem>>, vector<256x128xbf16>
    %cst_13 = arith.constant dense<0.000000e+00> : vector<256x128xf32>
    %28 = tpu.matmul %26, %27, %cst_13 {dimension_numbers = #tpu.dot_dimension_numbers<[1], [0], [0], [1], [0, 0, 1, 1], [], []>} : vector<256x256xbf16>, vector<256x128xbf16>, vector<256x128xf32> -> vector<256x128xf32>
    %c0_14 = arith.constant 0 : index
    %c256 = arith.constant 256 : index
    %29 = vector.load %arg5[%c0_14, %c256] : memref<1x512xf32, #tpu.memory_space<vmem>>, vector<1x128xf32>
    %30 = vector.broadcast %29 : vector<1x128xf32> to vector<256x128xf32>
    %31 = arith.addf %28, %30 : vector<256x128xf32>
    %cst_15 = arith.constant 0.00999999977 : f32
    %32 = vector.broadcast %cst_15 : f32 to vector<256x128xf32>
    %33 = arith.mulf %32, %31 : vector<256x128xf32>
    %34 = arith.maximumf %31, %33 : vector<256x128xf32>
    %cst_16 = arith.constant dense<0.000000e+00> : vector<256xf32>
    %35 = vector.multi_reduction <add>, %34, %cst_16 [1] : vector<256x128xf32> to vector<256xf32>
    %36 = vector.shape_cast %35 : vector<256xf32> to vector<256x1xf32>
    %cst_17 = arith.constant 1.280000e+02 : f32
    %37 = vector.broadcast %cst_17 : f32 to vector<256x1xf32>
    %38 = arith.divf %36, %37 : vector<256x1xf32>
    %39 = vector.broadcast %38 : vector<256x1xf32> to vector<256x128xf32>
    %40 = arith.subf %34, %39 : vector<256x128xf32>
    %41 = arith.mulf %40, %40 : vector<256x128xf32>
    %cst_18 = arith.constant dense<0.000000e+00> : vector<256xf32>
    %42 = vector.multi_reduction <add>, %41, %cst_18 [1] : vector<256x128xf32> to vector<256xf32>
    %43 = vector.shape_cast %42 : vector<256xf32> to vector<256x1xf32>
    %cst_19 = arith.constant 1.280000e+02 : f32
    %44 = vector.broadcast %cst_19 : f32 to vector<256x1xf32>
    %45 = arith.divf %43, %44 : vector<256x1xf32>
    %cst_20 = arith.constant 9.99999974E-6 : f32
    %46 = vector.broadcast %cst_20 : f32 to vector<256x1xf32>
    %47 = arith.addf %45, %46 : vector<256x1xf32>
    %48 = math.rsqrt %47 : vector<256x1xf32>
    %49 = vector.broadcast %48 : vector<256x1xf32> to vector<256x128xf32>
    %50 = arith.mulf %40, %49 : vector<256x128xf32>
    %51 = arith.truncf %50 : vector<256x128xf32> to vector<256x128xbf16>
    %c0_21 = arith.constant 0 : index
    %c0_22 = arith.constant 0 : index
    %52 = vector.load %arg4[%c0_21, %c0_22] : memref<128x128xbf16, #tpu.memory_space<vmem>>, vector<128x128xbf16>
    %cst_23 = arith.constant dense<0.000000e+00> : vector<256x128xf32>
    %53 = tpu.matmul %51, %52, %cst_23 {dimension_numbers = #tpu.dot_dimension_numbers<[1], [0], [0], [1], [0, 0, 1, 1], [], []>} : vector<256x128xbf16>, vector<128x128xbf16>, vector<256x128xf32> -> vector<256x128xf32>
    %c0_24 = arith.constant 0 : index
    %c384 = arith.constant 384 : index
    %54 = vector.load %arg5[%c0_24, %c384] : memref<1x512xf32, #tpu.memory_space<vmem>>, vector<1x128xf32>
    %55 = vector.broadcast %54 : vector<1x128xf32> to vector<256x128xf32>
    %56 = arith.addf %53, %55 : vector<256x128xf32>
    %c0_25 = arith.constant 0 : index
    %c0_26 = arith.constant 0 : index
    %57 = vector.load %arg6[%c0_25, %c0_26] : memref<256x128xf32, #tpu.memory_space<vmem>>, vector<256x128xf32>
    tpu.vector_store %arg6[%c0_25, %c0_26], %56 {strides = array<i32>} : memref<256x128xf32, #tpu.memory_space<vmem>>, vector<256x128xf32>,
    return
  }
  func.func @transform_0(%arg0: i32) -> (i32, i32) {
    %c0_i32 = arith.constant 0 : i32
    %c0_i32_0 = arith.constant 0 : i32
    return %arg0, %c0_i32 : i32, i32
  }
  func.func @transform_1(%arg0: i32) -> (i32, i32) {
    %c0_i32 = arith.constant 0 : i32
    %c0_i32_0 = arith.constant 0 : i32
    %c0_i32_1 = arith.constant 0 : i32
    return %c0_i32, %c0_i32_0 : i32, i32
  }
  func.func @transform_2(%arg0: i32) -> (i32, i32) {
    %c0_i32 = arith.constant 0 : i32
    %c0_i32_0 = arith.constant 0 : i32
    %c0_i32_1 = arith.constant 0 : i32
    return %c0_i32, %c0_i32_0 : i32, i32
  }
  func.func @transform_3(%arg0: i32) -> (i32, i32) {
    %c0_i32 = arith.constant 0 : i32
    %c0_i32_0 = arith.constant 0 : i32
    %c0_i32_1 = arith.constant 0 : i32
    return %c0_i32, %c0_i32_0 : i32, i32
  }
  func.func @transform_4(%arg0: i32) -> (i32, i32) {
    %c0_i32 = arith.constant 0 : i32
    %c0_i32_0 = arith.constant 0 : i32
    %c0_i32_1 = arith.constant 0 : i32
    return %c0_i32, %c0_i32_0 : i32, i32
  }
  func.func @transform_5(%arg0: i32) -> (i32, i32) {
    %c0_i32 = arith.constant 0 : i32
    %c0_i32_0 = arith.constant 0 : i32
    return %arg0, %c0_i32 : i32, i32
  }
}

</mosaic_0001>

<bundles_post_ra>
// kernel: tpu_custom_call.1
= control target key start
LH: loop header
LB: loop body
LE: loop exit
PB: predicated region body
PF: predicated region fallthrough
CT: control target
= control target key end

     0   :  { %10 = vsyncpa [#allocation3], 0  ;;  %s4585_s0 = inlined_call_operand.hbm [shape: f32[512,128], index: 0, kind: input, shape index: {}]   ;;  %s4586_s1 = inlined_call_operand.hbm [shape: bf16[128,256], index: 1, kind: input, shape index: {}]   ;;  %s4587_s2 = inlined_call_operand.hbm [shape: bf16[256,128], index: 2, kind: input, shape index: {}]   ;;  %s4588_s3 = inlined_call_operand.hbm [shape: bf16[128,128], index: 3, kind: input, shape index: {}]   ;;  %s4589_s4 = inlined_call_operand.vmem [shape: f32[1,512], index: 4, kind: input, shape index: {}]   ;;  %s4590_s5 = inlined_call_operand.hbm [shape: f32[512,128], index: 5, kind: output, shape index: {}]  }
   0x1   :  { %12 = vsyncpa [#allocation3 + $0x1], 0 }
   0x2   :  { %13 = vsyncpa [#allocation6], 0 }
   0x3   :  { %14 = vsyncpa [#allocation9], 0 }
   0x4   :  { %15 = vsyncpa [#allocation4], 0 }
   0x5   :  { %17 = vsyncpa [#allocation4 + $0x1], 0  ;;  %s3177_s18 = smov 0   ;;  %s3179_s19 = smov 0  }
   0x6   :  { %s3181_s20 = smov 0   ;;  %s3183_s21 = smov 0  }
   0x7 LB: > { %s3198_s22 = sadd.s32 4294967295, %s3133_s21   ;;  %s2421_s23 = sadd.s32 4294967294, %s3133_s21   ;;  %s3133_s21 = sphi %s3183_s21, %s4725_s21   ;;  %s3129_s20 = sphi %s3181_s20, %s4724_s20   ;;  %s3125_s19 = sphi %s3179_s19, %s4723_s19   ;;  %s3121_s18 = sphi %s3177_s18, %s4722_s18  }
   0x8   : > { %p43_p0 = scmp.ne.s32.totalorder %s3125_s19, %s3121_s18  ;;  %p4591_p1 = scmp.eq.s32.totalorder %s3198_s22, 0 }
   0x9   : > { %p157_p3 = scmp.eq.s32.totalorder %s2421_s23, 1  ;;  %p2422_p5 = scmp.ge.s32.totalorder %s3133_s21, 1 }
   0xa   : > { %p3207_p4 = por %p4591_p1, %p43_p0  ;;  %p164_p7 = scmp.lt.s32.totalorder %s3133_s21, 3 }
   0xb   : > { %p3212_p6 = por %p157_p3, %p43_p0  ;;  %s3135_s27 = smov [#allocation5]  }
   0xc   : > { %s4632_s24 = scalar_select %p3207_p4, 1, 0 }
   0xd   : > { %s4633_s25 = scalar_select %p3212_p6, 1, 0 }
   0xe   : > { %p3217_p8 = pnand %p2422_p5, %p164_p7  ;;  %s176_s28 = sshll.u32 %s3135_s27, 4  ;;  %s3221_s28 = int_to_ptr.vmem [resolvable:$true] %s176_s28 }
   0xf   : > { %s3136_s30 = smov [#allocation7]   ;;  %s2945_s9 = scalar_lea.hbm %s4586_s1, 2048 }
  0x10   : > { %s4634_s26 = scalar_select %p3217_p8, 1, 0 }
  0x11   : > { %p2701_p9 = pneg %p3217_p8  ;;  %s189_s6 = sshll.u32 %s3136_s30, 4  ;;  %s3232_s6 = int_to_ptr.vmem [resolvable:$true] %s189_s6 }
  0x12   : > { %p2946_p12 = scmp.ne.s32.totalorder %s4586_s1, %s2945_s9  ;;  %p2952_p5 = scmp.lt.u32.totalorder %s2945_s9, %s4586_s1 }
  0x13   : > { %p3228_p11 = pnand %p2701_p9, %p4591_p1 }
  0x15   : > { %p3242_p13 = pneg %p3228_p11 }
  0x17   : > { %p2948_p0 = pnand %p3242_p13, %p2946_p12 }
  0x19   : > { %p2949_p3 = pneg %p2948_p0 }
  0x1b   : > { %p2954_p7 = pnand %p2952_p5, %p2949_p3 }
  0x1d   : > { %2957 = shalt.err (!%p2954_p7)
}
  0x1e   : > { %s2958_s15 = scalar_lea.vmem %s3221_s28, 2048  ;;  %p2966_p2 = scmp.lt.s32.totalorder %s3221_s28, %s3221_s28 }
  0x1f   : > { %p2959_p9 = scmp.ne.s32.totalorder %s3221_s28, %s2958_s15  ;;  %p2967_p6 = scmp.lt.s32.totalorder %s2958_s15, %s2958_s15 }
  0x21   : > { %p2961_p10 = pnand %p2959_p9, %p3242_p13  ;;  %p2968_p12 = por %p2967_p6, %p2966_p2 }
  0x23   : > { %p2962_p1 = pneg %p2961_p10 }
  0x25   : > { %p2969_p0 = pnand %p2968_p12, %p2962_p1 }
  0x27   : > { %2972 = shalt.err (!%p2969_p0)
}
  0x28   : > { %s4592_s16 = smov 128   ;;  %s4593_s17 = smov 8  }
  0x29   : > { %2704 = dma.hbm_to_vmem [thread:$0]  (!%p3228_p11), %s4586_s1, 2048, %s3221_s28, [#allocation6], %s4592_s16, %s4592_s16, %s4593_s17  }
  0x2a   : > { %s2973_s8 = scalar_lea.hbm %s4587_s2, 2048 }
  0x2b   : > { %p2974_p1 = scmp.ne.s32.totalorder %s4587_s2, %s2973_s8  ;;  %p2980_p10 = scmp.lt.u32.totalorder %s2973_s8, %s4587_s2 }
  0x2d   : > { %p2976_p2 = pnand %p2974_p1, %p3242_p13 }
  0x2f   : > { %p2977_p6 = pneg %p2976_p2 }
  0x31   : > { %p2982_p3 = pnand %p2980_p10, %p2977_p6 }
  0x33   : > { %2985 = shalt.err (!%p2982_p3)
}
  0x34   : > { %s2986_s28 = scalar_lea.vmem %s3232_s6, 2048  ;;  %p2994_p12 = scmp.lt.s32.totalorder %s3232_s6, %s3232_s6 }
  0x35   : > { %p2987_p5 = scmp.ne.s32.totalorder %s3232_s6, %s2986_s28  ;;  %p2995_p0 = scmp.lt.s32.totalorder %s2986_s28, %s2986_s28 }
  0x37   : > { %p2989_p7 = pnand %p2987_p5, %p3242_p13  ;;  %p2996_p1 = por %p2995_p0, %p2994_p12 }
  0x39   : > { %p2990_p9 = pneg %p2989_p7 }
  0x3b   : > { %p2997_p2 = pnand %p2996_p1, %p2990_p9 }
  0x3d   : > { %3000 = shalt.err (!%p2997_p2)
}
  0x3e   : > { %s3139_s14 = smov 64   ;;  %s3140_s15 = smov 4  }
  0x3f   : > { %2707 = dma.hbm_to_vmem [thread:$0]  (!%p3228_p11), %s4587_s2, 2048, %s3232_s6, [#allocation6], %s3139_s14, %s3139_s14, %s3140_s15  }
  0x40   : > { %s3141_s30 = smov [#allocation8]   ;;  %s3290_s8 = sadd.s32 1, %s3133_s21  }
  0x41   : > { %s202_s7 = sshll.u32 %s3141_s30, 4  ;;  %s3001_s11 = scalar_lea.hbm %s4588_s3, 1024  ;;  %s203_s7 = int_to_ptr.vmem [resolvable:$true] %s202_s7 }
  0x42   : > { %p3002_p6 = scmp.ne.s32.totalorder %s4588_s3, %s3001_s11  ;;  %p3008_p5 = scmp.lt.u32.totalorder %s3001_s11, %s4588_s3 }
  0x44   : > { %p3004_p10 = pnand %p3002_p6, %p3242_p13 }
  0x46   : > { %p3005_p3 = pneg %p3004_p10 }
  0x48   : > { %p3010_p7 = pnand %p3008_p5, %p3005_p3 }
  0x4a   : > { %3013 = shalt.err (!%p3010_p7)
}
  0x4b   : > { %s3014_s6 = scalar_lea.vmem %s203_s7, 1024  ;;  %p3022_p1 = scmp.lt.s32.totalorder %s203_s7, %s203_s7 }
  0x4c   : > { %p3015_p9 = scmp.ne.s32.totalorder %s203_s7, %s3014_s6  ;;  %p3023_p2 = scmp.lt.s32.totalorder %s3014_s6, %s3014_s6 }
  0x4e   : > { %p3017_p12 = pnand %p3015_p9, %p3242_p13  ;;  %p3024_p4 = por %p3023_p2, %p3022_p1 }
  0x50   : > { %p3018_p0 = pneg %p3017_p12 }
  0x52   : > { %p3025_p8 = pnand %p3024_p4, %p3018_p0 }
  0x54   : > { %3028 = shalt.err (!%p3025_p8)
}
  0x55   : > { %2710 = dma.hbm_to_vmem [thread:$0]  (!%p3228_p11), %s4588_s3, 1024, %s203_s7, [#allocation9], %s3139_s14, %s3139_s14, %s3140_s15  }
  0x56   : > { %s27_s12 = ssub.s32 %s3133_s21, %s3290_s8  ;;  %s30_s16 = sadd.s32 1, %s3129_s20 }
  0x57   : > { %p28_p4 = scmp.eq.s32.totalorder %s27_s12, 0  ;;  %p37_p8 = scmp.ne.s32.totalorder %s3129_s20, %s3125_s19 }
  0x58   : > { %p38_p13 = scmp.eq.s32.totalorder %s3133_s21, 0  ;;  %p2722_p6 = scmp.lt.s32.totalorder %s3133_s21, 2 }
  0x59   : > { %s3318_s29 = scalar_select %p28_p4, %s3129_s20, %s30_s16  }
  0x5a   : > { %p39_p10 = por %p38_p13, %p37_p8  ;;  %p4637_p3 = scmp.eq.s32.totalorder %s3198_s22, 1 }
  0x5b   : > { %s219_s30 = sand.u32 1, %s3129_s20   ;;  %s2483_s9 = sshll.u32 %s3133_s21, 12 }
  0x5c   : > { %p3322_p5 = por %p4637_p3, %p37_p8  ;;  %s2427_s10 = sshll.u32 %s219_s30, 8 }
  0x5d   : > { %s3331_s14 = scalar_lea.hbm %s4585_s0, %s2483_s9  ;;  %s223_s15 = scalar_lea.vmem [#allocation2], %s2427_s10 }
  0x5e   : > { %s230_s7 = sshll.u32 %s223_s15, 4  ;;  %p3333_p11 = pnand %p2722_p6, %p39_p10  ;;  %s3337_s7 = int_to_ptr.vmem [resolvable:$true] %s230_s7 }
  0x5f   : > { %s3339_s6 = scalar_lea.sflag [#allocation3], %s219_s30  ;;  %s3029_s23 = scalar_lea.hbm %s3331_s14, 4096 }
  0x60   : > { %p3030_p7 = scmp.ne.s32.totalorder %s3331_s14, %s3029_s23  ;;  %p3031_p9 = pneg %p3333_p11 }
  0x61   : > { %s3034_s16 = scalar_lea.hbm %s4585_s0, 8192  ;;  %p3035_p1 = scmp.lt.u32.totalorder %s3331_s14, %s4585_s0 }
  0x62   : > { %p3032_p12 = pnand %p3031_p9, %p3030_p7  ;;  %p3036_p2 = scmp.lt.u32.totalorder %s3034_s16, %s3029_s23 }
  0x63   : > { %p3038_p8 = scmp.lt.u32.totalorder %s3029_s23, %s3331_s14 }
  0x64   : > { %p3033_p0 = pneg %p3032_p12  ;;  %p3037_p4 = por %p3036_p2, %p3035_p1 }
  0x66   : > { %p3039_p13 = por %p3038_p8, %p3037_p4 }
  0x68   : > { %p3040_p6 = pnand %p3039_p13, %p3033_p0 }
  0x6a   : > { %3043 = shalt.err (!%p3040_p6)
}
  0x6b   : > { %s3044_s30 = scalar_lea.vmem %s3337_s7, 4096  ;;  %s3142_s11 = smov [#allocation2]  }
  0x6c   : > { %p3045_p10 = scmp.ne.s32.totalorder %s3337_s7, %s3044_s30  ;;  %s3049_s13 = sshll.u32 %s3142_s11, 4  ;;  %s3050_s13 = int_to_ptr.vmem [resolvable:$false] %s3049_s13 }
  0x6d   : > { %s3051_s15 = scalar_lea.vmem %s3050_s13, 8192  ;;  %p3052_p12 = scmp.lt.s32.totalorder %s3337_s7, %s3050_s13 }
  0x6e   : > { %p3047_p3 = pnand %p3045_p10, %p3031_p9  ;;  %p3053_p1 = scmp.lt.s32.totalorder %s3051_s15, %s3044_s30 }
  0x70   : > { %p3048_p7 = pneg %p3047_p3  ;;  %p3054_p2 = por %p3053_p1, %p3052_p12 }
  0x72   : > { %p3055_p4 = pnand %p3054_p2, %p3048_p7 }
  0x74   : > { %3058 = shalt.err (!%p3055_p4)
}
  0x75   : > { %s4640_s23 = smov 8   ;;  %s4641_s27 = smov 128  }
  0x76   : > { %2714 = dma.hbm_to_vmem [thread:$0]  (!%p3333_p11), %s3331_s14, 4096, %s3337_s7, %s3339_s6, %s4641_s27, %s4641_s27, %s4640_s23  }
  0x77   : > { %p4642_p9 = scmp.ne.s32.totalorder %s4634_s26, 0 }
  0x79   : > { %242 = sbr.rel (%p4642_p9) target bundleno = 1661 (0x67d), region = 40 }
  0x80   : > { %s3373_s12 = sand.u32 1, %s3125_s19   ;;  %p4643_p0 = scmp.ne.s32.totalorder %s4632_s24, 0 }
  0x81   : > { %s2431_s16 = sshll.u32 %s3373_s12, 8  ;;  %s245_s9 = scalar_lea.sflag [#allocation3], %s3373_s12 }
  0x82   : > { %s3379_s28 = scalar_lea.vmem [#allocation2], %s2431_s16 }
  0x83   : > { %3104 = dma.done.wait (%p4643_p0), %s245_s9, 4096  }
  0x84   : > { %3106 = vsyncadd (%p4643_p0), %s245_s9, 4294963200  ;;  %p4644_p11 = scmp.eq.s32.totalorder %s3198_s22, 0 }
  0x86   : > { %3108 = dma.done.wait (%p4644_p11), [#allocation6], 4096   ;;  %p4645_p8 = pmov %p4644_p11 }
  0x88   : > { %3110 = vsyncadd (%p4645_p8), [#allocation6], 4294963200  ;;  %p4646_p13 = pmov %p4645_p8 }
  0x89   : > { %p4647_p6 = pmov %p4645_p8 }
  0x8a   : > { %3112 = dma.done.wait (%p4646_p13), [#allocation9], 1024  }
  0x8b   : > { %3114 = vsyncadd (%p4647_p6), [#allocation9], 4294966272  ;;  %v3143_v0 = vmov 0   ;;  %v2769_v1 = vld [vmem:[#allocation5 + $0x4] ss:$8 sps:$4 sm:$0xff]   ;;  %v292_v23 = vld [vmem:[%s3379_s28 + $0x10] sm:$0xff] }
  0x8c   : > { %478 = vmatprep.mubr.bf16.mxu0 %v3143_v0  ;;  %598 = vmatprep.mubr.bf16.mxu1 %v3143_v0  ;;  %v2771_v2 = vld [vmem:[#allocation5] ss:$8 sps:$4 sm:$0xff]   ;;  %v2772_v3 = vld [vmem:[#allocation5 + $0x14] ss:$8 sps:$4 sm:$0xff]   ;;  %v2774_v4 = vld [vmem:[#allocation5 + $0x10] ss:$8 sps:$4 sm:$0xff]  }
  0x8d   : > { %446 = vmatprep.subr.bf16.mxu0 %v2769_v1  ;;  %2669 = vmatprep.subr.bf16.mxu1 %v2769_v1  ;;  %v2775_v5 = vld [vmem:[#allocation5 + $0x24] ss:$8 sps:$4 sm:$0xff]   ;;  %v2777_v6 = vld [vmem:[#allocation5 + $0x20] ss:$8 sps:$4 sm:$0xff]   ;;  %v2778_v7 = vld [vmem:[#allocation5 + $0x34] ss:$8 sps:$4 sm:$0xff]  }
  0x8e   : > { %447 = vmatpush1.bf16.msra.mxu0 %v2771_v2  ;;  %2677 = vmatpush1.bf16.msra.mxu1 %v2771_v2  ;;  %v2780_v8 = vld [vmem:[#allocation5 + $0x30] ss:$8 sps:$4 sm:$0xff]   ;;  %v2781_v9 = vld [vmem:[#allocation5 + $0x44] ss:$8 sps:$4 sm:$0xff]   ;;  %v2783_v10 = vld [vmem:[#allocation5 + $0x40] ss:$8 sps:$4 sm:$0xff]   ;;  %v356_v2 = vlaneseq }
  0x8f   : > { %448 = vmatprep.subr.bf16.mxu0 %v2772_v3  ;;  %2670 = vmatprep.subr.bf16.mxu1 %v2772_v3  ;;  %v2784_v11 = vld [vmem:[#allocation5 + $0x54] ss:$8 sps:$4 sm:$0xff]   ;;  %v2786_v12 = vld [vmem:[#allocation5 + $0x50] ss:$8 sps:$4 sm:$0xff]   ;;  %v2787_v13 = vld [vmem:[#allocation5 + $0x64] ss:$8 sps:$4 sm:$0xff]  }
  0x90   : > { %v2789_v14 = vld [vmem:[#allocation5 + $0x60] ss:$8 sps:$4 sm:$0xff]   ;;  %v2790_v15 = vld [vmem:[#allocation5 + $0x74] ss:$8 sps:$4 sm:$0xff]   ;;  %v2792_v16 = vld [vmem:[#allocation5 + $0x70] ss:$8 sps:$4 sm:$0xff]  }
  0x91   : > { %v290_v17 = vld [vmem:[%s3379_s28] sm:$0xff]  ;;  %v291_v18 = vld [vmem:[%s3379_s28 + $0x8] sm:$0xff]  ;;  %v293_v24 = vld [vmem:[%s3379_s28 + $0x18] sm:$0xff]  ;;  %v357_v3 = vshrl.u32 %v356_v2, 7  ;;  %s4470_s30 = scalar_lea.vmem [#allocation10], %s2431_s16  ;;  %s2484_s11 = sshll.u32 %s3198_s22, 12 }
  0x92   : > { %449 = vmatpush1.bf16.msra.mxu0 %v2774_v4  ;;  %2678 = vmatpush1.bf16.msra.mxu1 %v2774_v4  ;;  %v314_v19 = vld [vmem:[%s3379_s28 + $0xc0] sm:$0xff]  ;;  %v315_v20 = vld [vmem:[%s3379_s28 + $0xc8] sm:$0xff]  ;;  %v322_v21 = vpack.c.bf16 %v291_v18, %v290_v17  ;;  %v316_v25 = vld [vmem:[%s3379_s28 + $0xd0] sm:$0xff]  ;;  %v323_v27 = vpack.c.bf16 %v293_v24, %v292_v23  ;;  %s2319_s13 = sshll.u32 %s4470_s30, 4  ;;  %s4535_s27 = scalar_lea.hbm %s4590_s5, %s2484_s11  ;;  %s4537_s13 = int_to_ptr.vmem [resolvable:$true] %s2319_s13 }
  0x93   : > { %450 = vmatprep.subr.bf16.mxu0 %v2775_v5  ;;  %2671 = vmatprep.subr.bf16.mxu1 %v2775_v5  ;;  %v334_v22 = vpack.c.bf16 %v315_v20, %v314_v19  ;;  %v317_v26 = vld [vmem:[%s3379_s28 + $0xd8] sm:$0xff]  ;;  %v294_v29 = vld [vmem:[%s3379_s28 + $0x20] sm:$0xff]  ;;  %v295_v30 = vld [vmem:[%s3379_s28 + $0x28] sm:$0xff]  ;;  %v358_v4 = vsub.s32 0, %v357_v3  ;;  %s2306_s22 = scalar_lea.sflag [#allocation4], %s3373_s12  ;;  %s3059_s16 = scalar_lea.vmem %s4537_s13, 4096 }
  0x94   : > { %v335_v28 = vpack.c.bf16 %v317_v26, %v316_v25  ;;  %v318_v31 = vld [vmem:[%s3379_s28 + $0xe0] sm:$0xff]  ;;  %v319_v32 = vld [vmem:[%s3379_s28 + $0xe8] sm:$0xff]  ;;  %v324_v33 = vpack.c.bf16 %v295_v30, %v294_v29  ;;  %v296_v35 = vld [vmem:[%s3379_s28 + $0x30] sm:$0xff]  ;;  %p3060_p10 = scmp.ne.s32.totalorder %s4537_s13, %s3059_s16  ;;  %s3144_s9 = smov [#allocation10]  }
  0x95   : > { %v336_v34 = vpack.c.bf16 %v319_v32, %v318_v31  ;;  %v297_v36 = vld [vmem:[%s3379_s28 + $0x38] sm:$0xff]  ;;  %v320_v37 = vld [vmem:[%s3379_s28 + $0xf0] sm:$0xff]  ;;  %v298_v41 = vld [vmem:[%s3379_s28 + $0x40] sm:$0xff] }
  0x96   : > { %451 = vmatpush1.bf16.msra.mxu0 %v2777_v6  ;;  %2679 = vmatpush1.bf16.msra.mxu1 %v2777_v6  ;;  %v321_v38 = vld [vmem:[%s3379_s28 + $0xf8] sm:$0xff]  ;;  %v325_v39 = vpack.c.bf16 %v297_v36, %v296_v35  ;;  %v299_v42 = vld [vmem:[%s3379_s28 + $0x48] sm:$0xff]  ;;  %v300_v44 = vld [vmem:[%s3379_s28 + $0x50] sm:$0xff]  ;;  %v362_v6 = vsub.s32 1, %v357_v3  ;;  %p3061_p3 = pnand %p3060_p10, %p3322_p5 }
  0x97   : > { %452 = vmatprep.subr.bf16.mxu0 %v2778_v7  ;;  %2672 = vmatprep.subr.bf16.mxu1 %v2778_v7  ;;  %v337_v40 = vpack.c.bf16 %v321_v38, %v320_v37  ;;  %v326_v43 = vpack.c.bf16 %v299_v42, %v298_v41  ;;  %v301_v45 = vld [vmem:[%s3379_s28 + $0x58] sm:$0xff]  ;;  %v302_v47 = vld [vmem:[%s3379_s28 + $0x60] sm:$0xff]  ;;  %v303_v48 = vld [vmem:[%s3379_s28 + $0x68] sm:$0xff] }
  0x98   : > { %v327_v46 = vpack.c.bf16 %v301_v45, %v300_v44  ;;  %v328_v49 = vpack.c.bf16 %v303_v48, %v302_v47  ;;  %v304_v50 = vld [vmem:[%s3379_s28 + $0x70] sm:$0xff]  ;;  %v305_v51 = vld [vmem:[%s3379_s28 + $0x78] sm:$0xff]  ;;  %v306_v53 = vld [vmem:[%s3379_s28 + $0x80] sm:$0xff]  ;;  %p3062_p7 = pneg %p3061_p3 }
  0x99   : > { %v329_v52 = vpack.c.bf16 %v305_v51, %v304_v50  ;;  %v307_v54 = vld [vmem:[%s3379_s28 + $0x88] sm:$0xff]  ;;  %v308_v56 = vld [vmem:[%s3379_s28 + $0x90] sm:$0xff]  ;;  %v309_v57 = vld [vmem:[%s3379_s28 + $0x98] sm:$0xff] }
  0x9a   : > { %453 = vmatpush1.bf16.msra.mxu0 %v2780_v8  ;;  %2680 = vmatpush1.bf16.msra.mxu1 %v2780_v8  ;;  %v330_v55 = vpack.c.bf16 %v307_v54, %v306_v53  ;;  %v331_v58 = vpack.c.bf16 %v309_v57, %v308_v56  ;;  %v310_v59 = vld [vmem:[%s3379_s28 + $0xa0] sm:$0xff]  ;;  %v311_v60 = vld [vmem:[%s3379_s28 + $0xa8] sm:$0xff]  ;;  %v312_v62 = vld [vmem:[%s3379_s28 + $0xb0] sm:$0xff] }
  0x9b   : > { %454 = vmatprep.subr.bf16.mxu0 %v2781_v9  ;;  %2673 = vmatprep.subr.bf16.mxu1 %v2781_v9  ;;  %v332_v61 = vpack.c.bf16 %v311_v60, %v310_v59  ;;  %v313_v63 = vld [vmem:[%s3379_s28 + $0xb8] sm:$0xff]  ;;  %v354_v5 = vld [vmem:[%s4589_s4] sm:$0x3]  ;;  %s3063_s28 = sshll.u32 %s3144_s9, 4  ;;  %s3064_s28 = int_to_ptr.vmem [resolvable:$false] %s3063_s28 }
  0x9c   : > { %v333_v1 = vpack.c.bf16 %v313_v63, %v312_v62  ;;  %v3444_v7 = vrot.slane %v354_v5, %v358_v4  ;;  %v3446_v8 = vrot.slane %v354_v5, %v362_v6  ;;  %s3065_s24 = scalar_lea.vmem %s3064_s28, 8192  ;;  %p3066_p12 = scmp.lt.s32.totalorder %s4537_s13, %s3064_s28 }
  0x9d   : > { %p3067_p1 = scmp.lt.s32.totalorder %s3065_s24, %s3059_s16 }
  0x9e   : > { %455 = vmatpush1.bf16.msra.mxu0 %v2783_v10  ;;  %2681 = vmatpush1.bf16.msra.mxu1 %v2783_v10 }
  0x9f   : > { %456 = vmatprep.subr.bf16.mxu0 %v2784_v11  ;;  %2674 = vmatprep.subr.bf16.mxu1 %v2784_v11  ;;  %p3068_p2 = por %p3067_p1, %p3066_p12 }
  0xa1   : > { %p3069_p4 = pnand %p3068_p2, %p3062_p7 }
  0xa2   : > { %457 = vmatpush1.bf16.msra.mxu0 %v2786_v12  ;;  %2682 = vmatpush1.bf16.msra.mxu1 %v2786_v12 }
  0xa3   : > { %458 = vmatprep.subr.bf16.mxu0 %v2787_v13  ;;  %2675 = vmatprep.subr.bf16.mxu1 %v2787_v13 }
  0xa6   : > { %459 = vmatpush1.bf16.msra.mxu0 %v2789_v14  ;;  %2683 = vmatpush1.bf16.msra.mxu1 %v2789_v14 }
  0xa7   : > { %460 = vmatprep.subr.bf16.mxu0 %v2790_v15  ;;  %2676 = vmatprep.subr.bf16.mxu1 %v2790_v15 }
  0xaa   : > { %461 = vmatpush1.bf16.msra.mxu0 %v2792_v16  ;;  %2684 = vmatpush1.bf16.msra.mxu1 %v2792_v16 }
  0xad   : > { %479 = vmatmul.mubr.bf16.vlgmr.msra.gmra.mrb[0].mxu0 %v322_v21  ;;  %599 = vmatmul.mubr.bf16.vlgmr.msra.gmra.mrb[0].mxu1 %v334_v22 }
  0xae   : > { %488 = vmatprep.mubr.bf16.mxu0 %v3143_v0  ;;  %608 = vmatprep.mubr.bf16.mxu1 %v3143_v0 }
  0xb5   : > { %489 = vmatmul.mubr.bf16.gmra.mrb[4].mxu0 %v323_v27  ;;  %609 = vmatmul.mubr.bf16.gmra.mrb[4].mxu1 %v335_v28 }
  0xb6   : > { %498 = vmatprep.mubr.bf16.mxu0 %v3143_v0  ;;  %618 = vmatprep.mubr.bf16.mxu1 %v3143_v0 }
  0xbd   : > { %499 = vmatmul.mubr.bf16.gmra.mrb[8].mxu0 %v324_v33  ;;  %619 = vmatmul.mubr.bf16.gmra.mrb[8].mxu1 %v336_v34 }
  0xbe   : > { %508 = vmatprep.mubr.bf16.mxu0 %v3143_v0  ;;  %628 = vmatprep.mubr.bf16.mxu1 %v3143_v0 }
  0xc5   : > { %509 = vmatmul.mubr.bf16.gmra.mrb[12].mxu0 %v325_v39  ;;  %629 = vmatmul.mubr.bf16.gmra.mrb[12].mxu1 %v337_v40 }
  0xc6   : > { %518 = vmatprep.mubr.bf16.mxu0 %v3143_v0 }
  0xcd   : > { %519 = vmatmul.mubr.bf16.gmra.mrb[16].mxu0 %v326_v43 }
  0xce   : > { %528 = vmatprep.mubr.bf16.mxu0 %v3143_v0 }
  0xd5   : > { %529 = vmatmul.mubr.bf16.gmra.mrb[20].mxu0 %v327_v46 }
  0xd6   : > { %538 = vmatprep.mubr.bf16.mxu0 %v3143_v0 }
  0xdd   : > { %539 = vmatmul.mubr.bf16.gmra.mrb[24].mxu0 %v328_v49 }
  0xde   : > { %548 = vmatprep.mubr.bf16.mxu0 %v3143_v0 }
  0xe5   : > { %549 = vmatmul.mubr.bf16.gmra.mrb[28].mxu0 %v329_v52 }
  0xe6   : > { %558 = vmatprep.mubr.bf16.mxu0 %v3143_v0 }
  0xed   : > { %559 = vmatmul.mubr.bf16.gmra.mrb[32].mxu0 %v330_v55 }
  0xee   : > { %568 = vmatprep.mubr.bf16.mxu0 %v3143_v0 }
  0xf5   : > { %569 = vmatmul.mubr.bf16.gmra.mrb[36].mxu0 %v331_v58 }
  0xf6   : > { %578 = vmatprep.mubr.bf16.mxu0 %v3143_v0 }
  0xfd   : > { %579 = vmatmul.mubr.bf16.gmra.mrb[40].mxu0 %v332_v61 }
  0xfe   : > { %588 = vmatprep.mubr.bf16.mxu0 %v3143_v0 }
 0x105   : > { %589 = vmatmul.mubr.bf16.gmra.mrb[44].mxu0 %v333_v1 }
 0x180   : > { %v480_v9 = vpop.f32.mrb[0].mxu0 }
 0x181   : > { %v481_v10 = vadd.f32 %v480_v9, %v3444_v7  ;;  %v482_v0 = vpop.f32.mrb[1].mxu0 }
 0x182   : > { %v483_v11 = vadd.f32 %v482_v0, %v3446_v8  ;;  %v484_v12 = vpop.f32.mrb[2].mxu0 }
 0x183   : > { %v639_v13 = vmul.f32 0.01, %v481_v10  ;;  %v485_v14 = vadd.f32 %v484_v12, %v3444_v7  ;;  %v486_v15 = vpop.f32.mrb[3].mxu0 }
 0x184   : > { %v640_v16 = vmul.f32 0.01, %v483_v11  ;;  %v487_v17 = vadd.f32 %v486_v15, %v3446_v8 }
 0x185   : > { %v641_v18 = vmul.f32 0.01, %v485_v14  ;;  %v3452_v19 = vmax.f32 %v481_v10, %v639_v13 }
 0x186   : > { %v642_v20 = vmul.f32 0.01, %v487_v17  ;;  %v3454_v21 = vmax.f32 %v483_v11, %v640_v16 }
 0x187   : > { %v3456_v22 = vmax.f32 %v485_v14, %v641_v18  ;;  %v3504_v14 = vpop.f32.mrb[0].mxu1 }
 0x188   : > { %v3458_v23 = vmax.f32 %v487_v17, %v642_v20  ;;  %v490_v24 = vpop.f32.mrb[4].mxu0  ;;  %v767_v25 = vadd.f32 %v3454_v21, %v3452_v19  ;;  %v3512_v20 = vpop.f32.mrb[1].mxu1 }
 0x189   : > { %v491_v26 = vadd.f32 %v490_v24, %v3444_v7  ;;  %v492_v27 = vpop.f32.mrb[5].mxu0 }
 0x18a   : > { %v493_v28 = vadd.f32 %v492_v27, %v3446_v8  ;;  %v494_v29 = vpop.f32.mrb[6].mxu0  ;;  %768 = vadd.xlane.f32.xlu0 %v767_v25  ;;  %v770_v35 = vadd.f32 %v3458_v23, %v3456_v22 }
 0x18b   : > { %v643_v30 = vmul.f32 0.01, %v491_v26  ;;  %v495_v31 = vadd.f32 %v494_v29, %v3444_v7  ;;  %v496_v32 = vpop.f32.mrb[7].mxu0 }
 0x18c   : > { %v644_v33 = vmul.f32 0.01, %v493_v28  ;;  %v497_v34 = vadd.f32 %v496_v32, %v3446_v8 }
 0x18d   : > { %v645_v36 = vmul.f32 0.01, %v495_v31  ;;  %v3468_v37 = vmax.f32 %v491_v26, %v643_v30  ;;  %v3515_v26 = vpop.f32.mrb[2].mxu1 }
 0x18e   : > { %v646_v38 = vmul.f32 0.01, %v497_v34  ;;  %771 = vadd.xlane.f32.xlu0 %v770_v35  ;;  %v3470_v39 = vmax.f32 %v493_v28, %v644_v33  ;;  %v3520_v30 = vpop.f32.mrb[3].mxu1 }
 0x18f   : > { %v3472_v40 = vmax.f32 %v495_v31, %v645_v36 }
 0x190   : > { %v3474_v41 = vmax.f32 %v497_v34, %v646_v38  ;;  %v500_v42 = vpop.f32.mrb[8].mxu0  ;;  %v773_v43 = vadd.f32 %v3470_v39, %v3468_v37 }
 0x191   : > { %v501_v44 = vadd.f32 %v500_v42, %v3444_v7  ;;  %v502_v45 = vpop.f32.mrb[9].mxu0 }
 0x192   : > { %v503_v46 = vadd.f32 %v502_v45, %v3446_v8  ;;  %v504_v47 = vpop.f32.mrb[10].mxu0  ;;  %774 = vadd.xlane.f32.xlu1 %v773_v43  ;;  %v776_v53 = vadd.f32 %v3474_v41, %v3472_v40 }
 0x193   : > { %v647_v48 = vmul.f32 0.01, %v501_v44  ;;  %v505_v49 = vadd.f32 %v504_v47, %v3444_v7  ;;  %v506_v50 = vpop.f32.mrb[11].mxu0 }
 0x194   : > { %v648_v51 = vmul.f32 0.01, %v503_v46  ;;  %v507_v52 = vadd.f32 %v506_v50, %v3446_v8 }
 0x195   : > { %v3484_v54 = vmax.f32 %v501_v44, %v647_v48  ;;  %v649_v55 = vmul.f32 0.01, %v505_v49  ;;  %v3528_v44 = vpop.f32.mrb[4].mxu1 }
 0x196   : > { %v3486_v56 = vmax.f32 %v503_v46, %v648_v51  ;;  %v650_v57 = vmul.f32 0.01, %v507_v52  ;;  %777 = vadd.xlane.f32.xlu1 %v776_v53 }
 0x197   : > { %v3488_v58 = vmax.f32 %v505_v49, %v649_v55  ;;  %v3536_v49 = vpop.f32.mrb[5].mxu1 }
 0x198   : > { %v3490_v59 = vmax.f32 %v507_v52, %v650_v57  ;;  %v510_v60 = vpop.f32.mrb[12].mxu0  ;;  %v779_v61 = vadd.f32 %v3486_v56, %v3484_v54  ;;  %v3539_v52 = vpop.f32.mrb[6].mxu1 }
 0x199   : > { %v511_v62 = vadd.f32 %v510_v60, %v3444_v7  ;;  %v512_v63 = vpop.f32.mrb[13].mxu0  ;;  %v3544_v60 = vpop.f32.mrb[7].mxu1 }
 0x19a   : > { %v513_v1 = vadd.f32 %v512_v63, %v3446_v8  ;;  %v514_v2 = vpop.f32.mrb[14].mxu0  ;;  %780 = vadd.xlane.f32.xlu0 %v779_v61  ;;  %v782_v3 = vadd.f32 %v3490_v59, %v3488_v58 }
 0x19b   : > { %v651_v4 = vmul.f32 0.01, %v511_v62  ;;  %v515_v5 = vadd.f32 %v514_v2, %v3444_v7  ;;  %v516_v6 = vpop.f32.mrb[15].mxu0 }
 0x19c   : > { %v652_v9 = vmul.f32 0.01, %v513_v1  ;;  %v517_v10 = vadd.f32 %v516_v6, %v3446_v8  ;;  %783 = vadd.xlane.f32.xlu1 %v782_v3 }
 0x19d   : > { %v3500_v0 = vmax.f32 %v511_v62, %v651_v4  ;;  %v653_v11 = vmul.f32 0.01, %v515_v5 }
 0x19e   : > { %v3502_v12 = vmax.f32 %v513_v1, %v652_v9  ;;  %v654_v13 = vmul.f32 0.01, %v517_v10 }
 0x19f   : > { %v3506_v15 = vmax.f32 %v515_v5, %v653_v11  ;;  %v3550_v5 = vpop.f32.mrb[8].mxu1 }
 0x1a0   : > { %v3508_v16 = vmax.f32 %v517_v10, %v654_v13  ;;  %v520_v17 = vpop.f32.mrb[16].mxu0  ;;  %v785_v18 = vadd.f32 %v3502_v12, %v3500_v0 }
 0x1a1   : > { %v521_v24 = vadd.f32 %v520_v17, %v3444_v7  ;;  %v522_v25 = vpop.f32.mrb[17].mxu0 }
 0x1a2   : > { %v523_v27 = vadd.f32 %v522_v25, %v3446_v8  ;;  %v524_v28 = vpop.f32.mrb[18].mxu0  ;;  %786 = vadd.xlane.f32.xlu0 %v785_v18  ;;  %v788_v29 = vadd.f32 %v3508_v16, %v3506_v15  ;;  %v3560_v18 = vpop.f32.mrb[9].mxu1 }
 0x1a3   : > { %v655_v31 = vmul.f32 0.01, %v521_v24  ;;  %v525_v32 = vadd.f32 %v524_v28, %v3444_v7  ;;  %v526_v33 = vpop.f32.mrb[19].mxu0 }
 0x1a4   : > { %v656_v34 = vmul.f32 0.01, %v523_v27  ;;  %v527_v35 = vadd.f32 %v526_v33, %v3446_v8  ;;  %789 = vadd.xlane.f32.xlu1 %v788_v29 }
 0x1a5   : > { %v3524_v36 = vmax.f32 %v521_v24, %v655_v31  ;;  %v657_v38 = vmul.f32 0.01, %v525_v32  ;;  %v3566_v31 = vpop.f32.mrb[10].mxu1 }
 0x1a6   : > { %v3526_v42 = vmax.f32 %v523_v27, %v656_v34  ;;  %v658_v43 = vmul.f32 0.01, %v527_v35 }
 0x1a7   : > { %v3530_v45 = vmax.f32 %v525_v32, %v657_v38 }
 0x1a8   : > { %v3532_v46 = vmax.f32 %v527_v35, %v658_v43  ;;  %v530_v47 = vpop.f32.mrb[20].mxu0  ;;  %v791_v48 = vadd.f32 %v3526_v42, %v3524_v36  ;;  %v3569_v35 = vpop.f32.mrb[11].mxu1 }
 0x1a9   : > { %v531_v50 = vadd.f32 %v530_v47, %v3444_v7  ;;  %v532_v51 = vpop.f32.mrb[21].mxu0 }
 0x1aa   : > { %v533_v53 = vadd.f32 %v532_v51, %v3446_v8  ;;  %v534_v55 = vpop.f32.mrb[22].mxu0  ;;  %792 = vadd.xlane.f32.xlu0 %v791_v48  ;;  %v794_v57 = vadd.f32 %v3532_v46, %v3530_v45 }
 0x1ab   : > { %v659_v61 = vmul.f32 0.01, %v531_v50  ;;  %v535_v62 = vadd.f32 %v534_v55, %v3444_v7  ;;  %v536_v63 = vpop.f32.mrb[23].mxu0 }
 0x1ac   : > { %v660_v1 = vmul.f32 0.01, %v533_v53  ;;  %v537_v2 = vadd.f32 %v536_v63, %v3446_v8  ;;  %795 = vadd.xlane.f32.xlu1 %v794_v57 }
 0x1ad   : > { %v3548_v3 = vmax.f32 %v531_v50, %v659_v61  ;;  %v661_v4 = vmul.f32 0.01, %v535_v62  ;;  %v3574_v50 = vpop.f32.mrb[12].mxu1 }
 0x1ae   : > { %v3552_v6 = vmax.f32 %v533_v53, %v660_v1  ;;  %v662_v9 = vmul.f32 0.01, %v537_v2 }
 0x1af   : > { %v3554_v10 = vmax.f32 %v535_v62, %v661_v4 }
 0x1b0   : > { %v3556_v11 = vmax.f32 %v537_v2, %v662_v9  ;;  %v540_v13 = vpop.f32.mrb[24].mxu0  ;;  %v797_v17 = vadd.f32 %v3552_v6, %v3548_v3  ;;  %v3585_v2 = vpop.f32.mrb[13].mxu1 }
 0x1b1   : > { %v541_v24 = vadd.f32 %v540_v13, %v3444_v7  ;;  %v542_v25 = vpop.f32.mrb[25].mxu0 }
 0x1b2   : > { %v543_v27 = vadd.f32 %v542_v25, %v3446_v8  ;;  %v544_v28 = vpop.f32.mrb[26].mxu0  ;;  %798 = vadd.xlane.f32.xlu0 %v797_v17  ;;  %v800_v29 = vadd.f32 %v3556_v11, %v3554_v10  ;;  %v3590_v17 = vpop.f32.mrb[14].mxu1 }
 0x1b3   : > { %v663_v32 = vmul.f32 0.01, %v541_v24  ;;  %v545_v33 = vadd.f32 %v544_v28, %v3444_v7  ;;  %v546_v34 = vpop.f32.mrb[27].mxu0  ;;  %v3593_v28 = vpop.f32.mrb[15].mxu1 }
 0x1b4   : > { %v664_v38 = vmul.f32 0.01, %v543_v27  ;;  %v547_v43 = vadd.f32 %v546_v34, %v3446_v8  ;;  %801 = vadd.xlane.f32.xlu1 %v800_v29 }
 0x1b5   : > { %v3572_v47 = vmax.f32 %v541_v24, %v663_v32  ;;  %v665_v48 = vmul.f32 0.01, %v545_v33 }
 0x1b6   : > { %v3576_v51 = vmax.f32 %v543_v27, %v664_v38  ;;  %v666_v53 = vmul.f32 0.01, %v547_v43 }
 0x1b7   : > { %v3578_v55 = vmax.f32 %v545_v33, %v665_v48 }
 0x1b8   : > { %v3580_v57 = vmax.f32 %v547_v43, %v666_v53  ;;  %v550_v61 = vpop.f32.mrb[28].mxu0  ;;  %v803_v62 = vadd.f32 %v3576_v51, %v3572_v47 }
 0x1b9   : > { %v551_v63 = vadd.f32 %v550_v61, %v3444_v7  ;;  %v552_v1 = vpop.f32.mrb[29].mxu0 }
 0x1ba   : > { %v553_v4 = vadd.f32 %v552_v1, %v3446_v8  ;;  %v554_v9 = vpop.f32.mrb[30].mxu0  ;;  %804 = vadd.xlane.f32.xlu0 %v803_v62  ;;  %v806_v13 = vadd.f32 %v3580_v57, %v3578_v55 }
 0x1bb   : > { %v667_v24 = vmul.f32 0.01, %v551_v63  ;;  %v555_v25 = vadd.f32 %v554_v9, %v3444_v7  ;;  %v556_v27 = vpop.f32.mrb[31].mxu0 }
 0x1bc   : > { %v668_v29 = vmul.f32 0.01, %v553_v4  ;;  %v557_v32 = vadd.f32 %v556_v27, %v3446_v8  ;;  %807 = vadd.xlane.f32.xlu1 %v806_v13 }
 0x1bd   : > { %v3596_v33 = vmax.f32 %v551_v63, %v667_v24  ;;  %v669_v34 = vmul.f32 0.01, %v555_v25 }
 0x1be   : > { %v3598_v38 = vmax.f32 %v553_v4, %v668_v29  ;;  %v670_v43 = vmul.f32 0.01, %v557_v32 }
 0x1bf   : > { %4648 = vst [vmem:[#allocation15_spill] sm:$0xff] %v3596_v33  ;;  %v3600_v48 = vmax.f32 %v555_v25, %v669_v34 }
 0x1c0   : > { %4649 = vst [vmem:[#allocation16_spill] sm:$0xff] %v3598_v38  ;;  %v3602_v53 = vmax.f32 %v557_v32, %v670_v43  ;;  %v560_v61 = vpop.f32.mrb[32].mxu0  ;;  %v809_v62 = vadd.f32 %v3598_v38, %v3596_v33 }
 0x1c1   : > { %4650 = vst [vmem:[#allocation17_spill] sm:$0xff] %v3600_v48  ;;  %v561_v1 = vadd.f32 %v560_v61, %v3444_v7  ;;  %v562_v9 = vpop.f32.mrb[33].mxu0 }
 0x1c2   : > { %4651 = vst [vmem:[#allocation18_spill] sm:$0xff] %v3602_v53  ;;  %v563_v27 = vadd.f32 %v562_v9, %v3446_v8  ;;  %v564_v13 = vpop.f32.mrb[34].mxu0  ;;  %810 = vadd.xlane.f32.xlu0 %v809_v62  ;;  %v812_v63 = vadd.f32 %v3602_v53, %v3600_v48 }
 0x1c3   : > { %v671_v4 = vmul.f32 0.01, %v561_v1  ;;  %v565_v24 = vadd.f32 %v564_v13, %v3444_v7  ;;  %v566_v25 = vpop.f32.mrb[35].mxu0 }
 0x1c4   : > { %v672_v29 = vmul.f32 0.01, %v563_v27  ;;  %v567_v32 = vadd.f32 %v566_v25, %v3446_v8  ;;  %813 = vadd.xlane.f32.xlu1 %v812_v63 }
 0x1c5   : > { %v3612_v34 = vmax.f32 %v561_v1, %v671_v4  ;;  %v673_v43 = vmul.f32 0.01, %v565_v24 }
 0x1c6   : > { %v3614_v61 = vmax.f32 %v563_v27, %v672_v29  ;;  %v674_v38 = vmul.f32 0.01, %v567_v32 }
 0x1c7   : > { %4652 = vst [vmem:[#allocation19_spill] sm:$0xff] %v3612_v34  ;;  %v3616_v9 = vmax.f32 %v565_v24, %v673_v43 }
 0x1c8   : > { %4653 = vst [vmem:[#allocation20_spill] sm:$0xff] %v3614_v61  ;;  %v3618_v62 = vmax.f32 %v567_v32, %v674_v38  ;;  %v570_v33 = vpop.f32.mrb[36].mxu0  ;;  %v815_v53 = vadd.f32 %v3614_v61, %v3612_v34 }
 0x1c9   : > { %4654 = vst [vmem:[#allocation21_spill] sm:$0xff] %v3616_v9  ;;  %v571_v13 = vadd.f32 %v570_v33, %v3444_v7  ;;  %v572_v48 = vpop.f32.mrb[37].mxu0 }
 0x1ca   : > { %4655 = vst [vmem:[#allocation22_spill] sm:$0xff] %v3618_v62  ;;  %v573_v25 = vadd.f32 %v572_v48, %v3446_v8  ;;  %v574_v63 = vpop.f32.mrb[38].mxu0  ;;  %816 = vadd.xlane.f32.xlu0 %v815_v53  ;;  %v818_v1 = vadd.f32 %v3618_v62, %v3616_v9 }
 0x1cb   : > { %v675_v27 = vmul.f32 0.01, %v571_v13  ;;  %v575_v4 = vadd.f32 %v574_v63, %v3444_v7  ;;  %v576_v24 = vpop.f32.mrb[39].mxu0 }
 0x1cc   : > { %v676_v38 = vmul.f32 0.01, %v573_v25  ;;  %v577_v29 = vadd.f32 %v576_v24, %v3446_v8  ;;  %819 = vadd.xlane.f32.xlu1 %v818_v1 }
 0x1cd   : > { %v3628_v32 = vmax.f32 %v571_v13, %v675_v27  ;;  %v677_v43 = vmul.f32 0.01, %v575_v4 }
 0x1ce   : > { %v3630_v33 = vmax.f32 %v573_v25, %v676_v38  ;;  %v678_v61 = vmul.f32 0.01, %v577_v29 }
 0x1cf   : > { %v3632_v48 = vmax.f32 %v575_v4, %v677_v43 }
 0x1d0   : > { %4656 = vst [vmem:[#allocation23_spill] sm:$0xff] %v3630_v33  ;;  %v3634_v53 = vmax.f32 %v577_v29, %v678_v61  ;;  %v580_v34 = vpop.f32.mrb[40].mxu0  ;;  %v821_v62 = vadd.f32 %v3630_v33, %v3628_v32 }
 0x1d1   : > { %4657 = vst [vmem:[#allocation24_spill] sm:$0xff] %v3632_v48  ;;  %v581_v63 = vadd.f32 %v580_v34, %v3444_v7  ;;  %v582_v9 = vpop.f32.mrb[41].mxu0 }
 0x1d2   : > { %4658 = vst [vmem:[#allocation25_spill] sm:$0xff] %v3634_v53  ;;  %v583_v24 = vadd.f32 %v582_v9, %v3446_v8  ;;  %v584_v1 = vpop.f32.mrb[42].mxu0  ;;  %822 = vadd.xlane.f32.xlu0 %v821_v62  ;;  %v824_v13 = vadd.f32 %v3634_v53, %v3632_v48 }
 0x1d3   : > { %v679_v25 = vmul.f32 0.01, %v581_v63  ;;  %v585_v27 = vadd.f32 %v584_v1, %v3444_v7  ;;  %v586_v4 = vpop.f32.mrb[43].mxu0 }
 0x1d4   : > { %v680_v61 = vmul.f32 0.01, %v583_v24  ;;  %v587_v38 = vadd.f32 %v586_v4, %v3446_v8  ;;  %825 = vadd.xlane.f32.xlu1 %v824_v13 }
 0x1d5   : > { %v3644_v29 = vmax.f32 %v581_v63, %v679_v25  ;;  %v681_v43 = vmul.f32 0.01, %v585_v27  ;;  %v2793_v25 = vld [vmem:[#allocation7 + $0x40] sm:$0xff]  }
 0x1d6   : > { %v3646_v34 = vmax.f32 %v583_v24, %v680_v61  ;;  %v682_v33 = vmul.f32 0.01, %v587_v38  ;;  %v2794_v24 = vld [vmem:[#allocation7] sm:$0xff]   ;;  %v2795_v61 = vld [vmem:[#allocation7 + $0x48] sm:$0xff]   ;;  %2485 = vmatprep.subr.bf16.mxu1 %v2793_v25 }
 0x1d7   : > { %4659 = vst [vmem:[#allocation26_spill] sm:$0xff] %v3644_v29  ;;  %v3648_v9 = vmax.f32 %v585_v27, %v681_v43  ;;  %2486 = vmatpush3.bf16.msra.mxu1 %v2794_v24  ;;  %v2796_v27 = vld [vmem:[#allocation7 + $0x8] sm:$0xff]  }
 0x1d8   : > { %4660 = vst [vmem:[#allocation27_spill] sm:$0xff] %v3646_v34  ;;  %v3650_v62 = vmax.f32 %v587_v38, %v682_v33  ;;  %v827_v53 = vadd.f32 %v3646_v34, %v3644_v29  ;;  %v590_v48 = vpop.f32.mrb[44].mxu0  ;;  %2487 = vmatprep.subr.bf16.mxu1 %v2795_v61 }
 0x1d9   : > { %4661 = vst [vmem:[#allocation28_spill] sm:$0xff] %v3648_v9  ;;  %v592_v1 = vpop.f32.mrb[45].mxu0  ;;  %v591_v33 = vadd.f32 %v590_v48, %v3444_v7  ;;  %v601_v48 = vadd.f32 %v3504_v14, %v3444_v7 }
 0x1da   : > { %4662 = vst [vmem:[#allocation29_spill] sm:$0xff] %v3650_v62  ;;  %828 = vadd.xlane.f32.xlu0 %v827_v53  ;;  %v830_v4 = vadd.f32 %v3650_v62, %v3648_v9  ;;  %v594_v13 = vpop.f32.mrb[46].mxu0  ;;  %v593_v38 = vadd.f32 %v592_v1, %v3446_v8  ;;  %v603_v1 = vadd.f32 %v3512_v20, %v3446_v8 }
 0x1db   : > { %v596_v63 = vpop.f32.mrb[47].mxu0  ;;  %2488 = vmatpush3.bf16.msra.mxu1 %v2796_v27  ;;  %v683_v43 = vmul.f32 0.01, %v591_v33  ;;  %v595_v62 = vadd.f32 %v594_v13, %v3444_v7 }
 0x1dc   : > { %831 = vadd.xlane.f32.xlu1 %v830_v4  ;;  %v684_v29 = vmul.f32 0.01, %v593_v38  ;;  %v597_v25 = vadd.f32 %v596_v63, %v3446_v8 }
 0x1dd   : > { %v3666_v24 = vmax.f32 %v591_v33, %v683_v43 }
 0x1de   : > { %v3672_v27 = vmax.f32 %v593_v38, %v684_v29  ;;  %v686_v63 = vmul.f32 0.01, %v597_v25  ;;  %v688_v29 = vmul.f32 0.01, %v603_v1 }
 0x217   : > { %v769_v53 = vpop.xlane.xlu0 %768 }
 0x218   : > { %v864_v34 = vmul.f32 0.00390625, %v769_v53  ;;  %v687_v53 = vmul.f32 0.01, %v601_v48 }
 0x21a   : > { %v3660_v4 = vsub.f32 %v3452_v19, %v864_v34  ;;  %v3663_v9 = vsub.f32 %v3454_v21, %v864_v34  ;;  %v685_v34 = vmul.f32 0.01, %v595_v62 }
 0x21b   : > { %v772_v61 = vpop.xlane.xlu0 %771 }
 0x21c   : > { %4663 = vst [vmem:[#allocation30_spill] sm:$0xff] %v3660_v4  ;;  %4664 = vst [vmem:[#allocation31_spill] sm:$0xff] %v3663_v9  ;;  %v865_v13 = vmul.f32 0.00390625, %v772_v61  ;;  %v960_v19 = vmul.f32 %v3660_v4, %v3660_v4  ;;  %v961_v21 = vmul.f32 %v3663_v9, %v3663_v9  ;;  %v833_v61 = vadd.f32 %v3672_v27, %v3666_v24 }
 0x21e   : > { %v3679_v33 = vsub.f32 %v3456_v22, %v865_v13  ;;  %v3682_v43 = vsub.f32 %v3458_v23, %v865_v13  ;;  %v1024_v14 = vadd.f32 %v961_v21, %v960_v19  ;;  %v3690_v22 = vmax.f32 %v595_v62, %v685_v34 }
 0x21f   : > { %v775_v20 = vpop.xlane.xlu1 %774  ;;  %v605_v23 = vadd.f32 %v3515_v26, %v3444_v7  ;;  %v607_v13 = vadd.f32 %v3520_v30, %v3446_v8  ;;  %v3696_v19 = vmax.f32 %v597_v25, %v686_v63  ;;  %v611_v26 = vadd.f32 %v3528_v44, %v3444_v7 }
 0x220   : > { %4665 = vst [vmem:[#allocation32_spill] sm:$0xff] %v3679_v33  ;;  %4666 = vst [vmem:[#allocation33_spill] sm:$0xff] %v3682_v43  ;;  %v866_v38 = vmul.f32 0.00390625, %v775_v20  ;;  %1025 = vadd.xlane.f32.xlu0 %v1024_v14  ;;  %v962_v9 = vmul.f32 %v3679_v33, %v3679_v33  ;;  %v963_v4 = vmul.f32 %v3682_v43, %v3682_v43 }
 0x221   : > { %v3704_v33 = vmax.f32 %v601_v48, %v687_v53  ;;  %v3706_v43 = vmax.f32 %v603_v1, %v688_v29  ;;  %v690_v25 = vmul.f32 0.01, %v607_v13  ;;  %v836_v1 = vadd.f32 %v3696_v19, %v3690_v22 }
 0x222   : > { %v3699_v21 = vsub.f32 %v3468_v37, %v866_v38  ;;  %v3702_v14 = vsub.f32 %v3470_v39, %v866_v38  ;;  %v1027_v20 = vadd.f32 %v963_v4, %v962_v9  ;;  %v689_v39 = vmul.f32 0.01, %v605_v23 }
 0x223   : > { %v778_v62 = vpop.xlane.xlu1 %777  ;;  %v613_v9 = vadd.f32 %v3536_v49, %v3446_v8  ;;  %v691_v63 = vmul.f32 0.01, %v611_v26  ;;  %v615_v29 = vadd.f32 %v3539_v52, %v3444_v7  ;;  %v839_v38 = vadd.f32 %v3706_v43, %v3704_v33 }
 0x224   : > { %v867_v34 = vmul.f32 0.00390625, %v778_v62  ;;  %834 = vadd.xlane.f32.xlu0 %v833_v61  ;;  %1028 = vadd.xlane.f32.xlu1 %v1027_v20  ;;  %v964_v30 = vmul.f32 %v3699_v21, %v3699_v21  ;;  %v965_v37 = vmul.f32 %v3702_v14, %v3702_v14  ;;  %v3734_v20 = vmax.f32 %v605_v23, %v689_v39 }
 0x225   : > { %v3736_v62 = vmax.f32 %v607_v13, %v690_v25  ;;  %v692_v52 = vmul.f32 0.01, %v613_v9  ;;  %v2797_v25 = vld [vmem:[#allocation7 + $0x50] sm:$0xff]  }
 0x226   : > { %v3717_v4 = vsub.f32 %v3472_v40, %v867_v34  ;;  %v3720_v48 = vsub.f32 %v3474_v41, %v867_v34  ;;  %v1030_v44 = vadd.f32 %v965_v37, %v964_v30  ;;  %v617_v40 = vadd.f32 %v3544_v60, %v3446_v8  ;;  %2489 = vmatprep.subr.bf16.mxu1 %v2797_v25  ;;  %v2800_v25 = vld [vmem:[#allocation7 + $0x18] sm:$0xff]  }
 0x227   : > { %v781_v53 = vpop.xlane.xlu0 %780  ;;  %v3754_v39 = vmax.f32 %v613_v9, %v692_v52 }
 0x228   : > { %4667 = vst [vmem:[#allocation34_spill] sm:$0xff] %v3717_v4  ;;  %v868_v61 = vmul.f32 0.00390625, %v781_v53  ;;  %1031 = vadd.xlane.f32.xlu0 %v1030_v44  ;;  %837 = vadd.xlane.f32.xlu1 %v836_v1  ;;  %v966_v41 = vmul.f32 %v3717_v4, %v3717_v4  ;;  %v967_v49 = vmul.f32 %v3720_v48, %v3720_v48  ;;  %v693_v53 = vmul.f32 0.01, %v615_v29 }
 0x229   : > { %v784_v34 = vpop.xlane.xlu1 %783  ;;  %v3744_v1 = vmax.f32 %v611_v26, %v691_v63  ;;  %v694_v13 = vmul.f32 0.01, %v617_v40  ;;  %v623_v26 = vadd.f32 %v3560_v18, %v3446_v8  ;;  %v627_v18 = vadd.f32 %v3569_v35, %v3446_v8 }
 0x22a   : > { %v3739_v30 = vsub.f32 %v3484_v54, %v868_v61  ;;  %v3742_v37 = vsub.f32 %v3486_v56, %v868_v61  ;;  %v869_v44 = vmul.f32 0.00390625, %v784_v34  ;;  %v1033_v60 = vadd.f32 %v967_v49, %v966_v41 }
 0x22b   : > { %v621_v56 = vadd.f32 %v3550_v5, %v3444_v7  ;;  %v625_v5 = vadd.f32 %v3566_v31, %v3444_v7  ;;  %v3772_v49 = vmax.f32 %v615_v29, %v693_v53  ;;  %v3774_v34 = vmax.f32 %v617_v40, %v694_v13 }
 0x22c   : > { %v3747_v4 = vsub.f32 %v3488_v58, %v869_v44  ;;  %v3750_v23 = vsub.f32 %v3490_v59, %v869_v44  ;;  %840 = vadd.xlane.f32.xlu0 %v839_v38  ;;  %1034 = vadd.xlane.f32.xlu1 %v1033_v60  ;;  %v968_v54 = vmul.f32 %v3739_v30, %v3739_v30  ;;  %v2798_v38 = vld [vmem:[#allocation7 + $0x10] sm:$0xff]   ;;  %v696_v60 = vmul.f32 0.01, %v623_v26 }
 0x22d   : > { %v969_v58 = vmul.f32 %v3742_v37, %v3742_v37  ;;  %v842_v59 = vadd.f32 %v3736_v62, %v3734_v20  ;;  %2490 = vmatpush3.bf16.msra.mxu1 %v2798_v38  ;;  %v695_v44 = vmul.f32 0.01, %v621_v56  ;;  %v698_v40 = vmul.f32 0.01, %v627_v18 }
 0x22e   : > { %4668 = vst [vmem:[#allocation35_spill] sm:$0xff] %v3747_v4  ;;  %v970_v63 = vmul.f32 %v3747_v4, %v3747_v4  ;;  %v971_v9 = vmul.f32 %v3750_v23, %v3750_v23  ;;  %v631_v13 = vadd.f32 %v3574_v50, %v3444_v7  ;;  %v633_v50 = vadd.f32 %v3585_v2, %v3446_v8 }
 0x22f   : > { %v787_v61 = vpop.xlane.xlu0 %786  ;;  %v1036_v41 = vadd.f32 %v969_v58, %v968_v54  ;;  %v845_v54 = vadd.f32 %v3754_v39, %v3744_v1  ;;  %v2799_v58 = vld [vmem:[#allocation7 + $0x58] sm:$0xff]  }
 0x230   : > { %v870_v52 = vmul.f32 0.00390625, %v787_v61  ;;  %843 = vadd.xlane.f32.xlu1 %v842_v59  ;;  %v1039_v53 = vadd.f32 %v971_v9, %v970_v63  ;;  %v697_v59 = vmul.f32 0.01, %v625_v5  ;;  %2491 = vmatprep.subr.bf16.mxu1 %v2799_v58  ;;  %v3798_v63 = vmax.f32 %v623_v26, %v696_v60 }
 0x231   : > { %1037 = vadd.xlane.f32.xlu0 %v1036_v41  ;;  %v790_v4 = vpop.xlane.xlu1 %789  ;;  %2492 = vmatpush3.bf16.msra.mxu1 %v2800_v25  ;;  %v3810_v60 = vmax.f32 %v627_v18, %v698_v40  ;;  %v699_v2 = vmul.f32 0.01, %v631_v13  ;;  %v700_v58 = vmul.f32 0.01, %v633_v50  ;;  %v637_v25 = vadd.f32 %v3593_v28, %v3446_v8 }
 0x232   : > { %v3779_v31 = vsub.f32 %v3500_v0, %v870_v52  ;;  %v3782_v35 = vsub.f32 %v3502_v12, %v870_v52  ;;  %v871_v29 = vmul.f32 0.00390625, %v790_v4  ;;  %v3796_v4 = vmax.f32 %v621_v56, %v695_v44  ;;  %v2802_v56 = vld [vmem:[#allocation7 + $0x20] sm:$0xff]  }
 0x233   : > { %v3808_v26 = vmax.f32 %v625_v5, %v697_v59  ;;  %v2803_v5 = vld [vmem:[#allocation7 + $0x68] sm:$0xff]   ;;  %v3834_v28 = vmax.f32 %v631_v13, %v699_v2 }
 0x234   : > { %v3787_v38 = vsub.f32 %v3506_v15, %v871_v29  ;;  %v3790_v61 = vsub.f32 %v3508_v16, %v871_v29  ;;  %1040 = vadd.xlane.f32.xlu1 %v1039_v53  ;;  %v972_v0 = vmul.f32 %v3779_v31, %v3779_v31  ;;  %v973_v12 = vmul.f32 %v3782_v35, %v3782_v35  ;;  %v2801_v15 = vld [vmem:[#allocation7 + $0x60] sm:$0xff]  }
 0x235   : > { %846 = vadd.xlane.f32.xlu0 %v845_v54  ;;  %v848_v16 = vadd.f32 %v3774_v34, %v3772_v49  ;;  %2493 = vmatprep.subr.bf16.mxu1 %v2801_v15  ;;  %v635_v29 = vadd.f32 %v3590_v17, %v3444_v7  ;;  %v2804_v15 = vld [vmem:[#allocation7 + $0x28] sm:$0xff]  }
 0x236   : > { %v1042_v9 = vadd.f32 %v973_v12, %v972_v0  ;;  %v974_v41 = vmul.f32 %v3787_v38, %v3787_v38  ;;  %v975_v52 = vmul.f32 %v3790_v61, %v3790_v61  ;;  %v851_v0 = vadd.f32 %v3798_v63, %v3796_v4  ;;  %2494 = vmatpush3.bf16.msra.mxu1 %v2802_v56 }
 0x237   : > { %v793_v44 = vpop.xlane.xlu0 %792  ;;  %2495 = vmatprep.subr.bf16.mxu1 %v2803_v5 }
 0x238   : > { %v872_v54 = vmul.f32 0.00390625, %v793_v44  ;;  %849 = vadd.xlane.f32.xlu1 %v848_v16  ;;  %v1045_v12 = vadd.f32 %v975_v52, %v974_v41  ;;  %v701_v16 = vmul.f32 0.01, %v635_v29  ;;  %v2806_v44 = vld [vmem:[#allocation7 + $0x30] sm:$0xff]  }
 0x239   : > { %1043 = vadd.xlane.f32.xlu0 %v1042_v9  ;;  %v796_v53 = vpop.xlane.xlu1 %795  ;;  %v702_v9 = vmul.f32 0.01, %v637_v25 }
 0x23a   : > { %v3819_v18 = vsub.f32 %v3524_v36, %v872_v54  ;;  %v3822_v59 = vsub.f32 %v3526_v42, %v872_v54  ;;  %v873_v40 = vmul.f32 0.00390625, %v796_v53  ;;  %v3836_v42 = vmax.f32 %v633_v50, %v700_v58  ;;  %2496 = vmatpush3.bf16.msra.mxu1 %v2804_v15 }
 0x23b   : > { %v3844_v2 = vmax.f32 %v635_v29, %v701_v16  ;;  %v3846_v54 = vmax.f32 %v637_v25, %v702_v9 }
 0x23c   : > { %v3825_v7 = vsub.f32 %v3530_v45, %v873_v40  ;;  %v3828_v8 = vsub.f32 %v3532_v46, %v873_v40  ;;  %1046 = vadd.xlane.f32.xlu1 %v1045_v12  ;;  %v976_v17 = vmul.f32 %v3819_v18, %v3819_v18  ;;  %v977_v36 = vmul.f32 %v3822_v59, %v3822_v59  ;;  %v2805_v45 = vld [vmem:[#allocation7 + $0x70] sm:$0xff]  }
 0x23d   : > { %852 = vadd.xlane.f32.xlu0 %v851_v0  ;;  %v854_v46 = vadd.f32 %v3810_v60, %v3808_v26  ;;  %2497 = vmatprep.subr.bf16.mxu1 %v2805_v45  ;;  %v857_v53 = vadd.f32 %v3836_v42, %v3834_v28  ;;  %v2807_v0 = vld [vmem:[#allocation7 + $0x78] sm:$0xff]  }
 0x23e   : > { %v1048_v41 = vadd.f32 %v977_v36, %v976_v17  ;;  %v978_v52 = vmul.f32 %v3825_v7, %v3825_v7  ;;  %v979_v56 = vmul.f32 %v3828_v8, %v3828_v8  ;;  %2498 = vmatpush3.bf16.msra.mxu1 %v2806_v44  ;;  %v2808_v17 = vld [vmem:[#allocation7 + $0x38] sm:$0xff]  }
 0x23f   : > { %v799_v13 = vpop.xlane.xlu0 %798  ;;  %2499 = vmatprep.subr.bf16.mxu1 %v2807_v0 }
 0x240   : > { %v874_v50 = vmul.f32 0.00390625, %v799_v13  ;;  %855 = vadd.xlane.f32.xlu1 %v854_v46  ;;  %v1051_v15 = vadd.f32 %v979_v56, %v978_v52 }
 0x241   : > { %1049 = vadd.xlane.f32.xlu0 %v1048_v41  ;;  %v802_v58 = vpop.xlane.xlu1 %801 }
 0x242   : > { %v3851_v5 = vsub.f32 %v3548_v3, %v874_v50  ;;  %v3854_v40 = vsub.f32 %v3552_v6, %v874_v50  ;;  %v875_v12 = vmul.f32 0.00390625, %v802_v58  ;;  %2500 = vmatpush3.bf16.msra.mxu1 %v2808_v17  ;;  %v860_v6 = vadd.f32 %v3846_v54, %v3844_v2  ;;  %v4669_v17 = vld [vmem:[#allocation15_spill] sm:$0xff] }
 0x244   : > { %v3857_v29 = vsub.f32 %v3554_v10, %v875_v12  ;;  %v3860_v25 = vsub.f32 %v3556_v11, %v875_v12  ;;  %1052 = vadd.xlane.f32.xlu1 %v1051_v15  ;;  %v980_v36 = vmul.f32 %v3851_v5, %v3851_v5  ;;  %v981_v3 = vmul.f32 %v3854_v40, %v3854_v40 }
 0x245   : > { %858 = vadd.xlane.f32.xlu0 %v857_v53 }
 0x246   : > { %v1054_v16 = vadd.f32 %v981_v3, %v980_v36  ;;  %v982_v10 = vmul.f32 %v3857_v29, %v3857_v29  ;;  %v983_v11 = vmul.f32 %v3860_v25, %v3860_v25  ;;  %v4670_v3 = vld [vmem:[#allocation16_spill] sm:$0xff] }
 0x247   : > { %v805_v9 = vpop.xlane.xlu0 %804 }
 0x248   : > { %v876_v45 = vmul.f32 0.00390625, %v805_v9  ;;  %861 = vadd.xlane.f32.xlu1 %v860_v6  ;;  %v1057_v44 = vadd.f32 %v983_v11, %v982_v10  ;;  %v4671_v10 = vld [vmem:[#allocation17_spill] sm:$0xff]  ;;  %v4672_v9 = vld [vmem:[#allocation18_spill] sm:$0xff] }
 0x249   : > { %1055 = vadd.xlane.f32.xlu0 %v1054_v16  ;;  %v808_v46 = vpop.xlane.xlu1 %807 }
 0x24a   : > { %v3873_v41 = vsub.f32 %v3572_v47, %v876_v45  ;;  %v3876_v52 = vsub.f32 %v3576_v51, %v876_v45  ;;  %v877_v56 = vmul.f32 0.00390625, %v808_v46 }
 0x24c   : > { %v3879_v13 = vsub.f32 %v3578_v55, %v877_v56  ;;  %v3882_v50 = vsub.f32 %v3580_v57, %v877_v56  ;;  %1058 = vadd.xlane.f32.xlu1 %v1057_v44  ;;  %v984_v58 = vmul.f32 %v3873_v41, %v3873_v41  ;;  %v985_v53 = vmul.f32 %v3876_v52, %v3876_v52 }
 0x24e   : > { %v1060_v47 = vadd.f32 %v985_v53, %v984_v58  ;;  %v986_v51 = vmul.f32 %v3879_v13, %v3879_v13  ;;  %v987_v0 = vmul.f32 %v3882_v50, %v3882_v50 }
 0x24f   : > { %v811_v12 = vpop.xlane.xlu0 %810 }
 0x250   : > { %v878_v55 = vmul.f32 0.00390625, %v811_v12  ;;  %1061 = vadd.xlane.f32.xlu0 %v1060_v47  ;;  %v1063_v15 = vadd.f32 %v987_v0, %v986_v51 }
 0x251   : > { %v814_v57 = vpop.xlane.xlu1 %813 }
 0x252   : > { %v3893_v36 = vsub.f32 %v4669_v17, %v878_v55  ;;  %v3896_v6 = vsub.f32 %v4670_v3, %v878_v55  ;;  %v879_v16 = vmul.f32 0.00390625, %v814_v57  ;;  %1064 = vadd.xlane.f32.xlu1 %v1063_v15  ;;  %v4673_v55 = vld [vmem:[#allocation19_spill] sm:$0xff]  ;;  %v4675_v57 = vld [vmem:[#allocation20_spill] sm:$0xff] }
 0x254   : > { %v3899_v11 = vsub.f32 %v4671_v10, %v879_v16  ;;  %v3902_v45 = vsub.f32 %v4672_v9, %v879_v16  ;;  %v988_v46 = vmul.f32 %v3893_v36, %v3893_v36  ;;  %v989_v56 = vmul.f32 %v3896_v6, %v3896_v6  ;;  %v4676_v16 = vld [vmem:[#allocation21_spill] sm:$0xff]  ;;  %v4678_v9 = vld [vmem:[#allocation22_spill] sm:$0xff] }
 0x256   : > { %v1066_v44 = vadd.f32 %v989_v56, %v988_v46  ;;  %v990_v58 = vmul.f32 %v3899_v11, %v3899_v11  ;;  %v991_v53 = vmul.f32 %v3902_v45, %v3902_v45 }
 0x257   : > { %v817_v47 = vpop.xlane.xlu0 %816 }
 0x258   : > { %v880_v51 = vmul.f32 0.00390625, %v817_v47  ;;  %1067 = vadd.xlane.f32.xlu0 %v1066_v44  ;;  %v1069_v0 = vadd.f32 %v991_v53, %v990_v58 }
 0x259   : > { %v820_v12 = vpop.xlane.xlu1 %819 }
 0x25a   : > { %v3913_v15 = vsub.f32 %v4673_v55, %v880_v51  ;;  %v3916_v17 = vsub.f32 %v4675_v57, %v880_v51  ;;  %v881_v3 = vmul.f32 0.00390625, %v820_v12  ;;  %1070 = vadd.xlane.f32.xlu1 %v1069_v0 }
 0x25c   : > { %4674 = vst [vmem:[#allocation15_spill] sm:$0xff] %v3913_v15  ;;  %v3919_v10 = vsub.f32 %v4676_v16, %v881_v3  ;;  %v3922_v46 = vsub.f32 %v4678_v9, %v881_v3  ;;  %v992_v56 = vmul.f32 %v3913_v15, %v3913_v15  ;;  %v993_v44 = vmul.f32 %v3916_v17, %v3916_v17  ;;  %v4681_v3 = vld [vmem:[#allocation23_spill] sm:$0xff]  ;;  %v4685_v15 = vld [vmem:[#allocation25_spill] sm:$0xff] }
 0x25e   : > { %4677 = vst [vmem:[#allocation16_spill] sm:$0xff] %v3919_v10  ;;  %4679 = vst [vmem:[#allocation17_spill] sm:$0xff] %v3922_v46  ;;  %v1072_v58 = vadd.f32 %v993_v44, %v992_v56  ;;  %v994_v53 = vmul.f32 %v3919_v10, %v3919_v10  ;;  %v995_v47 = vmul.f32 %v3922_v46, %v3922_v46  ;;  %v4683_v56 = vld [vmem:[#allocation24_spill] sm:$0xff] }
 0x25f   : > { %v823_v51 = vpop.xlane.xlu0 %822 }
 0x260   : > { %v882_v0 = vmul.f32 0.00390625, %v823_v51  ;;  %1073 = vadd.xlane.f32.xlu0 %v1072_v58  ;;  %v1075_v12 = vadd.f32 %v995_v47, %v994_v53 }
 0x261   : > { %v826_v55 = vpop.xlane.xlu1 %825 }
 0x262   : > { %v3933_v57 = vsub.f32 %v3628_v32, %v882_v0  ;;  %v3936_v16 = vsub.f32 %v4681_v3, %v882_v0  ;;  %v883_v9 = vmul.f32 0.00390625, %v826_v55  ;;  %1076 = vadd.xlane.f32.xlu1 %v1075_v12 }
 0x264   : > { %4680 = vst [vmem:[#allocation18_spill] sm:$0xff] %v3933_v57  ;;  %4682 = vst [vmem:[#allocation19_spill] sm:$0xff] %v3936_v16  ;;  %v3939_v44 = vsub.f32 %v4683_v56, %v883_v9  ;;  %v3942_v10 = vsub.f32 %v4685_v15, %v883_v9  ;;  %v996_v51 = vmul.f32 %v3933_v57, %v3933_v57  ;;  %v4687_v15 = vld [vmem:[#allocation26_spill] sm:$0xff]  ;;  %v4689_v56 = vld [vmem:[#allocation27_spill] sm:$0xff] }
 0x265   : > { %v997_v58 = vmul.f32 %v3936_v16, %v3936_v16 }
 0x266   : > { %4684 = vst [vmem:[#allocation20_spill] sm:$0xff] %v3939_v44  ;;  %4686 = vst [vmem:[#allocation21_spill] sm:$0xff] %v3942_v10  ;;  %v998_v32 = vmul.f32 %v3939_v44, %v3939_v44  ;;  %v999_v47 = vmul.f32 %v3942_v10, %v3942_v10  ;;  %v4692_v44 = vld [vmem:[#allocation29_spill] sm:$0xff] }
 0x267   : > { %v1078_v53 = vadd.f32 %v997_v58, %v996_v51  ;;  %v829_v0 = vpop.xlane.xlu0 %828  ;;  %v4690_v51 = vld [vmem:[#allocation28_spill] sm:$0xff] }
 0x268   : > { %v884_v12 = vmul.f32 0.00390625, %v829_v0  ;;  %v1081_v55 = vadd.f32 %v999_v47, %v998_v32 }
 0x269   : > { %1079 = vadd.xlane.f32.xlu0 %v1078_v53  ;;  %v832_v3 = vpop.xlane.xlu1 %831 }
 0x26a   : > { %v3953_v9 = vsub.f32 %v4687_v15, %v884_v12  ;;  %v3956_v57 = vsub.f32 %v4689_v56, %v884_v12  ;;  %v885_v46 = vmul.f32 0.00390625, %v832_v3  ;;  %1082 = vadd.xlane.f32.xlu1 %v1081_v55 }
 0x26c   : > { %4688 = vst [vmem:[#allocation22_spill] sm:$0xff] %v3953_v9  ;;  %v3959_v58 = vsub.f32 %v4690_v51, %v885_v46  ;;  %v3962_v16 = vsub.f32 %v4692_v44, %v885_v46  ;;  %v1000_v0 = vmul.f32 %v3953_v9, %v3953_v9  ;;  %v1001_v53 = vmul.f32 %v3956_v57, %v3956_v57 }
 0x26e   : > { %4691 = vst [vmem:[#allocation23_spill] sm:$0xff] %v3959_v58  ;;  %4693 = vst [vmem:[#allocation24_spill] sm:$0xff] %v3962_v16  ;;  %v1084_v32 = vadd.f32 %v1001_v53, %v1000_v0  ;;  %v1002_v47 = vmul.f32 %v3959_v58, %v3959_v58  ;;  %v1003_v12 = vmul.f32 %v3962_v16, %v3962_v16 }
 0x270   : > { %1085 = vadd.xlane.f32.xlu0 %v1084_v32  ;;  %v1087_v55 = vadd.f32 %v1003_v12, %v1002_v47 }
 0x272   : > { %1088 = vadd.xlane.f32.xlu1 %v1087_v55 }
 0x2ad   : > { %v1026_v3 = vpop.xlane.xlu0 %1025 }
 0x2ae   : > { %v1120_v15 = vmul.f32 0.00390625, %v1026_v3 }
 0x2b0   : > { %v1152_v46 = vadd.f32 1e-05, %v1120_v15 }
 0x2b1   : > { %v1029_v44 = vpop.xlane.xlu1 %1028  ;;  %v835_v56 = vpop.xlane.xlu0 %834 }
 0x2b2   : > { %v1121_v51 = vmul.f32 0.00390625, %v1029_v44  ;;  %v886_v9 = vmul.f32 0.00390625, %v835_v56  ;;  %2817 = vrsqrt.f32 %v1152_v46 }
 0x2b4   : > { %v1153_v10 = vadd.f32 1e-05, %v1121_v51  ;;  %v3973_v0 = vsub.f32 %v3666_v24, %v886_v9  ;;  %v3976_v53 = vsub.f32 %v3672_v27, %v886_v9 }
 0x2b5   : > { %v838_v58 = vpop.xlane.xlu1 %837  ;;  %v1032_v16 = vpop.xlane.xlu0 %1031 }
 0x2b6   : > { %4694 = vst [vmem:[#allocation25_spill] sm:$0xff] %v3973_v0  ;;  %2819 = vrsqrt.f32 %v1153_v10  ;;  %v887_v32 = vmul.f32 0.00390625, %v838_v58  ;;  %v1122_v47 = vmul.f32 0.00390625, %v1032_v16  ;;  %v1004_v12 = vmul.f32 %v3973_v0, %v3973_v0 }
 0x2b7   : > { %v1005_v55 = vmul.f32 %v3976_v53, %v3976_v53 }
 0x2b8   : > { %v3983_v3 = vsub.f32 %v3690_v22, %v887_v32  ;;  %v3986_v24 = vsub.f32 %v3696_v19, %v887_v32  ;;  %v1154_v15 = vadd.f32 1e-05, %v1122_v47 }
 0x2b9   : > { %v1035_v27 = vpop.xlane.xlu1 %1034  ;;  %v841_v9 = vpop.xlane.xlu0 %840  ;;  %v1090_v46 = vadd.f32 %v1005_v55, %v1004_v12 }
 0x2ba   : > { %4695 = vst [vmem:[#allocation26_spill] sm:$0xff] %v3983_v3  ;;  %4696 = vst [vmem:[#allocation27_spill] sm:$0xff] %v3986_v24  ;;  %v1123_v44 = vmul.f32 0.00390625, %v1035_v27  ;;  %v888_v10 = vmul.f32 0.00390625, %v841_v9  ;;  %v1006_v16 = vmul.f32 %v3983_v3, %v3983_v3  ;;  %2821 = vrsqrt.f32 %v1154_v15 }
 0x2bb   : > { %1091 = vadd.xlane.f32.xlu0 %v1090_v46  ;;  %v1007_v58 = vmul.f32 %v3986_v24, %v3986_v24  ;;  %v4702_v24 = vld [vmem:[#allocation33_spill] sm:$0xff] }
 0x2bc   : > { %v1155_v56 = vadd.f32 1e-05, %v1123_v44  ;;  %v3993_v22 = vsub.f32 %v3704_v33, %v888_v10  ;;  %v3996_v19 = vsub.f32 %v3706_v43, %v888_v10  ;;  %v2818_v51 = vpop.eup %2817  ;;  %v4699_v33 = vld [vmem:[#allocation30_spill] sm:$0xff] }
 0x2bd   : > { %v844_v32 = vpop.xlane.xlu1 %843  ;;  %v1093_v47 = vadd.f32 %v1007_v58, %v1006_v16  ;;  %v1216_v44 = vmul.f32 %v2818_v51, %v4699_v33  ;;  %v4700_v58 = vld [vmem:[#allocation32_spill] sm:$0xff] }
 0x2be   : > { %4697 = vst [vmem:[#allocation28_spill] sm:$0xff] %v3993_v22  ;;  %4698 = vst [vmem:[#allocation29_spill] sm:$0xff] %v3996_v19  ;;  %2823 = vrsqrt.f32 %v1155_v56  ;;  %v889_v12 = vmul.f32 0.00390625, %v844_v32  ;;  %v1038_v55 = vpop.xlane.xlu0 %1037  ;;  %v1008_v15 = vmul.f32 %v3993_v22, %v3993_v22  ;;  %v1009_v27 = vmul.f32 %v3996_v19, %v3996_v19  ;;  %v4701_v22 = vld [vmem:[#allocation31_spill] sm:$0xff] }
 0x2bf   : > { %v1124_v9 = vmul.f32 0.00390625, %v1038_v55  ;;  %1094 = vadd.xlane.f32.xlu1 %v1093_v47  ;;  %v1217_v0 = vmul.f32 %v2818_v51, %v4701_v22 }
 0x2c0   : > { %v2820_v46 = vpop.eup %2819  ;;  %v4004_v43 = vsub.f32 %v3734_v20, %v889_v12  ;;  %v4007_v10 = vsub.f32 %v3736_v62, %v889_v12  ;;  %v1096_v16 = vadd.f32 %v1009_v27, %v1008_v15 }
 0x2c1   : > { %v1218_v56 = vmul.f32 %v2820_v46, %v4700_v58  ;;  %v1156_v32 = vadd.f32 1e-05, %v1124_v9  ;;  %v1041_v3 = vpop.xlane.xlu1 %1040  ;;  %v1219_v19 = vmul.f32 %v2820_v46, %v4702_v24 }
 0x2c2   : > { %v1125_v55 = vmul.f32 0.00390625, %v1041_v3  ;;  %v847_v47 = vpop.xlane.xlu0 %846  ;;  %1097 = vadd.xlane.f32.xlu0 %v1096_v16  ;;  %v1010_v33 = vmul.f32 %v4004_v43, %v4004_v43  ;;  %v1011_v20 = vmul.f32 %v4007_v10, %v4007_v10 }
 0x2c3   : > { %2825 = vrsqrt.f32 %v1156_v32  ;;  %v890_v62 = vmul.f32 0.00390625, %v847_v47  ;;  %v1281_v12 = vpack.c.bf16 %v1219_v19, %v1217_v0  ;;  %v1280_v15 = vpack.c.bf16 %v1218_v56, %v1216_v44 }
 0x2c4   : > { %v1157_v27 = vadd.f32 1e-05, %v1125_v55  ;;  %v1099_v9 = vadd.f32 %v1011_v20, %v1010_v33  ;;  %v2822_v58 = vpop.eup %2821 }
 0x2c5   : > { %v4017_v22 = vsub.f32 %v3744_v1, %v890_v62  ;;  %v4020_v3 = vsub.f32 %v3754_v39, %v890_v62  ;;  %v850_v24 = vpop.xlane.xlu1 %849  ;;  %1479 = vmatprep.mubr.bf16.mxu1 %v1281_v12  ;;  %v1221_v56 = vmul.f32 %v2822_v58, %v3702_v14  ;;  %v1220_v32 = vmul.f32 %v2822_v58, %v3699_v21  ;;  %v4703_v62 = vld [vmem:[#allocation34_spill] sm:$0xff] }
 0x2c6   : > { %2827 = vrsqrt.f32 %v1157_v27  ;;  %v891_v51 = vmul.f32 0.00390625, %v850_v24  ;;  %v1044_v46 = vpop.xlane.xlu0 %1043  ;;  %1100 = vadd.xlane.f32.xlu1 %v1099_v9  ;;  %1480 = vmatmul.mubr.bf16.vlgmr.msra.gmra.mrb[16].mxu1 %v1280_v15 }
 0x2c7   : > { %v1126_v16 = vmul.f32 0.00390625, %v1044_v46  ;;  %v1012_v0 = vmul.f32 %v4017_v22, %v4017_v22  ;;  %v1013_v19 = vmul.f32 %v4020_v3, %v4020_v3 }
 0x2c8   : > { %v2824_v44 = vpop.eup %2823  ;;  %v4027_v1 = vsub.f32 %v3772_v49, %v891_v51  ;;  %v4030_v39 = vsub.f32 %v3774_v34, %v891_v51 }
 0x2c9   : > { %v1158_v55 = vadd.f32 1e-05, %v1126_v16  ;;  %v1047_v47 = vpop.xlane.xlu1 %1046  ;;  %v1102_v33 = vadd.f32 %v1013_v19, %v1012_v0  ;;  %v1223_v20 = vmul.f32 %v2824_v44, %v3720_v48  ;;  %v1222_v12 = vmul.f32 %v2824_v44, %v4703_v62 }
 0x2ca   : > { %v1127_v15 = vmul.f32 0.00390625, %v1047_v47  ;;  %v853_v27 = vpop.xlane.xlu0 %852  ;;  %v1014_v49 = vmul.f32 %v4027_v1, %v4027_v1  ;;  %v1015_v34 = vmul.f32 %v4030_v39, %v4030_v39 }
 0x2cb   : > { %2829 = vrsqrt.f32 %v1158_v55  ;;  %v892_v9 = vmul.f32 0.00390625, %v853_v27  ;;  %1103 = vadd.xlane.f32.xlu0 %v1102_v33  ;;  %v1283_v14 = vpack.c.bf16 %v1223_v20, %v1221_v56  ;;  %v1282_v21 = vpack.c.bf16 %v1222_v12, %v1220_v32  ;;  %v4704_v27 = vld [vmem:[#allocation35_spill] sm:$0xff] }
 0x2cc   : > { %v1159_v58 = vadd.f32 1e-05, %v1127_v15  ;;  %v1105_v24 = vadd.f32 %v1015_v34, %v1014_v49 }
 0x2cd   : > { %v2826_v51 = vpop.eup %2825  ;;  %v4041_v48 = vsub.f32 %v3796_v4, %v892_v9  ;;  %v4044_v46 = vsub.f32 %v3798_v63, %v892_v9  ;;  %v856_v16 = vpop.xlane.xlu1 %855  ;;  %1487 = vmatprep.mubr.bf16.mxu1 %v1283_v14 }
 0x2ce   : > { %2831 = vrsqrt.f32 %v1159_v58  ;;  %v893_v0 = vmul.f32 0.00390625, %v856_v16  ;;  %v1050_v19 = vpop.xlane.xlu0 %1049  ;;  %1106 = vadd.xlane.f32.xlu1 %v1105_v24  ;;  %1488 = vmatmul.mubr.bf16.gmra.mrb[20].mxu1 %v1282_v21  ;;  %v1225_v47 = vmul.f32 %v2826_v51, %v3742_v37  ;;  %v1224_v33 = vmul.f32 %v2826_v51, %v3739_v30 }
 0x2cf   : > { %v1128_v44 = vmul.f32 0.00390625, %v1050_v19  ;;  %v1016_v56 = vmul.f32 %v4041_v48, %v4041_v48  ;;  %v1017_v32 = vmul.f32 %v4044_v46, %v4044_v46 }
 0x2d0   : > { %v2828_v55 = vpop.eup %2827  ;;  %v4051_v4 = vsub.f32 %v3808_v26, %v893_v0  ;;  %v4054_v63 = vsub.f32 %v3810_v60, %v893_v0 }
 0x2d1   : > { %v1160_v20 = vadd.f32 1e-05, %v1128_v44  ;;  %v1053_v62 = vpop.xlane.xlu1 %1052  ;;  %v1108_v12 = vadd.f32 %v1017_v32, %v1016_v56  ;;  %v1227_v15 = vmul.f32 %v2828_v55, %v3750_v23  ;;  %v1226_v49 = vmul.f32 %v2828_v55, %v4704_v27 }
 0x2d2   : > { %v1129_v34 = vmul.f32 0.00390625, %v1053_v62  ;;  %v859_v9 = vpop.xlane.xlu0 %858  ;;  %v1018_v26 = vmul.f32 %v4051_v4, %v4051_v4  ;;  %v1019_v60 = vmul.f32 %v4054_v63, %v4054_v63 }
 0x2d3   : > { %v894_v14 = vmul.f32 0.00390625, %v859_v9  ;;  %1109 = vadd.xlane.f32.xlu0 %v1108_v12  ;;  %v1285_v37 = vpack.c.bf16 %v1227_v15, %v1225_v47  ;;  %v1284_v21 = vpack.c.bf16 %v1226_v49, %v1224_v33  ;;  %2833 = vrsqrt.f32 %v1160_v20 }
 0x2d4   : > { %v1161_v30 = vadd.f32 1e-05, %v1129_v34  ;;  %v1111_v58 = vadd.f32 %v1019_v60, %v1018_v26 }
 0x2d5   : > { %v2830_v24 = vpop.eup %2829  ;;  %v4065_v23 = vsub.f32 %v3834_v28, %v894_v14  ;;  %v4068_v51 = vsub.f32 %v3836_v42, %v894_v14  ;;  %v862_v16 = vpop.xlane.xlu1 %861  ;;  %1495 = vmatprep.mubr.bf16.mxu1 %v1285_v37 }
 0x2d6   : > { %2835 = vrsqrt.f32 %v1161_v30  ;;  %v895_v0 = vmul.f32 0.00390625, %v862_v16  ;;  %v1056_v19 = vpop.xlane.xlu0 %1055  ;;  %1112 = vadd.xlane.f32.xlu1 %v1111_v58  ;;  %1496 = vmatmul.mubr.bf16.gmra.mrb[24].mxu1 %v1284_v21  ;;  %v1229_v47 = vmul.f32 %v2830_v24, %v3782_v35  ;;  %v1228_v33 = vmul.f32 %v2830_v24, %v3779_v31 }
 0x2d7   : > { %v1130_v44 = vmul.f32 0.00390625, %v1056_v19  ;;  %v1020_v56 = vmul.f32 %v4065_v23, %v4065_v23  ;;  %v1021_v32 = vmul.f32 %v4068_v51, %v4068_v51 }
 0x2d8   : > { %v2832_v55 = vpop.eup %2831  ;;  %v4075_v28 = vsub.f32 %v3844_v2, %v895_v0  ;;  %v4078_v42 = vsub.f32 %v3846_v54, %v895_v0 }
 0x2d9   : > { %v1162_v20 = vadd.f32 1e-05, %v1130_v44  ;;  %v1059_v62 = vpop.xlane.xlu1 %1058  ;;  %v1114_v12 = vadd.f32 %v1021_v32, %v1020_v56  ;;  %v1231_v15 = vmul.f32 %v2832_v55, %v3790_v61  ;;  %v1230_v27 = vmul.f32 %v2832_v55, %v3787_v38 }
 0x2da   : > { %v1131_v49 = vmul.f32 0.00390625, %v1059_v62  ;;  %v1022_v34 = vmul.f32 %v4075_v28, %v4075_v28  ;;  %v1023_v2 = vmul.f32 %v4078_v42, %v4078_v42 }
 0x2db   : > { %1115 = vadd.xlane.f32.xlu0 %v1114_v12  ;;  %v1287_v54 = vpack.c.bf16 %v1231_v15, %v1229_v47  ;;  %v1286_v9 = vpack.c.bf16 %v1230_v27, %v1228_v33  ;;  %2837 = vrsqrt.f32 %v1162_v20 }
 0x2dc   : > { %v1163_v35 = vadd.f32 1e-05, %v1131_v49  ;;  %v1117_v31 = vadd.f32 %v1023_v2, %v1022_v34 }
 0x2dd   : > { %1503 = vmatprep.mubr.bf16.mxu1 %v1287_v54  ;;  %v1062_v26 = vpop.xlane.xlu0 %1061  ;;  %v2834_v60 = vpop.eup %2833 }
 0x2de   : > { %2839 = vrsqrt.f32 %v1163_v35  ;;  %v1132_v61 = vmul.f32 0.00390625, %v1062_v26  ;;  %1118 = vadd.xlane.f32.xlu1 %v1117_v31  ;;  %1504 = vmatmul.mubr.bf16.gmra.mrb[28].mxu1 %v1286_v9  ;;  %v1233_v30 = vmul.f32 %v2834_v60, %v3822_v59  ;;  %v1232_v24 = vmul.f32 %v2834_v60, %v3819_v18 }
 0x2df   : > { %v1065_v38 = vpop.xlane.xlu1 %1064 }
 0x2e0   : > { %v2836_v14 = vpop.eup %2835  ;;  %v1164_v37 = vadd.f32 1e-05, %v1132_v61  ;;  %v1133_v21 = vmul.f32 0.00390625, %v1065_v38 }
 0x2e1   : > { %v1235_v58 = vmul.f32 %v2836_v14, %v3828_v8  ;;  %v1234_v16 = vmul.f32 %v2836_v14, %v3825_v7 }
 0x2e2   : > { %2841 = vrsqrt.f32 %v1164_v37  ;;  %v1165_v0 = vadd.f32 1e-05, %v1133_v21 }
 0x2e3   : > { %v1289_v19 = vpack.c.bf16 %v1235_v58, %v1233_v30  ;;  %v1288_v44 = vpack.c.bf16 %v1234_v16, %v1232_v24 }
 0x2e4   : > { %2843 = vrsqrt.f32 %v1165_v0 }
 0x2e5   : > { %1511 = vmatprep.mubr.bf16.mxu1 %v1289_v19  ;;  %v1068_v56 = vpop.xlane.xlu0 %1067  ;;  %v2838_v32 = vpop.eup %2837 }
 0x2e6   : > { %v1134_v55 = vmul.f32 0.00390625, %v1068_v56  ;;  %1512 = vmatmul.mubr.bf16.gmra.mrb[32].mxu1 %v1288_v44  ;;  %v1237_v8 = vmul.f32 %v2838_v32, %v3854_v40  ;;  %v1236_v7 = vmul.f32 %v2838_v32, %v3851_v5 }
 0x2e7   : > { %v1071_v47 = vpop.xlane.xlu1 %1070 }
 0x2e8   : > { %v2840_v33 = vpop.eup %2839  ;;  %v1166_v20 = vadd.f32 1e-05, %v1134_v55  ;;  %v1135_v59 = vmul.f32 0.00390625, %v1071_v47  ;;  %v4705_v47 = vld [vmem:[#allocation17_spill] sm:$0xff] }
 0x2e9   : > { %v1239_v18 = vmul.f32 %v2840_v33, %v3860_v25  ;;  %v1238_v62 = vmul.f32 %v2840_v33, %v3857_v29 }
 0x2ea   : > { %2845 = vrsqrt.f32 %v1166_v20  ;;  %v1167_v12 = vadd.f32 1e-05, %v1135_v59  ;;  %v4706_v59 = vld [vmem:[#allocation16_spill] sm:$0xff] }
 0x2eb   : > { %v1291_v15 = vpack.c.bf16 %v1239_v18, %v1237_v8  ;;  %v1290_v27 = vpack.c.bf16 %v1238_v62, %v1236_v7  ;;  %v4707_v7 = vld [vmem:[#allocation15_spill] sm:$0xff] }
 0x2ec   : > { %v2842_v49 = vpop.eup %2841  ;;  %2847 = vrsqrt.f32 %v1167_v12 }
 0x2ed   : > { %1519 = vmatprep.mubr.bf16.mxu1 %v1291_v15  ;;  %v1074_v34 = vpop.xlane.xlu0 %1073  ;;  %v1241_v40 = vmul.f32 %v2842_v49, %v3876_v52  ;;  %v1240_v60 = vmul.f32 %v2842_v49, %v3873_v41  ;;  %v4708_v49 = vld [vmem:[#allocation19_spill] sm:$0xff] }
 0x2ee   : > { %v2844_v2 = vpop.eup %2843  ;;  %v1136_v54 = vmul.f32 0.00390625, %v1074_v34  ;;  %1520 = vmatmul.mubr.bf16.gmra.mrb[36].mxu1 %v1290_v27 }
 0x2ef   : > { %v1077_v9 = vpop.xlane.xlu1 %1076  ;;  %v1243_v25 = vmul.f32 %v2844_v2, %v3882_v50  ;;  %v1242_v29 = vmul.f32 %v2844_v2, %v3879_v13 }
 0x2f0   : > { %v1168_v35 = vadd.f32 1e-05, %v1136_v54  ;;  %v1137_v5 = vmul.f32 0.00390625, %v1077_v9  ;;  %v4710_v54 = vld [vmem:[#allocation20_spill] sm:$0xff] }
 0x2f1   : > { %v1293_v31 = vpack.c.bf16 %v1243_v25, %v1241_v40  ;;  %v1292_v38 = vpack.c.bf16 %v1242_v29, %v1240_v60  ;;  %v4711_v25 = vld [vmem:[#allocation18_spill] sm:$0xff]  ;;  %v4712_v60 = vld [vmem:[#allocation24_spill] sm:$0xff] }
 0x2f2   : > { %2849 = vrsqrt.f32 %v1168_v35  ;;  %v1169_v26 = vadd.f32 1e-05, %v1137_v5 }
 0x2f3   : > { %1527 = vmatprep.mubr.bf16.mxu1 %v1293_v31 }
 0x2f4   : > { %v2846_v61 = vpop.eup %2845  ;;  %2851 = vrsqrt.f32 %v1169_v26 }
 0x2f5   : > { %v1245_v50 = vmul.f32 %v2846_v61, %v3896_v6  ;;  %v1244_v0 = vmul.f32 %v2846_v61, %v3893_v36 }
 0x2f6   : > { %v1080_v14 = vpop.xlane.xlu0 %1079  ;;  %v2848_v37 = vpop.eup %2847  ;;  %1528 = vmatmul.mubr.bf16.gmra.mrb[40].mxu1 %v1292_v38  ;;  %v4713_v38 = vld [vmem:[#allocation23_spill] sm:$0xff] }
 0x2f7   : > { %v1138_v21 = vmul.f32 0.00390625, %v1080_v14  ;;  %v1083_v52 = vpop.xlane.xlu1 %1082  ;;  %v1247_v30 = vmul.f32 %v2848_v37, %v3902_v45  ;;  %v1246_v24 = vmul.f32 %v2848_v37, %v3899_v11 }
 0x2f8   : > { %v1139_v13 = vmul.f32 0.00390625, %v1083_v52 }
 0x2f9   : > { %v1170_v58 = vadd.f32 1e-05, %v1138_v21  ;;  %v1295_v16 = vpack.c.bf16 %v1247_v30, %v1245_v50  ;;  %v1294_v44 = vpack.c.bf16 %v1246_v24, %v1244_v0  ;;  %v4714_v21 = vld [vmem:[#allocation22_spill] sm:$0xff] }
 0x2fa   : > { %v1171_v41 = vadd.f32 1e-05, %v1139_v13 }
 0x2fb   : > { %2853 = vrsqrt.f32 %v1170_v58  ;;  %1535 = vmatprep.mubr.bf16.mxu1 %v1295_v16 }
 0x2fc   : > { %v2850_v19 = vpop.eup %2849  ;;  %2855 = vrsqrt.f32 %v1171_v41 }
 0x2fd   : > { %v1086_v56 = vpop.xlane.xlu0 %1085  ;;  %v1249_v45 = vmul.f32 %v2850_v19, %v3916_v17  ;;  %v1248_v62 = vmul.f32 %v2850_v19, %v4707_v7  ;;  %v4709_v17 = vld [vmem:[#allocation21_spill] sm:$0xff] }
 0x2fe   : > { %v2852_v32 = vpop.eup %2851  ;;  %v1140_v55 = vmul.f32 0.00390625, %v1086_v56  ;;  %1536 = vmatmul.mubr.bf16.gmra.mrb[44].mxu1 %v1294_v44 }
 0x2ff   : > { %v1089_v6 = vpop.xlane.xlu1 %1088  ;;  %v1251_v33 = vmul.f32 %v2852_v32, %v4705_v47  ;;  %v1250_v8 = vmul.f32 %v2852_v32, %v4706_v59 }
 0x300   : > { %v1172_v20 = vadd.f32 1e-05, %v1140_v55  ;;  %v1141_v11 = vmul.f32 0.00390625, %v1089_v6 }
 0x301   : > { %v1297_v18 = vpack.c.bf16 %v1251_v33, %v1249_v45  ;;  %v1296_v15 = vpack.c.bf16 %v1250_v8, %v1248_v62  ;;  %v4715_v8 = vld [vmem:[#allocation27_spill] sm:$0xff]  ;;  %v4717_v62 = vld [vmem:[#allocation26_spill] sm:$0xff] }
 0x302   : > { %2857 = vrsqrt.f32 %v1172_v20  ;;  %v1173_v36 = vadd.f32 1e-05, %v1141_v11 }
 0x303   : > { %1543 = vmatprep.mubr.bf16.mxu1 %v1297_v18 }
 0x304   : > { %2859 = vrsqrt.f32 %v1173_v36  ;;  %v4716_v36 = vld [vmem:[#allocation25_spill] sm:$0xff] }
 0x305   : > { %v2854_v12 = vpop.eup %2853 }
 0x306   : > { %v2856_v27 = vpop.eup %2855  ;;  %1544 = vmatmul.mubr.bf16.gmra.mrb[48].mxu1 %v1296_v15  ;;  %v1253_v34 = vmul.f32 %v2854_v12, %v4708_v49  ;;  %v1252_v35 = vmul.f32 %v2854_v12, %v4711_v25 }
 0x307   : > { %v1255_v2 = vmul.f32 %v2856_v27, %v4709_v17  ;;  %v1254_v9 = vmul.f32 %v2856_v27, %v4710_v54 }
 0x309   : > { %v1299_v40 = vpack.c.bf16 %v1255_v2, %v1253_v34  ;;  %v1298_v29 = vpack.c.bf16 %v1254_v9, %v1252_v35  ;;  %v4718_v9 = vld [vmem:[#allocation29_spill] sm:$0xff] }
 0x30b   : > { %1551 = vmatprep.mubr.bf16.mxu1 %v1299_v40 }
 0x30c   : > { %v2858_v5 = vpop.eup %2857 }
 0x30d   : > { %v1257_v26 = vmul.f32 %v2858_v5, %v3956_v57  ;;  %v1256_v52 = vmul.f32 %v2858_v5, %v4714_v21  ;;  %v4719_v5 = vld [vmem:[#allocation28_spill] sm:$0xff] }
 0x30e   : > { %v2860_v31 = vpop.eup %2859  ;;  %1552 = vmatmul.mubr.bf16.gmra.mrb[52].mxu1 %v1298_v29 }
 0x30f   : > { %v1259_v61 = vmul.f32 %v2860_v31, %v4712_v60  ;;  %v1258_v14 = vmul.f32 %v2860_v31, %v4713_v38 }
 0x311   : > { %v1301_v37 = vpack.c.bf16 %v1259_v61, %v1257_v26  ;;  %v1300_v50 = vpack.c.bf16 %v1258_v14, %v1256_v52 }
 0x313   : > { %1559 = vmatprep.mubr.bf16.mxu1 %v1301_v37 }
 0x316   : > { %1560 = vmatmul.mubr.bf16.gmra.mrb[56].mxu1 %v1300_v50 }
 0x348   : > { %v1092_v30 = vpop.xlane.xlu0 %1091 }
 0x349   : > { %v1142_v58 = vmul.f32 0.00390625, %v1092_v30 }
 0x34b   : > { %v1174_v13 = vadd.f32 1e-05, %v1142_v58 }
 0x34c   : > { %v1095_v24 = vpop.xlane.xlu1 %1094 }
 0x34d   : > { %v1143_v16 = vmul.f32 0.00390625, %v1095_v24  ;;  %2861 = vrsqrt.f32 %v1174_v13 }
 0x34f   : > { %v1175_v41 = vadd.f32 1e-05, %v1143_v16  ;;  %v1098_v0 = vpop.xlane.xlu0 %1097 }
 0x350   : > { %v1144_v19 = vmul.f32 0.00390625, %v1098_v0 }
 0x351   : > { %2863 = vrsqrt.f32 %v1175_v41 }
 0x352   : > { %v1176_v57 = vadd.f32 1e-05, %v1144_v19 }
 0x353   : > { %v1101_v44 = vpop.xlane.xlu1 %1100 }
 0x354   : > { %v1145_v56 = vmul.f32 0.00390625, %v1101_v44  ;;  %2865 = vrsqrt.f32 %v1176_v57 }
 0x356   : > { %v1177_v32 = vadd.f32 1e-05, %v1145_v56 }
 0x357   : > { %v2862_v55 = vpop.eup %2861 }
 0x358   : > { %2867 = vrsqrt.f32 %v1177_v32  ;;  %v1104_v6 = vpop.xlane.xlu0 %1103  ;;  %v1261_v11 = vmul.f32 %v2862_v55, %v3976_v53  ;;  %v1260_v7 = vmul.f32 %v2862_v55, %v4716_v36 }
 0x359   : > { %v1146_v45 = vmul.f32 0.00390625, %v1104_v6 }
 0x35b   : > { %v2864_v47 = vpop.eup %2863  ;;  %v1178_v33 = vadd.f32 1e-05, %v1146_v45  ;;  %v1107_v20 = vpop.xlane.xlu1 %1106 }
 0x35c   : > { %v1147_v59 = vmul.f32 0.00390625, %v1107_v20  ;;  %v1263_v18 = vmul.f32 %v2864_v47, %v4715_v8  ;;  %v1262_v12 = vmul.f32 %v2864_v47, %v4717_v62 }
 0x35d   : > { %2869 = vrsqrt.f32 %v1178_v33 }
 0x35e   : > { %v1179_v15 = vadd.f32 1e-05, %v1147_v59  ;;  %v1303_v27 = vpack.c.bf16 %v1263_v18, %v1261_v11  ;;  %v1302_v49 = vpack.c.bf16 %v1262_v12, %v1260_v7  ;;  %v2866_v34 = vpop.eup %2865 }
 0x35f   : > { %v1265_v53 = vmul.f32 %v2866_v34, %v4718_v9  ;;  %v1264_v29 = vmul.f32 %v2866_v34, %v4719_v5 }
 0x360   : > { %2871 = vrsqrt.f32 %v1179_v15  ;;  %1567 = vmatprep.mubr.bf16.mxu1 %v1303_v27  ;;  %v1110_v17 = vpop.xlane.xlu0 %1109 }
 0x361   : > { %v1148_v2 = vmul.f32 0.00390625, %v1110_v17  ;;  %1568 = vmatmul.mubr.bf16.gmra.mrb[60].mxu1 %v1302_v49 }
 0x362   : > { %v2868_v54 = vpop.eup %2867 }
 0x363   : > { %v1180_v40 = vadd.f32 1e-05, %v1148_v2  ;;  %v1113_v25 = vpop.xlane.xlu1 %1112  ;;  %v1267_v35 = vmul.f32 %v2868_v54, %v4007_v10  ;;  %v1266_v31 = vmul.f32 %v2868_v54, %v4004_v43 }
 0x364   : > { %v1149_v26 = vmul.f32 0.00390625, %v1113_v25 }
 0x365   : > { %v1305_v60 = vpack.c.bf16 %v1267_v35, %v1265_v53  ;;  %v1304_v61 = vpack.c.bf16 %v1266_v31, %v1264_v29  ;;  %2873 = vrsqrt.f32 %v1180_v40 }
 0x366   : > { %v1181_v38 = vadd.f32 1e-05, %v1149_v26 }
 0x367   : > { %v2870_v14 = vpop.eup %2869  ;;  %1575 = vmatprep.mubr.bf16.mxu1 %v1305_v60 }
 0x368   : > { %2875 = vrsqrt.f32 %v1181_v38  ;;  %v1116_v37 = vpop.xlane.xlu0 %1115  ;;  %v1269_v50 = vmul.f32 %v2870_v14, %v4020_v3  ;;  %v1268_v43 = vmul.f32 %v2870_v14, %v4017_v22 }
 0x369   : > { %v1150_v21 = vmul.f32 0.00390625, %v1116_v37  ;;  %1576 = vmatmul.mubr.bf16.gmra.mrb[64].mxu1 %v1304_v61 }
 0x36a   : > { %v2872_v52 = vpop.eup %2871 }
 0x36b   : > { %v1182_v30 = vadd.f32 1e-05, %v1150_v21  ;;  %v1119_v10 = vpop.xlane.xlu1 %1118  ;;  %v1271_v58 = vmul.f32 %v2872_v52, %v4030_v39  ;;  %v1270_v13 = vmul.f32 %v2872_v52, %v4027_v1 }
 0x36c   : > { %v1151_v24 = vmul.f32 0.00390625, %v1119_v10 }
 0x36d   : > { %v1307_v16 = vpack.c.bf16 %v1271_v58, %v1269_v50  ;;  %v1306_v41 = vpack.c.bf16 %v1270_v13, %v1268_v43  ;;  %2877 = vrsqrt.f32 %v1182_v30 }
 0x36e   : > { %v1183_v0 = vadd.f32 1e-05, %v1151_v24 }
 0x36f   : > { %1583 = vmatprep.mubr.bf16.mxu1 %v1307_v16  ;;  %v2874_v19 = vpop.eup %2873 }
 0x370   : > { %2879 = vrsqrt.f32 %v1183_v0  ;;  %v1273_v3 = vmul.f32 %v2874_v19, %v4044_v46  ;;  %v1272_v39 = vmul.f32 %v2874_v19, %v4041_v48 }
 0x371   : > { %1584 = vmatmul.mubr.bf16.gmra.mrb[68].mxu1 %v1306_v41 }
 0x372   : > { %v2876_v57 = vpop.eup %2875 }
 0x373   : > { %v1275_v44 = vmul.f32 %v2876_v57, %v4054_v63  ;;  %v1274_v22 = vmul.f32 %v2876_v57, %v4051_v4  ;;  %v4139_v4 = vld [vmem:[%s4589_s4 + $0x2] ss:$0 sm:$0xff] }
 0x375   : > { %v1309_v56 = vpack.c.bf16 %v1275_v44, %v1273_v3  ;;  %v1308_v1 = vpack.c.bf16 %v1274_v22, %v1272_v39 }
 0x377   : > { %1591 = vmatprep.mubr.bf16.mxu1 %v1309_v56  ;;  %v2878_v32 = vpop.eup %2877 }
 0x378   : > { %v1277_v6 = vmul.f32 %v2878_v32, %v4068_v51  ;;  %v1276_v47 = vmul.f32 %v2878_v32, %v4065_v23 }
 0x379   : > { %1592 = vmatmul.mubr.bf16.gmra.mrb[72].mxu1 %v1308_v1 }
 0x37a   : > { %v2880_v55 = vpop.eup %2879 }
 0x37b   : > { %v1279_v45 = vmul.f32 %v2880_v55, %v4078_v42  ;;  %v1278_v46 = vmul.f32 %v2880_v55, %v4075_v28 }
 0x37d   : > { %v1311_v33 = vpack.c.bf16 %v1279_v45, %v1277_v6  ;;  %v1310_v63 = vpack.c.bf16 %v1278_v46, %v1276_v47 }
 0x37f   : > { %1599 = vmatprep.mubr.bf16.mxu1 %v1311_v33 }
 0x381   : > { %1600 = vmatmul.mubr.bf16.gmra.mrb[76].mxu1 %v1310_v63 }
 0x399   : > { %v2501_v48 = vpop.f32.mrb[16].mxu1 }
 0x39a   : > { %v2502_v20 = vpop.f32.mrb[17].mxu1 }
 0x39b   : > { %v2503_v11 = vadd.f32 %v2502_v20, %v2501_v48  ;;  %v2504_v59 = vpop.f32.mrb[18].mxu1 }
 0x39c   : > { %v2505_v51 = vpop.f32.mrb[19].mxu1 }
 0x39d   : > { %v1482_v42 = vadd.f32 %v2503_v11, %v4139_v4  ;;  %v2506_v8 = vadd.f32 %v2505_v51, %v2504_v59 }
 0x39f   : > { %v1485_v23 = vadd.f32 %v2506_v8, %v4139_v4  ;;  %v1608_v28 = vmul.f32 0.01, %v1482_v42 }
 0x3a1   : > { %v2507_v18 = vpop.f32.mrb[20].mxu1  ;;  %v4143_v36 = vmax.f32 %v1482_v42, %v1608_v28  ;;  %v1609_v7 = vmul.f32 0.01, %v1485_v23 }
 0x3a2   : > { %v2508_v62 = vpop.f32.mrb[21].mxu1 }
 0x3a3   : > { %v2509_v12 = vadd.f32 %v2508_v62, %v2507_v18  ;;  %v2510_v15 = vpop.f32.mrb[22].mxu1  ;;  %1672 = vadd.xlane.f32.xlu0 %v4143_v36  ;;  %v4146_v27 = vmax.f32 %v1485_v23, %v1609_v7 }
 0x3a4   : > { %v2511_v49 = vpop.f32.mrb[23].mxu1 }
 0x3a5   : > { %v1490_v34 = vadd.f32 %v2509_v12, %v4139_v4  ;;  %v2512_v17 = vadd.f32 %v2511_v49, %v2510_v15  ;;  %1674 = vadd.xlane.f32.xlu1 %v4146_v27 }
 0x3a7   : > { %v1493_v2 = vadd.f32 %v2512_v17, %v4139_v4  ;;  %v1610_v54 = vmul.f32 0.01, %v1490_v34 }
 0x3a9   : > { %v2513_v9 = vpop.f32.mrb[24].mxu1  ;;  %v4151_v53 = vmax.f32 %v1490_v34, %v1610_v54  ;;  %v1611_v40 = vmul.f32 0.01, %v1493_v2 }
 0x3aa   : > { %v2514_v25 = vpop.f32.mrb[25].mxu1 }
 0x3ab   : > { %v2515_v35 = vadd.f32 %v2514_v25, %v2513_v9  ;;  %v2516_v5 = vpop.f32.mrb[26].mxu1  ;;  %1676 = vadd.xlane.f32.xlu0 %v4151_v53  ;;  %v4154_v29 = vmax.f32 %v1493_v2, %v1611_v40 }
 0x3ac   : > { %v2517_v31 = vpop.f32.mrb[27].mxu1 }
 0x3ad   : > { %v1498_v26 = vadd.f32 %v2515_v35, %v4139_v4  ;;  %v2518_v60 = vadd.f32 %v2517_v31, %v2516_v5  ;;  %1678 = vadd.xlane.f32.xlu1 %v4154_v29 }
 0x3af   : > { %v1501_v61 = vadd.f32 %v2518_v60, %v4139_v4  ;;  %v1612_v38 = vmul.f32 0.01, %v1498_v26 }
 0x3b1   : > { %v2519_v14 = vpop.f32.mrb[28].mxu1  ;;  %v4159_v37 = vmax.f32 %v1498_v26, %v1612_v38  ;;  %v1613_v21 = vmul.f32 0.01, %v1501_v61 }
 0x3b2   : > { %v2520_v52 = vpop.f32.mrb[29].mxu1 }
 0x3b3   : > { %v2521_v50 = vadd.f32 %v2520_v52, %v2519_v14  ;;  %v2522_v30 = vpop.f32.mrb[30].mxu1  ;;  %1680 = vadd.xlane.f32.xlu0 %v4159_v37  ;;  %v4162_v10 = vmax.f32 %v1501_v61, %v1613_v21 }
 0x3b4   : > { %v2523_v58 = vpop.f32.mrb[31].mxu1 }
 0x3b5   : > { %v1506_v43 = vadd.f32 %v2521_v50, %v4139_v4  ;;  %v2524_v13 = vadd.f32 %v2523_v58, %v2522_v30  ;;  %1682 = vadd.xlane.f32.xlu1 %v4162_v10 }
 0x3b7   : > { %v1509_v24 = vadd.f32 %v2524_v13, %v4139_v4  ;;  %v1614_v16 = vmul.f32 0.01, %v1506_v43 }
 0x3b9   : > { %v2525_v41 = vpop.f32.mrb[32].mxu1  ;;  %v4167_v0 = vmax.f32 %v1506_v43, %v1614_v16  ;;  %v1615_v19 = vmul.f32 0.01, %v1509_v24 }
 0x3ba   : > { %v2526_v57 = vpop.f32.mrb[33].mxu1 }
 0x3bb   : > { %v2527_v3 = vadd.f32 %v2526_v57, %v2525_v41  ;;  %v2528_v44 = vpop.f32.mrb[34].mxu1  ;;  %1684 = vadd.xlane.f32.xlu0 %v4167_v0  ;;  %v4170_v39 = vmax.f32 %v1509_v24, %v1615_v19 }
 0x3bc   : > { %v2529_v22 = vpop.f32.mrb[35].mxu1 }
 0x3bd   : > { %v1514_v56 = vadd.f32 %v2527_v3, %v4139_v4  ;;  %v2530_v1 = vadd.f32 %v2529_v22, %v2528_v44  ;;  %1686 = vadd.xlane.f32.xlu1 %v4170_v39 }
 0x3bf   : > { %v1517_v32 = vadd.f32 %v2530_v1, %v4139_v4  ;;  %v1616_v55 = vmul.f32 0.01, %v1514_v56 }
 0x3c1   : > { %v2531_v6 = vpop.f32.mrb[36].mxu1  ;;  %v4175_v45 = vmax.f32 %v1514_v56, %v1616_v55  ;;  %v1617_v47 = vmul.f32 0.01, %v1517_v32 }
 0x3c2   : > { %v2532_v46 = vpop.f32.mrb[37].mxu1 }
 0x3c3   : > { %v2533_v33 = vadd.f32 %v2532_v46, %v2531_v6  ;;  %1688 = vadd.xlane.f32.xlu0 %v4175_v45  ;;  %v2534_v63 = vpop.f32.mrb[38].mxu1  ;;  %v4178_v48 = vmax.f32 %v1517_v32, %v1617_v47 }
 0x3c4   : > { %v2535_v20 = vpop.f32.mrb[39].mxu1 }
 0x3c5   : > { %v1522_v11 = vadd.f32 %v2533_v33, %v4139_v4  ;;  %v2536_v59 = vadd.f32 %v2535_v20, %v2534_v63  ;;  %1690 = vadd.xlane.f32.xlu1 %v4178_v48 }
 0x3c7   : > { %v1525_v51 = vadd.f32 %v2536_v59, %v4139_v4  ;;  %v1618_v42 = vmul.f32 0.01, %v1522_v11 }
 0x3c9   : > { %v2537_v8 = vpop.f32.mrb[40].mxu1  ;;  %v4183_v23 = vmax.f32 %v1522_v11, %v1618_v42  ;;  %v1619_v28 = vmul.f32 0.01, %v1525_v51 }
 0x3ca   : > { %v2538_v18 = vpop.f32.mrb[41].mxu1 }
 0x3cb   : > { %v2539_v7 = vadd.f32 %v2538_v18, %v2537_v8  ;;  %1692 = vadd.xlane.f32.xlu0 %v4183_v23  ;;  %v2540_v62 = vpop.f32.mrb[42].mxu1  ;;  %v4186_v12 = vmax.f32 %v1525_v51, %v1619_v28 }
 0x3cc   : > { %v2541_v15 = vpop.f32.mrb[43].mxu1 }
 0x3cd   : > { %v1530_v49 = vadd.f32 %v2539_v7, %v4139_v4  ;;  %v2542_v34 = vadd.f32 %v2541_v15, %v2540_v62  ;;  %1694 = vadd.xlane.f32.xlu1 %v4186_v12 }
 0x3cf   : > { %v1533_v17 = vadd.f32 %v2542_v34, %v4139_v4  ;;  %v1620_v2 = vmul.f32 0.01, %v1530_v49 }
 0x3d1   : > { %v2543_v54 = vpop.f32.mrb[44].mxu1  ;;  %v4191_v9 = vmax.f32 %v1530_v49, %v1620_v2  ;;  %v1621_v40 = vmul.f32 0.01, %v1533_v17 }
 0x3d2   : > { %v2544_v25 = vpop.f32.mrb[45].mxu1 }
 0x3d3   : > { %v2545_v35 = vadd.f32 %v2544_v25, %v2543_v54  ;;  %1696 = vadd.xlane.f32.xlu0 %v4191_v9  ;;  %v2546_v5 = vpop.f32.mrb[46].mxu1  ;;  %v4194_v31 = vmax.f32 %v1533_v17, %v1621_v40 }
 0x3d4   : > { %v2547_v26 = vpop.f32.mrb[47].mxu1 }
 0x3d5   : > { %v1538_v60 = vadd.f32 %v2545_v35, %v4139_v4  ;;  %v2548_v61 = vadd.f32 %v2547_v26, %v2546_v5  ;;  %1698 = vadd.xlane.f32.xlu1 %v4194_v31 }
 0x3d7   : > { %v1541_v38 = vadd.f32 %v2548_v61, %v4139_v4  ;;  %v1622_v14 = vmul.f32 0.01, %v1538_v60 }
 0x3d9   : > { %v2549_v21 = vpop.f32.mrb[48].mxu1  ;;  %v4199_v52 = vmax.f32 %v1538_v60, %v1622_v14  ;;  %v1623_v50 = vmul.f32 0.01, %v1541_v38 }
 0x3da   : > { %v2550_v30 = vpop.f32.mrb[49].mxu1 }
 0x3db   : > { %v2551_v58 = vadd.f32 %v2550_v30, %v2549_v21  ;;  %1700 = vadd.xlane.f32.xlu0 %v4199_v52  ;;  %v2552_v43 = vpop.f32.mrb[50].mxu1  ;;  %v4202_v13 = vmax.f32 %v1541_v38, %v1623_v50 }
 0x3dc   : > { %v2553_v24 = vpop.f32.mrb[51].mxu1 }
 0x3dd   : > { %v1546_v16 = vadd.f32 %v2551_v58, %v4139_v4  ;;  %v2554_v41 = vadd.f32 %v2553_v24, %v2552_v43  ;;  %1702 = vadd.xlane.f32.xlu1 %v4202_v13 }
 0x3df   : > { %v1549_v19 = vadd.f32 %v2554_v41, %v4139_v4  ;;  %v1624_v57 = vmul.f32 0.01, %v1546_v16 }
 0x3e1   : > { %v2555_v3 = vpop.f32.mrb[52].mxu1  ;;  %v4207_v44 = vmax.f32 %v1546_v16, %v1624_v57  ;;  %v1625_v22 = vmul.f32 0.01, %v1549_v19 }
 0x3e2   : > { %v2556_v56 = vpop.f32.mrb[53].mxu1 }
 0x3e3   : > { %v2557_v1 = vadd.f32 %v2556_v56, %v2555_v3  ;;  %1704 = vadd.xlane.f32.xlu0 %v4207_v44  ;;  %v2558_v32 = vpop.f32.mrb[54].mxu1  ;;  %v4210_v55 = vmax.f32 %v1549_v19, %v1625_v22 }
 0x3e4   : > { %v2559_v6 = vpop.f32.mrb[55].mxu1 }
 0x3e5   : > { %v1554_v47 = vadd.f32 %v2557_v1, %v4139_v4  ;;  %v2560_v46 = vadd.f32 %v2559_v6, %v2558_v32  ;;  %1706 = vadd.xlane.f32.xlu1 %v4210_v55 }
 0x3e7   : > { %v1557_v33 = vadd.f32 %v2560_v46, %v4139_v4  ;;  %v1626_v63 = vmul.f32 0.01, %v1554_v47 }
 0x3e9   : > { %v2561_v20 = vpop.f32.mrb[56].mxu1  ;;  %v4215_v11 = vmax.f32 %v1554_v47, %v1626_v63  ;;  %v1627_v59 = vmul.f32 0.01, %v1557_v33 }
 0x3ea   : > { %v2562_v51 = vpop.f32.mrb[57].mxu1 }
 0x3eb   : > { %v2563_v42 = vadd.f32 %v2562_v51, %v2561_v20  ;;  %1708 = vadd.xlane.f32.xlu0 %v4215_v11  ;;  %v2564_v8 = vpop.f32.mrb[58].mxu1  ;;  %v4218_v28 = vmax.f32 %v1557_v33, %v1627_v59 }
 0x3ec   : > { %v2565_v18 = vpop.f32.mrb[59].mxu1 }
 0x3ed   : > { %v1562_v7 = vadd.f32 %v2563_v42, %v4139_v4  ;;  %v2566_v62 = vadd.f32 %v2565_v18, %v2564_v8  ;;  %1710 = vadd.xlane.f32.xlu1 %v4218_v28 }
 0x3ef   : > { %v1565_v15 = vadd.f32 %v2566_v62, %v4139_v4  ;;  %v1628_v49 = vmul.f32 0.01, %v1562_v7 }
 0x3f1   : > { %v4223_v34 = vmax.f32 %v1562_v7, %v1628_v49  ;;  %v1629_v17 = vmul.f32 0.01, %v1565_v15 }
 0x3f3   : > { %1712 = vadd.xlane.f32.xlu0 %v4223_v34  ;;  %v4226_v2 = vmax.f32 %v1565_v15, %v1629_v17 }
 0x3f5   : > { %1714 = vadd.xlane.f32.xlu1 %v4226_v2 }
 0x434   : > { %v2567_v54 = vpop.f32.mrb[60].mxu1 }
 0x435   : > { %v2568_v40 = vpop.f32.mrb[61].mxu1 }
 0x436   : > { %v2569_v25 = vadd.f32 %v2568_v40, %v2567_v54  ;;  %v2570_v35 = vpop.f32.mrb[62].mxu1 }
 0x437   : > { %v2571_v5 = vpop.f32.mrb[63].mxu1 }
 0x438   : > { %v1570_v26 = vadd.f32 %v2569_v25, %v4139_v4  ;;  %v2572_v60 = vadd.f32 %v2571_v5, %v2570_v35 }
 0x43a   : > { %v1573_v61 = vadd.f32 %v2572_v60, %v4139_v4  ;;  %v1630_v38 = vmul.f32 0.01, %v1570_v26 }
 0x43c   : > { %v2573_v14 = vpop.f32.mrb[64].mxu1  ;;  %v4231_v21 = vmax.f32 %v1570_v26, %v1630_v38  ;;  %v1631_v50 = vmul.f32 0.01, %v1573_v61 }
 0x43d   : > { %v2574_v30 = vpop.f32.mrb[65].mxu1 }
 0x43e   : > { %v2575_v58 = vadd.f32 %v2574_v30, %v2573_v14  ;;  %1716 = vadd.xlane.f32.xlu0 %v4231_v21  ;;  %v2576_v43 = vpop.f32.mrb[66].mxu1  ;;  %v4234_v24 = vmax.f32 %v1573_v61, %v1631_v50  ;;  %v1673_v61 = vpop.xlane.xlu0 %1672 }
 0x43f   : > { %v2577_v16 = vpop.f32.mrb[67].mxu1 }
 0x440   : > { %v1578_v41 = vadd.f32 %v2575_v58, %v4139_v4  ;;  %v2578_v19 = vadd.f32 %v2577_v16, %v2576_v43  ;;  %1718 = vadd.xlane.f32.xlu1 %v4234_v24  ;;  %v1675_v58 = vpop.xlane.xlu1 %1674  ;;  %v1737_v16 = vmul.f32 0.0078125, %v1673_v61 }
 0x442   : > { %v1581_v57 = vadd.f32 %v2578_v19, %v4139_v4  ;;  %v1632_v3 = vmul.f32 0.01, %v1578_v41 }
 0x444   : > { %v2579_v22 = vpop.f32.mrb[68].mxu1  ;;  %v4239_v56 = vmax.f32 %v1578_v41, %v1632_v3  ;;  %v1633_v1 = vmul.f32 0.01, %v1581_v57  ;;  %v1738_v3 = vmul.f32 0.0078125, %v1675_v58 }
 0x445   : > { %v2580_v32 = vpop.f32.mrb[69].mxu1 }
 0x446   : > { %v2581_v6 = vadd.f32 %v2580_v32, %v2579_v22  ;;  %1720 = vadd.xlane.f32.xlu0 %v4239_v56  ;;  %v2582_v47 = vpop.f32.mrb[70].mxu1  ;;  %v4242_v46 = vmax.f32 %v1581_v57, %v1633_v1  ;;  %v1677_v57 = vpop.xlane.xlu0 %1676 }
 0x447   : > { %v2583_v33 = vpop.f32.mrb[71].mxu1  ;;  %v1679_v32 = vpop.xlane.xlu1 %1678 }
 0x448   : > { %v1586_v63 = vadd.f32 %v2581_v6, %v4139_v4  ;;  %v2584_v20 = vadd.f32 %v2583_v33, %v2582_v47  ;;  %1722 = vadd.xlane.f32.xlu1 %v4242_v46  ;;  %v4264_v6 = vsub.f32 %v4143_v36, %v1737_v16  ;;  %v1739_v47 = vmul.f32 0.0078125, %v1677_v57 }
 0x44a   : > { %v1589_v59 = vadd.f32 %v2584_v20, %v4139_v4  ;;  %v1634_v51 = vmul.f32 0.01, %v1586_v63  ;;  %v1681_v20 = vpop.xlane.xlu0 %1680  ;;  %v1801_v36 = vmul.f32 %v4264_v6, %v4264_v6 }
 0x44c   : > { %v2585_v42 = vpop.f32.mrb[72].mxu1  ;;  %v4247_v8 = vmax.f32 %v1586_v63, %v1634_v51  ;;  %v1635_v18 = vmul.f32 0.01, %v1589_v59  ;;  %v1740_v51 = vmul.f32 0.0078125, %v1679_v32 }
 0x44d   : > { %v2586_v7 = vpop.f32.mrb[73].mxu1 }
 0x44e   : > { %v2587_v62 = vadd.f32 %v2586_v7, %v2585_v42  ;;  %1724 = vadd.xlane.f32.xlu0 %v4247_v8  ;;  %v2588_v15 = vpop.f32.mrb[74].mxu1  ;;  %v4250_v49 = vmax.f32 %v1589_v59, %v1635_v18  ;;  %v4269_v59 = vsub.f32 %v4146_v27, %v1738_v3  ;;  %v1683_v18 = vpop.xlane.xlu1 %1682  ;;  %v1741_v7 = vmul.f32 0.0078125, %v1681_v20 }
 0x44f   : > { %v2589_v17 = vpop.f32.mrb[75].mxu1  ;;  %v1742_v27 = vmul.f32 0.0078125, %v1683_v18 }
 0x450   : > { %v1594_v54 = vadd.f32 %v2587_v62, %v4139_v4  ;;  %v2590_v40 = vadd.f32 %v2589_v17, %v2588_v15  ;;  %1726 = vadd.xlane.f32.xlu1 %v4250_v49  ;;  %v1685_v62 = vpop.xlane.xlu0 %1684  ;;  %v4281_v15 = vsub.f32 %v4154_v29, %v1740_v51  ;;  %v1802_v17 = vmul.f32 %v4269_v59, %v4269_v59 }
 0x452   : > { %v1597_v25 = vadd.f32 %v2590_v40, %v4139_v4  ;;  %v1636_v35 = vmul.f32 0.01, %v1594_v54  ;;  %v4286_v40 = vsub.f32 %v4159_v37, %v1741_v7 }
 0x454   : > { %v2591_v5 = vpop.f32.mrb[76].mxu1  ;;  %v4255_v26 = vmax.f32 %v1594_v54, %v1636_v35  ;;  %v1637_v60 = vmul.f32 0.01, %v1597_v25  ;;  %v1687_v54 = vpop.xlane.xlu1 %1686 }
 0x455   : > { %v2592_v38 = vpop.f32.mrb[77].mxu1  ;;  %v1689_v35 = vpop.xlane.xlu0 %1688  ;;  %v1744_v29 = vmul.f32 0.0078125, %v1687_v54 }
 0x456   : > { %v2593_v14 = vadd.f32 %v2592_v38, %v2591_v5  ;;  %1728 = vadd.xlane.f32.xlu0 %v4255_v26  ;;  %v2594_v50 = vpop.f32.mrb[78].mxu1  ;;  %v4258_v30 = vmax.f32 %v1597_v25, %v1637_v60  ;;  %v4291_v5 = vsub.f32 %v4162_v10, %v1742_v27  ;;  %v1804_v60 = vmul.f32 %v4281_v15, %v4281_v15  ;;  %v2809_v38 = vld [vmem:[#allocation8] sm:$0xff]   ;;  %v2812_v27 = vld [vmem:[#allocation8 + $0x18] sm:$0xff]  }
 0x457   : > { %v2595_v43 = vpop.f32.mrb[79].mxu1  ;;  %v1745_v37 = vmul.f32 0.0078125, %v1689_v35  ;;  %2621 = vmatprep.subr.bf16.mxu0 %v2809_v38  ;;  %v4301_v10 = vsub.f32 %v4170_v39, %v1744_v29 }
 0x458   : > { %v1602_v41 = vadd.f32 %v2593_v14, %v4139_v4  ;;  %v2596_v19 = vadd.f32 %v2595_v43, %v2594_v50  ;;  %1730 = vadd.xlane.f32.xlu1 %v4258_v30  ;;  %v1691_v61 = vpop.xlane.xlu1 %1690  ;;  %v1805_v50 = vmul.f32 %v4286_v40, %v4286_v40  ;;  %v1806_v16 = vmul.f32 %v4291_v5, %v4291_v5 }
 0x459   : > { %v1693_v58 = vpop.xlane.xlu0 %1692  ;;  %v1746_v43 = vmul.f32 0.0078125, %v1691_v61  ;;  %2622 = vmatpush3.bf16.msra.mxu0 %v2809_v38  ;;  %v1808_v32 = vmul.f32 %v4301_v10, %v4301_v10 }
 0x45a   : > { %v1605_v22 = vadd.f32 %v2596_v19, %v4139_v4  ;;  %v1638_v1 = vmul.f32 0.01, %v1602_v41  ;;  %v4275_v4 = vsub.f32 %v4151_v53, %v1739_v47  ;;  %v1743_v53 = vmul.f32 0.0078125, %v1685_v62  ;;  %v2810_v19 = vld [vmem:[#allocation8 + $0x8] sm:$0xff]  }
 0x45b   : > { %v1747_v57 = vmul.f32 0.0078125, %v1693_v58  ;;  %2623 = vmatprep.subr.bf16.mxu0 %v2810_v19  ;;  %v4311_v39 = vsub.f32 %v4178_v48, %v1746_v43 }
 0x45c   : > { %v4266_v33 = vmax.f32 %v1602_v41, %v1638_v1  ;;  %v1639_v63 = vmul.f32 0.01, %v1605_v22  ;;  %v1803_v25 = vmul.f32 %v4275_v4, %v4275_v4  ;;  %v4296_v14 = vsub.f32 %v4167_v0, %v1743_v53  ;;  %v1695_v41 = vpop.xlane.xlu1 %1694 }
 0x45d   : > { %v4306_v0 = vsub.f32 %v4175_v45, %v1745_v37  ;;  %v1748_v1 = vmul.f32 0.0078125, %v1695_v41  ;;  %2624 = vmatpush3.bf16.msra.mxu0 %v2810_v19  ;;  %v4316_v45 = vsub.f32 %v4183_v23, %v1747_v57 }
 0x45e   : > { %1732 = vadd.xlane.f32.xlu0 %v4266_v33  ;;  %v4272_v42 = vmax.f32 %v1605_v22, %v1639_v63  ;;  %v1807_v3 = vmul.f32 %v4296_v14, %v4296_v14  ;;  %v2811_v63 = vld [vmem:[#allocation8 + $0x10] sm:$0xff]  }
 0x45f   : > { %v1809_v51 = vmul.f32 %v4306_v0, %v4306_v0  ;;  %2625 = vmatprep.subr.bf16.mxu0 %v2811_v63  ;;  %v4321_v48 = vsub.f32 %v4186_v12, %v1748_v1  ;;  %v1811_v54 = vmul.f32 %v4316_v45, %v4316_v45 }
 0x460   : > { %1734 = vadd.xlane.f32.xlu1 %v4272_v42  ;;  %v1697_v22 = vpop.xlane.xlu0 %1696 }
 0x461   : > { %v1749_v20 = vmul.f32 0.0078125, %v1697_v22  ;;  %2626 = vmatpush3.bf16.msra.mxu0 %v2811_v63  ;;  %v1812_v35 = vmul.f32 %v4321_v48, %v4321_v48  ;;  %v2815_v22 = vld [vmem:[#allocation8 + $0x30] sm:$0xff]  }
 0x462   : > { %1833 = vadd.xlane.f32.xlu0 %v1801_v36  ;;  %v1699_v47 = vpop.xlane.xlu1 %1698  ;;  %v1810_v36 = vmul.f32 %v4311_v39, %v4311_v39  ;;  %2627 = vmatprep.subr.bf16.mxu0 %v2812_v27 }
 0x463   : > { %v1750_v7 = vmul.f32 0.0078125, %v1699_v47  ;;  %v4326_v23 = vsub.f32 %v4191_v9, %v1749_v20 }
 0x464   : > { %1835 = vadd.xlane.f32.xlu1 %v1802_v17 }
 0x465   : > { %v4331_v12 = vsub.f32 %v4194_v31, %v1750_v7  ;;  %2628 = vmatpush3.bf16.msra.mxu0 %v2812_v27  ;;  %v1813_v38 = vmul.f32 %v4326_v23, %v4326_v23 }
 0x466   : > { %1837 = vadd.xlane.f32.xlu0 %v1803_v25 }
 0x467   : > { %v1814_v58 = vmul.f32 %v4331_v12, %v4331_v12 }
 0x468   : > { %1839 = vadd.xlane.f32.xlu1 %v1804_v60  ;;  %v1701_v18 = vpop.xlane.xlu0 %1700  ;;  %v2813_v60 = vld [vmem:[#allocation8 + $0x20] sm:$0xff]  }
 0x469   : > { %v1751_v17 = vmul.f32 0.0078125, %v1701_v18  ;;  %2629 = vmatprep.subr.bf16.mxu0 %v2813_v60  ;;  %v2816_v18 = vld [vmem:[#allocation8 + $0x38] sm:$0xff]  }
 0x46a   : > { %1841 = vadd.xlane.f32.xlu0 %v1805_v50  ;;  %v1703_v62 = vpop.xlane.xlu1 %1702  ;;  %2630 = vmatpush3.bf16.msra.mxu0 %v2813_v60 }
 0x46b   : > { %v1752_v25 = vmul.f32 0.0078125, %v1703_v62  ;;  %v4336_v9 = vsub.f32 %v4199_v52, %v1751_v17 }
 0x46c   : > { %1843 = vadd.xlane.f32.xlu1 %v1806_v16  ;;  %v2814_v16 = vld [vmem:[#allocation8 + $0x28] sm:$0xff]  }
 0x46d   : > { %v4341_v31 = vsub.f32 %v4202_v13, %v1752_v25  ;;  %v1815_v19 = vmul.f32 %v4336_v9, %v4336_v9  ;;  %2631 = vmatprep.subr.bf16.mxu0 %v2814_v16 }
 0x46e   : > { %1845 = vadd.xlane.f32.xlu0 %v1807_v3  ;;  %2632 = vmatpush3.bf16.msra.mxu0 %v2814_v16 }
 0x46f   : > { %v1816_v3 = vmul.f32 %v4341_v31, %v4341_v31  ;;  %2633 = vmatprep.subr.bf16.mxu0 %v2815_v22 }
 0x470   : > { %1847 = vadd.xlane.f32.xlu1 %v1808_v32  ;;  %v1705_v53 = vpop.xlane.xlu0 %1704 }
 0x471   : > { %v1753_v61 = vmul.f32 0.0078125, %v1705_v53 }
 0x472   : > { %1849 = vadd.xlane.f32.xlu0 %v1809_v51  ;;  %v1707_v29 = vpop.xlane.xlu1 %1706  ;;  %2634 = vmatpush3.bf16.msra.mxu0 %v2815_v22 }
 0x473   : > { %v1754_v50 = vmul.f32 0.0078125, %v1707_v29  ;;  %v4346_v52 = vsub.f32 %v4207_v44, %v1753_v61  ;;  %2635 = vmatprep.subr.bf16.mxu0 %v2816_v18 }
 0x474   : > { %1851 = vadd.xlane.f32.xlu1 %v1810_v36 }
 0x475   : > { %v4351_v13 = vsub.f32 %v4210_v55, %v1754_v50  ;;  %v1817_v32 = vmul.f32 %v4346_v52, %v4346_v52 }
 0x476   : > { %1853 = vadd.xlane.f32.xlu0 %v1811_v54  ;;  %2636 = vmatpush3.bf16.msra.mxu0 %v2816_v18 }
 0x477   : > { %v1818_v20 = vmul.f32 %v4351_v13, %v4351_v13 }
 0x478   : > { %1855 = vadd.xlane.f32.xlu1 %v1812_v35  ;;  %v1709_v37 = vpop.xlane.xlu0 %1708 }
 0x479   : > { %v1755_v41 = vmul.f32 0.0078125, %v1709_v37 }
 0x47a   : > { %1857 = vadd.xlane.f32.xlu0 %v1813_v38  ;;  %v1711_v43 = vpop.xlane.xlu1 %1710 }
 0x47b   : > { %v1756_v57 = vmul.f32 0.0078125, %v1711_v43  ;;  %v4356_v1 = vsub.f32 %v4215_v11, %v1755_v41 }
 0x47c   : > { %1859 = vadd.xlane.f32.xlu1 %v1814_v58 }
 0x47d   : > { %v4361_v55 = vsub.f32 %v4218_v28, %v1756_v57  ;;  %v1819_v7 = vmul.f32 %v4356_v1, %v4356_v1 }
 0x47e   : > { %1861 = vadd.xlane.f32.xlu0 %v1815_v19 }
 0x47f   : > { %v1820_v28 = vmul.f32 %v4361_v55, %v4361_v55 }
 0x480   : > { %1863 = vadd.xlane.f32.xlu1 %v1816_v3  ;;  %v1713_v44 = vpop.xlane.xlu0 %1712 }
 0x481   : > { %v1757_v47 = vmul.f32 0.0078125, %v1713_v44 }
 0x482   : > { %1865 = vadd.xlane.f32.xlu0 %v1817_v32  ;;  %v1715_v63 = vpop.xlane.xlu1 %1714 }
 0x483   : > { %v1758_v51 = vmul.f32 0.0078125, %v1715_v63  ;;  %v4366_v11 = vsub.f32 %v4223_v34, %v1757_v47 }
 0x484   : > { %1867 = vadd.xlane.f32.xlu1 %v1818_v20 }
 0x485   : > { %v4371_v36 = vsub.f32 %v4226_v2, %v1758_v51  ;;  %v1821_v62 = vmul.f32 %v4366_v11, %v4366_v11 }
 0x486   : > { %1869 = vadd.xlane.f32.xlu0 %v1819_v7 }
 0x487   : > { %v1822_v34 = vmul.f32 %v4371_v36, %v4371_v36 }
 0x488   : > { %1871 = vadd.xlane.f32.xlu1 %v1820_v28 }
 0x48a   : > { %1873 = vadd.xlane.f32.xlu0 %v1821_v62 }
 0x48c   : > { %1875 = vadd.xlane.f32.xlu1 %v1822_v34 }
 0x4cb   : > { %v1717_v27 = vpop.xlane.xlu0 %1716 }
 0x4cc   : > { %v1759_v17 = vmul.f32 0.0078125, %v1717_v27 }
 0x4cd   : > { %v1719_v54 = vpop.xlane.xlu1 %1718 }
 0x4ce   : > { %v4380_v2 = vsub.f32 %v4231_v21, %v1759_v17  ;;  %v1760_v53 = vmul.f32 0.0078125, %v1719_v54 }
 0x4d0   : > { %v4383_v25 = vsub.f32 %v4234_v24, %v1760_v53  ;;  %v1823_v35 = vmul.f32 %v4380_v2, %v4380_v2 }
 0x4d2   : > { %1877 = vadd.xlane.f32.xlu0 %v1823_v35  ;;  %v1824_v29 = vmul.f32 %v4383_v25, %v4383_v25 }
 0x4d3   : > { %v1721_v60 = vpop.xlane.xlu0 %1720 }
 0x4d4   : > { %v1761_v61 = vmul.f32 0.0078125, %v1721_v60  ;;  %1879 = vadd.xlane.f32.xlu1 %v1824_v29 }
 0x4d5   : > { %v1723_v38 = vpop.xlane.xlu1 %1722 }
 0x4d6   : > { %v4390_v37 = vsub.f32 %v4239_v56, %v1761_v61  ;;  %v1762_v21 = vmul.f32 0.0078125, %v1723_v38 }
 0x4d8   : > { %v4393_v50 = vsub.f32 %v4242_v46, %v1762_v21  ;;  %v1825_v24 = vmul.f32 %v4390_v37, %v4390_v37 }
 0x4da   : > { %1881 = vadd.xlane.f32.xlu0 %v1825_v24  ;;  %v1826_v58 = vmul.f32 %v4393_v50, %v4393_v50 }
 0x4db   : > { %v1725_v43 = vpop.xlane.xlu0 %1724 }
 0x4dc   : > { %v1763_v16 = vmul.f32 0.0078125, %v1725_v43  ;;  %1883 = vadd.xlane.f32.xlu1 %v1826_v58 }
 0x4dd   : > { %v1727_v41 = vpop.xlane.xlu1 %1726 }
 0x4de   : > { %v4400_v19 = vsub.f32 %v4247_v8, %v1763_v16  ;;  %v1764_v56 = vmul.f32 0.0078125, %v1727_v41 }
 0x4e0   : > { %v4403_v57 = vsub.f32 %v4250_v49, %v1764_v56  ;;  %v1827_v46 = vmul.f32 %v4400_v19, %v4400_v19 }
 0x4e2   : > { %1885 = vadd.xlane.f32.xlu0 %v1827_v46  ;;  %v1828_v3 = vmul.f32 %v4403_v57, %v4403_v57 }
 0x4e3   : > { %v1729_v22 = vpop.xlane.xlu0 %1728 }
 0x4e4   : > { %v1765_v44 = vmul.f32 0.0078125, %v1729_v22  ;;  %1887 = vadd.xlane.f32.xlu1 %v1828_v3 }
 0x4e5   : > { %v1731_v32 = vpop.xlane.xlu1 %1730 }
 0x4e6   : > { %v4410_v47 = vsub.f32 %v4255_v26, %v1765_v44  ;;  %v1766_v8 = vmul.f32 0.0078125, %v1731_v32 }
 0x4e8   : > { %v4413_v63 = vsub.f32 %v4258_v30, %v1766_v8  ;;  %v1829_v49 = vmul.f32 %v4410_v47, %v4410_v47 }
 0x4ea   : > { %1889 = vadd.xlane.f32.xlu0 %v1829_v49  ;;  %v1830_v20 = vmul.f32 %v4413_v63, %v4413_v63 }
 0x4eb   : > { %v1733_v51 = vpop.xlane.xlu0 %1732 }
 0x4ec   : > { %v1767_v18 = vmul.f32 0.0078125, %v1733_v51  ;;  %1891 = vadd.xlane.f32.xlu1 %v1830_v20 }
 0x4ed   : > { %v1735_v7 = vpop.xlane.xlu1 %1734 }
 0x4ee   : > { %v4420_v28 = vsub.f32 %v4266_v33, %v1767_v18  ;;  %v1768_v26 = vmul.f32 0.0078125, %v1735_v7 }
 0x4ef   : > { %v1834_v62 = vpop.xlane.xlu0 %1833 }
 0x4f0   : > { %v4423_v34 = vsub.f32 %v4272_v42, %v1768_v26  ;;  %v1897_v30 = vmul.f32 0.0078125, %v1834_v62  ;;  %v1831_v27 = vmul.f32 %v4420_v28, %v4420_v28 }
 0x4f1   : > { %v1836_v17 = vpop.xlane.xlu1 %1835 }
 0x4f2   : > { %v1929_v54 = vadd.f32 1e-05, %v1897_v30  ;;  %v1898_v53 = vmul.f32 0.0078125, %v1836_v17  ;;  %1893 = vadd.xlane.f32.xlu0 %v1831_v27  ;;  %v1832_v35 = vmul.f32 %v4423_v34, %v4423_v34 }
 0x4f3   : > { %v1838_v29 = vpop.xlane.xlu0 %1837 }
 0x4f4   : > { %2881 = vrsqrt.f32 %v1929_v54  ;;  %v1930_v33 = vadd.f32 1e-05, %v1898_v53  ;;  %v1899_v60 = vmul.f32 0.0078125, %v1838_v29  ;;  %1895 = vadd.xlane.f32.xlu1 %v1832_v35 }
 0x4f5   : > { %v1840_v61 = vpop.xlane.xlu1 %1839 }
 0x4f6   : > { %2883 = vrsqrt.f32 %v1930_v33  ;;  %v1931_v42 = vadd.f32 1e-05, %v1899_v60  ;;  %v1900_v38 = vmul.f32 0.0078125, %v1840_v61 }
 0x4f7   : > { %v1842_v21 = vpop.xlane.xlu0 %1841 }
 0x4f8   : > { %2885 = vrsqrt.f32 %v1931_v42  ;;  %v1932_v24 = vadd.f32 1e-05, %v1900_v38  ;;  %v1901_v58 = vmul.f32 0.0078125, %v1842_v21 }
 0x4f9   : > { %v1844_v43 = vpop.xlane.xlu1 %1843 }
 0x4fa   : > { %2887 = vrsqrt.f32 %v1932_v24  ;;  %v1933_v16 = vadd.f32 1e-05, %v1901_v58  ;;  %v1902_v41 = vmul.f32 0.0078125, %v1844_v43 }
 0x4fb   : > { %v1846_v56 = vpop.xlane.xlu0 %1845 }
 0x4fc   : > { %2889 = vrsqrt.f32 %v1933_v16  ;;  %v1934_v46 = vadd.f32 1e-05, %v1902_v41  ;;  %v1903_v3 = vmul.f32 0.0078125, %v1846_v56 }
 0x4fd   : > { %v1848_v22 = vpop.xlane.xlu1 %1847 }
 0x4fe   : > { %v2882_v44 = vpop.eup %2881  ;;  %2891 = vrsqrt.f32 %v1934_v46  ;;  %v1935_v32 = vadd.f32 1e-05, %v1903_v3  ;;  %v1904_v8 = vmul.f32 0.0078125, %v1848_v22 }
 0x4ff   : > { %v1850_v49 = vpop.xlane.xlu0 %1849  ;;  %v1993_v26 = vmul.f32 %v2882_v44, %v4264_v6 }
 0x500   : > { %v2884_v20 = vpop.eup %2883  ;;  %2893 = vrsqrt.f32 %v1935_v32  ;;  %v1936_v51 = vadd.f32 1e-05, %v1904_v8  ;;  %v1905_v18 = vmul.f32 0.0078125, %v1850_v49 }
 0x501   : > { %v1852_v7 = vpop.xlane.xlu1 %1851  ;;  %v1994_v62 = vmul.f32 %v2884_v20, %v4269_v59 }
 0x502   : > { %v2886_v30 = vpop.eup %2885  ;;  %2895 = vrsqrt.f32 %v1936_v51  ;;  %v1937_v27 = vadd.f32 1e-05, %v1905_v18  ;;  %v1906_v17 = vmul.f32 0.0078125, %v1852_v7 }
 0x503   : > { %v1854_v54 = vpop.xlane.xlu0 %1853  ;;  %v2025_v53 = vpack.c.bf16 %v1994_v62, %v1993_v26  ;;  %v1995_v60 = vmul.f32 %v2886_v30, %v4275_v4 }
 0x504   : > { %v2888_v35 = vpop.eup %2887  ;;  %2897 = vrsqrt.f32 %v1937_v27  ;;  %v1938_v29 = vadd.f32 1e-05, %v1906_v17  ;;  %v1907_v33 = vmul.f32 0.0078125, %v1854_v54 }
 0x505   : > { %v1996_v61 = vmul.f32 %v2888_v35, %v4281_v15  ;;  %v1856_v42 = vpop.xlane.xlu1 %1855  ;;  %2637 = vmatprep.mubr.bf16.mxu0 %v2025_v53 }
 0x506   : > { %v2890_v38 = vpop.eup %2889  ;;  %2899 = vrsqrt.f32 %v1938_v29  ;;  %v1939_v6 = vadd.f32 1e-05, %v1907_v33  ;;  %v1908_v59 = vmul.f32 0.0078125, %v1856_v42 }
 0x507   : > { %v1858_v21 = vpop.xlane.xlu0 %1857  ;;  %v2026_v24 = vpack.c.bf16 %v1996_v61, %v1995_v60  ;;  %v1997_v56 = vmul.f32 %v2890_v38, %v4286_v40 }
 0x508   : > { %v2892_v58 = vpop.eup %2891  ;;  %2901 = vrsqrt.f32 %v1939_v6  ;;  %v1940_v43 = vadd.f32 1e-05, %v1908_v59  ;;  %v1909_v16 = vmul.f32 0.0078125, %v1858_v21 }
 0x509   : > { %v1860_v41 = vpop.xlane.xlu1 %1859  ;;  %2638 = vmatmul.mubr.bf16.vlgmr.msra.gmra.mrb[48].mxu0 %v2026_v24  ;;  %v1998_v4 = vmul.f32 %v2892_v58, %v4291_v5 }
 0x50a   : > { %v2894_v46 = vpop.eup %2893  ;;  %2903 = vrsqrt.f32 %v1940_v43  ;;  %v1941_v15 = vadd.f32 1e-05, %v1909_v16  ;;  %v1910_v3 = vmul.f32 0.0078125, %v1860_v41 }
 0x50b   : > { %v1862_v22 = vpop.xlane.xlu0 %1861  ;;  %v2027_v44 = vpack.c.bf16 %v1998_v4, %v1997_v56  ;;  %v1999_v51 = vmul.f32 %v2894_v46, %v4296_v14 }
 0x50c   : > { %v2896_v32 = vpop.eup %2895  ;;  %2905 = vrsqrt.f32 %v1941_v15  ;;  %v1942_v8 = vadd.f32 1e-05, %v1910_v3  ;;  %v1911_v49 = vmul.f32 0.0078125, %v1862_v22 }
 0x50d   : > { %v1864_v20 = vpop.xlane.xlu1 %1863  ;;  %2641 = vmatprep.mubr.bf16.mxu0 %v2027_v44  ;;  %v2000_v18 = vmul.f32 %v2896_v32, %v4301_v10 }
 0x50e   : > { %v2898_v7 = vpop.eup %2897  ;;  %2907 = vrsqrt.f32 %v1942_v8  ;;  %v1943_v40 = vadd.f32 1e-05, %v1911_v49  ;;  %v1912_v5 = vmul.f32 0.0078125, %v1864_v20 }
 0x50f   : > { %v1866_v26 = vpop.xlane.xlu0 %1865  ;;  %v2028_v62 = vpack.c.bf16 %v2000_v18, %v1999_v51  ;;  %v2001_v53 = vmul.f32 %v2898_v7, %v4306_v0 }
 0x510   : > { %v2900_v30 = vpop.eup %2899  ;;  %2909 = vrsqrt.f32 %v1943_v40  ;;  %v1944_v27 = vadd.f32 1e-05, %v1912_v5  ;;  %v1913_v17 = vmul.f32 0.0078125, %v1866_v26 }
 0x511   : > { %v1868_v54 = vpop.xlane.xlu1 %1867  ;;  %2642 = vmatmul.mubr.bf16.gmra.mrb[52].mxu0 %v2028_v62  ;;  %v2002_v35 = vmul.f32 %v2900_v30, %v4311_v39 }
 0x512   : > { %v2902_v29 = vpop.eup %2901  ;;  %2911 = vrsqrt.f32 %v1944_v27  ;;  %v1945_v14 = vadd.f32 1e-05, %v1913_v17  ;;  %v1914_v10 = vmul.f32 0.0078125, %v1868_v54 }
 0x513   : > { %v1870_v33 = vpop.xlane.xlu0 %1869  ;;  %v2029_v60 = vpack.c.bf16 %v2002_v35, %v2001_v53  ;;  %v2003_v59 = vmul.f32 %v2902_v29, %v4316_v45 }
 0x514   : > { %v2904_v61 = vpop.eup %2903  ;;  %2913 = vrsqrt.f32 %v1945_v14  ;;  %v1946_v42 = vadd.f32 1e-05, %v1914_v10  ;;  %v1915_v38 = vmul.f32 0.0078125, %v1870_v33 }
 0x515   : > { %v1872_v6 = vpop.xlane.xlu1 %1871  ;;  %2645 = vmatprep.mubr.bf16.mxu0 %v2029_v60  ;;  %v2004_v21 = vmul.f32 %v2904_v61, %v4321_v48 }
 0x516   : > { %v2906_v24 = vpop.eup %2905  ;;  %2915 = vrsqrt.f32 %v1946_v42  ;;  %v1947_v0 = vadd.f32 1e-05, %v1915_v38  ;;  %v1916_v39 = vmul.f32 0.0078125, %v1872_v6 }
 0x517   : > { %v1874_v58 = vpop.xlane.xlu0 %1873  ;;  %v2030_v43 = vpack.c.bf16 %v2004_v21, %v2003_v59  ;;  %v2005_v46 = vmul.f32 %v2906_v24, %v4326_v23 }
 0x518   : > { %v2908_v16 = vpop.eup %2907  ;;  %2917 = vrsqrt.f32 %v1947_v0  ;;  %v1948_v41 = vadd.f32 1e-05, %v1916_v39  ;;  %v1917_v56 = vmul.f32 0.0078125, %v1874_v58 }
 0x519   : > { %v1876_v4 = vpop.xlane.xlu1 %1875  ;;  %2646 = vmatmul.mubr.bf16.gmra.mrb[56].mxu0 %v2030_v43  ;;  %v2006_v15 = vmul.f32 %v2908_v16, %v4331_v12 }
 0x51a   : > { %v2910_v3 = vpop.eup %2909  ;;  %2919 = vrsqrt.f32 %v1948_v41  ;;  %v1949_v45 = vadd.f32 1e-05, %v1917_v56  ;;  %v1918_v48 = vmul.f32 0.0078125, %v1876_v4 }
 0x51b   : > { %v2031_v22 = vpack.c.bf16 %v2006_v15, %v2005_v46  ;;  %v2007_v8 = vmul.f32 %v2910_v3, %v4336_v9 }
 0x51c   : > { %v2912_v44 = vpop.eup %2911  ;;  %2921 = vrsqrt.f32 %v1949_v45  ;;  %v1950_v32 = vadd.f32 1e-05, %v1918_v48 }
 0x51d   : > { %2649 = vmatprep.mubr.bf16.mxu0 %v2031_v22  ;;  %v2008_v49 = vmul.f32 %v2912_v44, %v4341_v31 }
 0x51e   : > { %v2914_v20 = vpop.eup %2913  ;;  %2923 = vrsqrt.f32 %v1950_v32 }
 0x51f   : > { %v2032_v51 = vpack.c.bf16 %v2008_v49, %v2007_v8  ;;  %v2009_v23 = vmul.f32 %v2914_v20, %v4346_v52 }
 0x520   : > { %v2916_v18 = vpop.eup %2915 }
 0x521   : > { %2650 = vmatmul.mubr.bf16.gmra.mrb[60].mxu0 %v2032_v51  ;;  %v2010_v12 = vmul.f32 %v2916_v18, %v4351_v13 }
 0x522   : > { %v2918_v7 = vpop.eup %2917 }
 0x523   : > { %v2033_v40 = vpack.c.bf16 %v2010_v12, %v2009_v23  ;;  %v2011_v26 = vmul.f32 %v2918_v7, %v4356_v1 }
 0x524   : > { %v2920_v5 = vpop.eup %2919 }
 0x525   : > { %2653 = vmatprep.mubr.bf16.mxu0 %v2033_v40  ;;  %v2012_v62 = vmul.f32 %v2920_v5, %v4361_v55 }
 0x526   : > { %v2922_v9 = vpop.eup %2921 }
 0x527   : > { %v2034_v30 = vpack.c.bf16 %v2012_v62, %v2011_v26  ;;  %v2013_v27 = vmul.f32 %v2922_v9, %v4366_v11 }
 0x528   : > { %v2924_v31 = vpop.eup %2923 }
 0x529   : > { %2654 = vmatmul.mubr.bf16.gmra.mrb[64].mxu0 %v2034_v30  ;;  %v2014_v17 = vmul.f32 %v2924_v31, %v4371_v36  ;;  %v4464_v30 = vld [vmem:[%s4589_s4 + $0x3] ss:$0 sm:$0xff] }
 0x52b   : > { %v2035_v54 = vpack.c.bf16 %v2014_v17, %v2013_v27 }
 0x52d   : > { %2657 = vmatprep.mubr.bf16.mxu0 %v2035_v54 }
 0x55f   : > { %v1878_v52 = vpop.xlane.xlu0 %1877 }
 0x560   : > { %v1919_v13 = vmul.f32 0.0078125, %v1878_v52 }
 0x561   : > { %v1880_v53 = vpop.xlane.xlu1 %1879 }
 0x562   : > { %v1951_v35 = vadd.f32 1e-05, %v1919_v13  ;;  %v1920_v29 = vmul.f32 0.0078125, %v1880_v53 }
 0x564   : > { %2925 = vrsqrt.f32 %v1951_v35  ;;  %v1952_v14 = vadd.f32 1e-05, %v1920_v29 }
 0x566   : > { %2927 = vrsqrt.f32 %v1952_v14 }
 0x567   : > { %v1882_v1 = vpop.xlane.xlu0 %1881 }
 0x568   : > { %v1921_v55 = vmul.f32 0.0078125, %v1882_v1 }
 0x569   : > { %v1884_v10 = vpop.xlane.xlu1 %1883 }
 0x56a   : > { %v1953_v33 = vadd.f32 1e-05, %v1921_v55  ;;  %v1922_v60 = vmul.f32 0.0078125, %v1884_v10 }
 0x56c   : > { %2929 = vrsqrt.f32 %v1953_v33  ;;  %v1954_v61 = vadd.f32 1e-05, %v1922_v60 }
 0x56e   : > { %v2926_v11 = vpop.eup %2925  ;;  %2931 = vrsqrt.f32 %v1954_v61 }
 0x56f   : > { %v1886_v36 = vpop.xlane.xlu0 %1885  ;;  %v2015_v59 = vmul.f32 %v2926_v11, %v4380_v2 }
 0x570   : > { %v2928_v42 = vpop.eup %2927  ;;  %v1923_v38 = vmul.f32 0.0078125, %v1886_v36 }
 0x571   : > { %v1888_v6 = vpop.xlane.xlu1 %1887  ;;  %v2016_v21 = vmul.f32 %v2928_v42, %v4383_v25 }
 0x572   : > { %v1955_v24 = vadd.f32 1e-05, %v1923_v38  ;;  %v1924_v0 = vmul.f32 0.0078125, %v1888_v6 }
 0x573   : > { %v2036_v39 = vpack.c.bf16 %v2016_v21, %v2015_v59 }
 0x574   : > { %2933 = vrsqrt.f32 %v1955_v24  ;;  %v1956_v58 = vadd.f32 1e-05, %v1924_v0 }
 0x575   : > { %2658 = vmatmul.mubr.bf16.gmra.mrb[68].mxu0 %v2036_v39 }
 0x576   : > { %v2930_v43 = vpop.eup %2929  ;;  %2935 = vrsqrt.f32 %v1956_v58 }
 0x577   : > { %v1890_v16 = vpop.xlane.xlu0 %1889  ;;  %v2017_v46 = vmul.f32 %v2930_v43, %v4390_v37 }
 0x578   : > { %v2932_v41 = vpop.eup %2931  ;;  %v1925_v56 = vmul.f32 0.0078125, %v1890_v16 }
 0x579   : > { %v1892_v4 = vpop.xlane.xlu1 %1891  ;;  %v2018_v15 = vmul.f32 %v2932_v41, %v4393_v50 }
 0x57a   : > { %v1957_v3 = vadd.f32 1e-05, %v1925_v56  ;;  %v1926_v2 = vmul.f32 0.0078125, %v1892_v4 }
 0x57b   : > { %v2037_v45 = vpack.c.bf16 %v2018_v15, %v2017_v46 }
 0x57c   : > { %2937 = vrsqrt.f32 %v1957_v3  ;;  %v1958_v25 = vadd.f32 1e-05, %v1926_v2 }
 0x57d   : > { %2661 = vmatprep.mubr.bf16.mxu0 %v2037_v45 }
 0x57e   : > { %v2934_v48 = vpop.eup %2933  ;;  %2939 = vrsqrt.f32 %v1958_v25 }
 0x57f   : > { %v1894_v22 = vpop.xlane.xlu0 %1893  ;;  %v2019_v49 = vmul.f32 %v2934_v48, %v4400_v19 }
 0x580   : > { %v2936_v44 = vpop.eup %2935  ;;  %v1927_v32 = vmul.f32 0.0078125, %v1894_v22 }
 0x581   : > { %v1896_v8 = vpop.xlane.xlu1 %1895  ;;  %v2020_v20 = vmul.f32 %v2936_v44, %v4403_v57 }
 0x582   : > { %v1959_v51 = vadd.f32 1e-05, %v1927_v32  ;;  %v1928_v37 = vmul.f32 0.0078125, %v1896_v8 }
 0x583   : > { %v2038_v18 = vpack.c.bf16 %v2020_v20, %v2019_v49 }
 0x584   : > { %2941 = vrsqrt.f32 %v1959_v51  ;;  %v1960_v50 = vadd.f32 1e-05, %v1928_v37 }
 0x585   : > { %2662 = vmatmul.mubr.bf16.gmra.mrb[72].mxu0 %v2038_v18 }
 0x586   : > { %v2938_v23 = vpop.eup %2937  ;;  %2943 = vrsqrt.f32 %v1960_v50 }
 0x587   : > { %v2021_v7 = vmul.f32 %v2938_v23, %v4410_v47 }
 0x588   : > { %v2940_v12 = vpop.eup %2939 }
 0x589   : > { %v2022_v40 = vmul.f32 %v2940_v12, %v4413_v63 }
 0x58b   : > { %v2039_v5 = vpack.c.bf16 %v2022_v40, %v2021_v7 }
 0x58d   : > { %2665 = vmatprep.mubr.bf16.mxu0 %v2039_v5 }
 0x58e   : > { %v2942_v26 = vpop.eup %2941 }
 0x58f   : > { %v2023_v57 = vmul.f32 %v2942_v26, %v4420_v28 }
 0x590   : > { %v2944_v19 = vpop.eup %2943 }
 0x591   : > { %v2024_v62 = vmul.f32 %v2944_v19, %v4423_v34 }
 0x593   : > { %v2040_v9 = vpack.c.bf16 %v2024_v62, %v2023_v57 }
 0x595   : > { %2666 = vmatmul.mubr.bf16.gmra.mrb[76].mxu0 %v2040_v9 }
 0x5dc   : > { %v2639_v31 = vpop.f32.mrb[48].mxu0 }
 0x5dd   : > { %v2155_v47 = vadd.f32 %v2639_v31, %v4464_v30  ;;  %v2146_v27 = vpop.f32.mrb[49].mxu0 }
 0x5de   : > { %v2147_v63 = vadd.f32 %v4464_v30, %v2146_v27  ;;  %v2640_v17 = vpop.f32.mrb[50].mxu0 }
 0x5df   : > { %2275 = vst [vmem:[%s4470_s30 + $0x10] sm:$0xff] %v2155_v47  ;;  %v2158_v28 = vadd.f32 %v2640_v17, %v4464_v30  ;;  %v2149_v34 = vpop.f32.mrb[51].mxu0 }
 0x5e0   : > { %2273 = vst [vmem:[%s4470_s30] sm:$0xff] %v2147_v63  ;;  %v2150_v54 = vadd.f32 %v4464_v30, %v2149_v34 }
 0x5e1   : > { %2276 = vst [vmem:[%s4470_s30 + $0x18] sm:$0xff] %v2158_v28 }
 0x5e2   : > { %2274 = vst [vmem:[%s4470_s30 + $0x8] sm:$0xff] %v2150_v54 }
 0x5e4   : > { %v2643_v52 = vpop.f32.mrb[52].mxu0 }
 0x5e5   : > { %v2171_v13 = vadd.f32 %v2643_v52, %v4464_v30  ;;  %v2162_v53 = vpop.f32.mrb[53].mxu0 }
 0x5e6   : > { %v2163_v35 = vadd.f32 %v4464_v30, %v2162_v53  ;;  %v2644_v29 = vpop.f32.mrb[54].mxu0 }
 0x5e7   : > { %2279 = vst [vmem:[%s4470_s30 + $0x30] sm:$0xff] %v2171_v13  ;;  %v2174_v14 = vadd.f32 %v2644_v29, %v4464_v30  ;;  %v2165_v1 = vpop.f32.mrb[55].mxu0 }
 0x5e8   : > { %2277 = vst [vmem:[%s4470_s30 + $0x20] sm:$0xff] %v2163_v35  ;;  %v2166_v55 = vadd.f32 %v4464_v30, %v2165_v1 }
 0x5e9   : > { %2280 = vst [vmem:[%s4470_s30 + $0x38] sm:$0xff] %v2174_v14 }
 0x5ea   : > { %2278 = vst [vmem:[%s4470_s30 + $0x28] sm:$0xff] %v2166_v55 }
 0x5ec   : > { %v2647_v10 = vpop.f32.mrb[56].mxu0 }
 0x5ed   : > { %v2187_v33 = vadd.f32 %v2647_v10, %v4464_v30  ;;  %v2178_v60 = vpop.f32.mrb[57].mxu0 }
 0x5ee   : > { %v2179_v61 = vadd.f32 %v4464_v30, %v2178_v60  ;;  %v2648_v11 = vpop.f32.mrb[58].mxu0 }
 0x5ef   : > { %2283 = vst [vmem:[%s4470_s30 + $0x50] sm:$0xff] %v2187_v33  ;;  %v2190_v36 = vadd.f32 %v2648_v11, %v4464_v30  ;;  %v2181_v42 = vpop.f32.mrb[59].mxu0 }
 0x5f0   : > { %2281 = vst [vmem:[%s4470_s30 + $0x40] sm:$0xff] %v2179_v61  ;;  %v2182_v38 = vadd.f32 %v4464_v30, %v2181_v42 }
 0x5f1   : > { %2284 = vst [vmem:[%s4470_s30 + $0x58] sm:$0xff] %v2190_v36 }
 0x5f2   : > { %2282 = vst [vmem:[%s4470_s30 + $0x48] sm:$0xff] %v2182_v38 }
 0x5f4   : > { %v2651_v6 = vpop.f32.mrb[60].mxu0 }
 0x5f5   : > { %v2203_v59 = vadd.f32 %v2651_v6, %v4464_v30  ;;  %v2194_v21 = vpop.f32.mrb[61].mxu0 }
 0x5f6   : > { %v2195_v24 = vadd.f32 %v4464_v30, %v2194_v21  ;;  %v2652_v0 = vpop.f32.mrb[62].mxu0 }
 0x5f7   : > { %2287 = vst [vmem:[%s4470_s30 + $0x70] sm:$0xff] %v2203_v59  ;;  %v2206_v39 = vadd.f32 %v2652_v0, %v4464_v30  ;;  %v2197_v58 = vpop.f32.mrb[63].mxu0 }
 0x5f8   : > { %2285 = vst [vmem:[%s4470_s30 + $0x60] sm:$0xff] %v2195_v24  ;;  %v2198_v43 = vadd.f32 %v4464_v30, %v2197_v58 }
 0x5f9   : > { %2288 = vst [vmem:[%s4470_s30 + $0x78] sm:$0xff] %v2206_v39 }
 0x5fa   : > { %2286 = vst [vmem:[%s4470_s30 + $0x68] sm:$0xff] %v2198_v43 }
 0x5fc   : > { %v2655_v16 = vpop.f32.mrb[64].mxu0 }
 0x5fd   : > { %v2219_v41 = vadd.f32 %v2655_v16, %v4464_v30  ;;  %v2210_v56 = vpop.f32.mrb[65].mxu0 }
 0x5fe   : > { %v2211_v4 = vadd.f32 %v4464_v30, %v2210_v56  ;;  %v2656_v46 = vpop.f32.mrb[66].mxu0 }
 0x5ff   : > { %2291 = vst [vmem:[%s4470_s30 + $0x90] sm:$0xff] %v2219_v41  ;;  %v2222_v15 = vadd.f32 %v2656_v46, %v4464_v30  ;;  %v2213_v3 = vpop.f32.mrb[67].mxu0 }
 0x600   : > { %2289 = vst [vmem:[%s4470_s30 + $0x80] sm:$0xff] %v2211_v4  ;;  %v2214_v2 = vadd.f32 %v4464_v30, %v2213_v3 }
 0x601   : > { %2292 = vst [vmem:[%s4470_s30 + $0x98] sm:$0xff] %v2222_v15 }
 0x602   : > { %2290 = vst [vmem:[%s4470_s30 + $0x88] sm:$0xff] %v2214_v2 }
 0x648   : > { %v2659_v45 = vpop.f32.mrb[68].mxu0 }
 0x649   : > { %v2235_v25 = vadd.f32 %v2659_v45, %v4464_v30  ;;  %v2226_v48 = vpop.f32.mrb[69].mxu0 }
 0x64a   : > { %v2227_v22 = vadd.f32 %v4464_v30, %v2226_v48  ;;  %v2660_v44 = vpop.f32.mrb[70].mxu0 }
 0x64b   : > { %2295 = vst [vmem:[%s4470_s30 + $0xb0] sm:$0xff] %v2235_v25  ;;  %v2238_v32 = vadd.f32 %v2660_v44, %v4464_v30  ;;  %v2229_v8 = vpop.f32.mrb[71].mxu0 }
 0x64c   : > { %2293 = vst [vmem:[%s4470_s30 + $0xa0] sm:$0xff] %v2227_v22  ;;  %v2230_v49 = vadd.f32 %v4464_v30, %v2229_v8 }
 0x64d   : > { %2296 = vst [vmem:[%s4470_s30 + $0xb8] sm:$0xff] %v2238_v32 }
 0x64e   : > { %2294 = vst [vmem:[%s4470_s30 + $0xa8] sm:$0xff] %v2230_v49 }
 0x658   : > { %v2663_v20 = vpop.f32.mrb[72].mxu0 }
 0x659   : > { %v2251_v51 = vadd.f32 %v2663_v20, %v4464_v30  ;;  %v2242_v37 = vpop.f32.mrb[73].mxu0 }
 0x65a   : > { %v2243_v18 = vadd.f32 %v4464_v30, %v2242_v37  ;;  %v2664_v50 = vpop.f32.mrb[74].mxu0 }
 0x65b   : > { %2299 = vst [vmem:[%s4470_s30 + $0xd0] sm:$0xff] %v2251_v51  ;;  %v2254_v23 = vadd.f32 %v2664_v50, %v4464_v30  ;;  %v2245_v12 = vpop.f32.mrb[75].mxu0 }
 0x65c   : > { %2297 = vst [vmem:[%s4470_s30 + $0xc0] sm:$0xff] %v2243_v18  ;;  %v2246_v7 = vadd.f32 %v4464_v30, %v2245_v12 }
 0x65d   : > { %2300 = vst [vmem:[%s4470_s30 + $0xd8] sm:$0xff] %v2254_v23 }
 0x65e   : > { %2298 = vst [vmem:[%s4470_s30 + $0xc8] sm:$0xff] %v2246_v7 }
 0x668   : > { %v2667_v40 = vpop.f32.mrb[76].mxu0 }
 0x669   : > { %v2267_v5 = vadd.f32 %v2667_v40, %v4464_v30  ;;  %v2258_v26 = vpop.f32.mrb[77].mxu0 }
 0x66a   : > { %v2259_v19 = vadd.f32 %v4464_v30, %v2258_v26  ;;  %v2668_v57 = vpop.f32.mrb[78].mxu0 }
 0x66b   : > { %2303 = vst [vmem:[%s4470_s30 + $0xf0] sm:$0xff] %v2267_v5  ;;  %v2270_v62 = vadd.f32 %v2668_v57, %v4464_v30  ;;  %v2261_v9 = vpop.f32.mrb[79].mxu0 }
 0x66c   : > { %2301 = vst [vmem:[%s4470_s30 + $0xe0] sm:$0xff] %v2259_v19  ;;  %v2262_v31 = vadd.f32 %v4464_v30, %v2261_v9 }
 0x66d   : > { %2304 = vst [vmem:[%s4470_s30 + $0xf8] sm:$0xff] %v2270_v62 }
 0x66e   : > { %2302 = vst [vmem:[%s4470_s30 + $0xe8] sm:$0xff] %v2262_v31 }
 0x66f   : > { %3072 = shalt.err (!%p3069_p4)
}
 0x670   : > { %s3073_s26 = scalar_lea.hbm %s4535_s27, 4096  ;;  %s3077_s6 = scalar_lea.hbm %s4590_s5, 8192 }
 0x671   : > { %p3074_p9 = scmp.ne.s32.totalorder %s4535_s27, %s3073_s26  ;;  %p3078_p8 = scmp.lt.u32.totalorder %s4535_s27, %s4590_s5 }
 0x672   : > { %p3079_p13 = scmp.lt.u32.totalorder %s3077_s6, %s3073_s26  ;;  %p3081_p10 = scmp.lt.u32.totalorder %s3073_s26, %s4535_s27 }
 0x673   : > { %p3075_p0 = pnand %p3074_p9, %p3322_p5 }
 0x674   : > { %p3080_p6 = por %p3079_p13, %p3078_p8 }
 0x675   : > { %p3076_p11 = pneg %p3075_p0 }
 0x676   : > { %p3082_p3 = por %p3081_p10, %p3080_p6 }
 0x678   : > { %p3083_p7 = pnand %p3082_p3, %p3076_p11 }
 0x67a   : > { %3086 = shalt.err (!%p3083_p7)
}
 0x67b   : > { %s3145_s11 = smov 128   ;;  %s3146_s15 = smov 8  }
 0x67c   : > { %2699 = dma.vmem_to_hbm [thread:$0]  (%p3322_p5), %s4537_s13, 4096, %s4535_s27, %s2306_s22, %s3145_s11, %s3145_s11, %s3146_s15  }
 0x67d PF: > { %s2334_s23 = sand.u32 1, %s3121_s18   ;;  %p4720_p12 = scmp.ne.s32.totalorder %s4633_s25, 0 }
 0x67e   : > { %p4721_p1 = scmp.ge.s32.totalorder %s3133_s21, 2  ;;  %s2335_s16 = scalar_lea.sflag [#allocation4], %s2334_s23 }
 0x680   : > { %p2716_p2 = pnand %p4721_p1, %p4720_p12 }
 0x682   : > { %3116 = dma.done.wait (!%p2716_p2), %s2335_s16, 4096  }
 0x683   : > { %3118 = vsyncadd (!%p2716_p2), %s2335_s16, 4294963200  ;;  %p20_p4 = scmp.ge.s32.totalorder %s3290_s8, 4   ;;  %s4722_s18 = smov %s3125_s19 }
 0x684   : > { %s4723_s19 = smov %s3129_s20  ;;  %s4724_s20 = smov %s3318_s29 }
 0x685   : > { %s4725_s21 = smov %s3290_s8  ;;  %22 = sbr.rel (!%p20_p4) target bundleno = 7 (0x7), region = 97 }
 0x68c   :  { %2340 = vsyncpa [#allocation3], 1 }
 0x68d   :  { %2342 = vsyncpa [#allocation3 + $0x1], 1 }
 0x68e   :  { %2343 = vsyncpa [#allocation6], 1 }
 0x68f   :  { %2344 = vsyncpa [#allocation9], 1 }
 0x690   :  { %2345 = vsyncpa [#allocation4], 1 }
 0x691   :  { %2347 = vsyncpa [#allocation4 + $0x1], 1 }

// kernel: tpu_custom_call.1
= control target key start
LH: loop header
LB: loop body
LE: loop exit
PB: predicated region body
PF: predicated region fallthrough
CT: control target
= control target key end

     0   :  { %10 = vsyncpa [#allocation3], 0  ;;  %s4585_s0 = inlined_call_operand.hbm [shape: f32[512,128], index: 0, kind: input, shape index: {}]   ;;  %s4586_s1 = inlined_call_operand.hbm [shape: bf16[128,256], index: 1, kind: input, shape index: {}]   ;;  %s4587_s2 = inlined_call_operand.hbm [shape: bf16[256,128], index: 2, kind: input, shape index: {}]   ;;  %s4588_s3 = inlined_call_operand.hbm [shape: bf16[128,128], index: 3, kind: input, shape index: {}]   ;;  %s4589_s4 = inlined_call_operand.vmem [shape: f32[1,512], index: 4, kind: input, shape index: {}]   ;;  %s4590_s5 = inlined_call_operand.hbm [shape: f32[512,128], index: 5, kind: output, shape index: {}]  }
   0x1   :  { %12 = vsyncpa [#allocation3 + $0x1], 0 }
   0x2   :  { %13 = vsyncpa [#allocation6], 0 }
   0x3   :  { %14 = vsyncpa [#allocation9], 0 }
   0x4   :  { %15 = vsyncpa [#allocation4], 0 }
   0x5   :  { %17 = vsyncpa [#allocation4 + $0x1], 0  ;;  %s3177_s18 = smov 0   ;;  %s3179_s19 = smov 0  }
   0x6   :  { %s3181_s20 = smov 0   ;;  %s3183_s21 = smov 0  }
   0x7 LB: > { %s3198_s22 = sadd.s32 4294967295, %s3133_s21   ;;  %s2421_s23 = sadd.s32 4294967294, %s3133_s21   ;;  %s3133_s21 = sphi %s3183_s21, %s4725_s21   ;;  %s3129_s20 = sphi %s3181_s20, %s4724_s20   ;;  %s3125_s19 = sphi %s3179_s19, %s4723_s19   ;;  %s3121_s18 = sphi %s3177_s18, %s4722_s18  }
   0x8   : > { %p43_p0 = scmp.ne.s32.totalorder %s3125_s19, %s3121_s18  ;;  %p4591_p1 = scmp.eq.s32.totalorder %s3198_s22, 0 }
   0x9   : > { %p157_p3 = scmp.eq.s32.totalorder %s2421_s23, 1  ;;  %p2422_p5 = scmp.ge.s32.totalorder %s3133_s21, 1 }
   0xa   : > { %p3207_p4 = por %p4591_p1, %p43_p0  ;;  %p164_p7 = scmp.lt.s32.totalorder %s3133_s21, 3 }
   0xb   : > { %p3212_p6 = por %p157_p3, %p43_p0  ;;  %s3135_s27 = smov [#allocation5]  }
   0xc   : > { %s4632_s24 = scalar_select %p3207_p4, 1, 0 }
   0xd   : > { %s4633_s25 = scalar_select %p3212_p6, 1, 0 }
   0xe   : > { %p3217_p8 = pnand %p2422_p5, %p164_p7  ;;  %s176_s28 = sshll.u32 %s3135_s27, 4  ;;  %s3221_s28 = int_to_ptr.vmem [resolvable:$true] %s176_s28 }
   0xf   : > { %s3136_s30 = smov [#allocation7]   ;;  %s2945_s9 = scalar_lea.hbm %s4586_s1, 2048 }
  0x10   : > { %s4634_s26 = scalar_select %p3217_p8, 1, 0 }
  0x11   : > { %p2701_p9 = pneg %p3217_p8  ;;  %s189_s6 = sshll.u32 %s3136_s30, 4  ;;  %s3232_s6 = int_to_ptr.vmem [resolvable:$true] %s189_s6 }
  0x12   : > { %p2946_p12 = scmp.ne.s32.totalorder %s4586_s1, %s2945_s9  ;;  %p2952_p5 = scmp.lt.u32.totalorder %s2945_s9, %s4586_s1 }
  0x13   : > { %p3228_p11 = pnand %p2701_p9, %p4591_p1 }
  0x15   : > { %p3242_p13 = pneg %p3228_p11 }
  0x17   : > { %p2948_p0 = pnand %p3242_p13, %p2946_p12 }
  0x19   : > { %p2949_p3 = pneg %p2948_p0 }
  0x1b   : > { %p2954_p7 = pnand %p2952_p5, %p2949_p3 }
  0x1d   : > { %2957 = shalt.err (!%p2954_p7)
}
  0x1e   : > { %s2958_s15 = scalar_lea.vmem %s3221_s28, 2048  ;;  %p2966_p2 = scmp.lt.s32.totalorder %s3221_s28, %s3221_s28 }
  0x1f   : > { %p2959_p9 = scmp.ne.s32.totalorder %s3221_s28, %s2958_s15  ;;  %p2967_p6 = scmp.lt.s32.totalorder %s2958_s15, %s2958_s15 }
  0x21   : > { %p2961_p10 = pnand %p2959_p9, %p3242_p13  ;;  %p2968_p12 = por %p2967_p6, %p2966_p2 }
  0x23   : > { %p2962_p1 = pneg %p2961_p10 }
  0x25   : > { %p2969_p0 = pnand %p2968_p12, %p2962_p1 }
  0x27   : > { %2972 = shalt.err (!%p2969_p0)
}
  0x28   : > { %s4592_s16 = smov 128   ;;  %s4593_s17 = smov 8  }
  0x29   : > { %2704 = dma.hbm_to_vmem [thread:$0]  (!%p3228_p11), %s4586_s1, 2048, %s3221_s28, [#allocation6], %s4592_s16, %s4592_s16, %s4593_s17  }
  0x2a   : > { %s2973_s8 = scalar_lea.hbm %s4587_s2, 2048 }
  0x2b   : > { %p2974_p1 = scmp.ne.s32.totalorder %s4587_s2, %s2973_s8  ;;  %p2980_p10 = scmp.lt.u32.totalorder %s2973_s8, %s4587_s2 }
  0x2d   : > { %p2976_p2 = pnand %p2974_p1, %p3242_p13 }
  0x2f   : > { %p2977_p6 = pneg %p2976_p2 }
  0x31   : > { %p2982_p3 = pnand %p2980_p10, %p2977_p6 }
  0x33   : > { %2985 = shalt.err (!%p2982_p3)
}
  0x34   : > { %s2986_s28 = scalar_lea.vmem %s3232_s6, 2048  ;;  %p2994_p12 = scmp.lt.s32.totalorder %s3232_s6, %s3232_s6 }
  0x35   : > { %p2987_p5 = scmp.ne.s32.totalorder %s3232_s6, %s2986_s28  ;;  %p2995_p0 = scmp.lt.s32.totalorder %s2986_s28, %s2986_s28 }
  0x37   : > { %p2989_p7 = pnand %p2987_p5, %p3242_p13  ;;  %p2996_p1 = por %p2995_p0, %p2994_p12 }
  0x39   : > { %p2990_p9 = pneg %p2989_p7 }
  0x3b   : > { %p2997_p2 = pnand %p2996_p1, %p2990_p9 }
  0x3d   : > { %3000 = shalt.err (!%p2997_p2)
}
  0x3e   : > { %s3139_s14 = smov 64   ;;  %s3140_s15 = smov 4  }
  0x3f   : > { %2707 = dma.hbm_to_vmem [thread:$0]  (!%p3228_p11), %s4587_s2, 2048, %s3232_s6, [#allocation6], %s3139_s14, %s3139_s14, %s3140_s15  }
  0x40   : > { %s3141_s30 = smov [#allocation8]   ;;  %s3290_s8 = sadd.s32 1, %s3133_s21  }
  0x41   : > { %s202_s7 = sshll.u32 %s3141_s30, 4  ;;  %s3001_s11 = scalar_lea.hbm %s4588_s3, 1024  ;;  %s203_s7 = int_to_ptr.vmem [resolvable:$true] %s202_s7 }
  0x42   : > { %p3002_p6 = scmp.ne.s32.totalorder %s4588_s3, %s3001_s11  ;;  %p3008_p5 = scmp.lt.u32.totalorder %s3001_s11, %s4588_s3 }
  0x44   : > { %p3004_p10 = pnand %p3002_p6, %p3242_p13 }
  0x46   : > { %p3005_p3 = pneg %p3004_p10 }
  0x48   : > { %p3010_p7 = pnand %p3008_p5, %p3005_p3 }
  0x4a   : > { %3013 = shalt.err (!%p3010_p7)
}
  0x4b   : > { %s3014_s6 = scalar_lea.vmem %s203_s7, 1024  ;;  %p3022_p1 = scmp.lt.s32.totalorder %s203_s7, %s203_s7 }
  0x4c   : > { %p3015_p9 = scmp.ne.s32.totalorder %s203_s7, %s3014_s6  ;;  %p3023_p2 = scmp.lt.s32.totalorder %s3014_s6, %s3014_s6 }
  0x4e   : > { %p3017_p12 = pnand %p3015_p9, %p3242_p13  ;;  %p3024_p4 = por %p3023_p2, %p3022_p1 }
  0x50   : > { %p3018_p0 = pneg %p3017_p12 }
  0x52   : > { %p3025_p8 = pnand %p3024_p4, %p3018_p0 }
  0x54   : > { %3028 = shalt.err (!%p3025_p8)
}
  0x55   : > { %2710 = dma.hbm_to_vmem [thread:$0]  (!%p3228_p11), %s4588_s3, 1024, %s203_s7, [#allocation9], %s3139_s14, %s3139_s14, %s3140_s15  }
  0x56   : > { %s27_s12 = ssub.s32 %s3133_s21, %s3290_s8  ;;  %s30_s16 = sadd.s32 1, %s3129_s20 }
  0x57   : > { %p28_p4 = scmp.eq.s32.totalorder %s27_s12, 0  ;;  %p37_p8 = scmp.ne.s32.totalorder %s3129_s20, %s3125_s19 }
  0x58   : > { %p38_p13 = scmp.eq.s32.totalorder %s3133_s21, 0  ;;  %p2722_p6 = scmp.lt.s32.totalorder %s3133_s21, 2 }
  0x59   : > { %s3318_s29 = scalar_select %p28_p4, %s3129_s20, %s30_s16  }
  0x5a   : > { %p39_p10 = por %p38_p13, %p37_p8  ;;  %p4637_p3 = scmp.eq.s32.totalorder %s3198_s22, 1 }
  0x5b   : > { %s219_s30 = sand.u32 1, %s3129_s20   ;;  %s2483_s9 = sshll.u32 %s3133_s21, 12 }
  0x5c   : > { %p3322_p5 = por %p4637_p3, %p37_p8  ;;  %s2427_s10 = sshll.u32 %s219_s30, 8 }
  0x5d   : > { %s3331_s14 = scalar_lea.hbm %s4585_s0, %s2483_s9  ;;  %s223_s15 = scalar_lea.vmem [#allocation2], %s2427_s10 }
  0x5e   : > { %s230_s7 = sshll.u32 %s223_s15, 4  ;;  %p3333_p11 = pnand %p2722_p6, %p39_p10  ;;  %s3337_s7 = int_to_ptr.vmem [resolvable:$true] %s230_s7 }
  0x5f   : > { %s3339_s6 = scalar_lea.sflag [#allocation3], %s219_s30  ;;  %s3029_s23 = scalar_lea.hbm %s3331_s14, 4096 }
  0x60   : > { %p3030_p7 = scmp.ne.s32.totalorder %s3331_s14, %s3029_s23  ;;  %p3031_p9 = pneg %p3333_p11 }
  0x61   : > { %s3034_s16 = scalar_lea.hbm %s4585_s0, 8192  ;;  %p3035_p1 = scmp.lt.u32.totalorder %s3331_s14, %s4585_s0 }
  0x62   : > { %p3032_p12 = pnand %p3031_p9, %p3030_p7  ;;  %p3036_p2 = scmp.lt.u32.totalorder %s3034_s16, %s3029_s23 }
  0x63   : > { %p3038_p8 = scmp.lt.u32.totalorder %s3029_s23, %s3331_s14 }
  0x64   : > { %p3033_p0 = pneg %p3032_p12  ;;  %p3037_p4 = por %p3036_p2, %p3035_p1 }
  0x66   : > { %p3039_p13 = por %p3038_p8, %p3037_p4 }
  0x68   : > { %p3040_p6 = pnand %p3039_p13, %p3033_p0 }
  0x6a   : > { %3043 = shalt.err (!%p3040_p6)
}
  0x6b   : > { %s3044_s30 = scalar_lea.vmem %s3337_s7, 4096  ;;  %s3142_s11 = smov [#allocation2]  }
  0x6c   : > { %p3045_p10 = scmp.ne.s32.totalorder %s3337_s7, %s3044_s30  ;;  %s3049_s13 = sshll.u32 %s3142_s11, 4  ;;  %s3050_s13 = int_to_ptr.vmem [resolvable:$false] %s3049_s13 }
  0x6d   : > { %s3051_s15 = scalar_lea.vmem %s3050_s13, 8192  ;;  %p3052_p12 = scmp.lt.s32.totalorder %s3337_s7, %s3050_s13 }
  0x6e   : > { %p3047_p3 = pnand %p3045_p10, %p3031_p9  ;;  %p3053_p1 = scmp.lt.s32.totalorder %s3051_s15, %s3044_s30 }
  0x70   : > { %p3048_p7 = pneg %p3047_p3  ;;  %p3054_p2 = por %p3053_p1, %p3052_p12 }
  0x72   : > { %p3055_p4 = pnand %p3054_p2, %p3048_p7 }
  0x74   : > { %3058 = shalt.err (!%p3055_p4)
}
  0x75   : > { %s4640_s23 = smov 8   ;;  %s4641_s27 = smov 128  }
  0x76   : > { %2714 = dma.hbm_to_vmem [thread:$0]  (!%p3333_p11), %s3331_s14, 4096, %s3337_s7, %s3339_s6, %s4641_s27, %s4641_s27, %s4640_s23  }
  0x77   : > { %p4642_p9 = scmp.ne.s32.totalorder %s4634_s26, 0 }
  0x79   : > { %242 = sbr.rel (%p4642_p9) target bundleno = 1661 (0x67d), region = 40 }
  0x80   : > { %s3373_s12 = sand.u32 1, %s3125_s19   ;;  %p4643_p0 = scmp.ne.s32.totalorder %s4632_s24, 0 }
  0x81   : > { %s2431_s16 = sshll.u32 %s3373_s12, 8  ;;  %s245_s9 = scalar_lea.sflag [#allocation3], %s3373_s12 }
  0x82   : > { %s3379_s28 = scalar_lea.vmem [#allocation2], %s2431_s16 }
  0x83   : > { %3104 = dma.done.wait (%p4643_p0), %s245_s9, 4096  }
  0x84   : > { %3106 = vsyncadd (%p4643_p0), %s245_s9, 4294963200  ;;  %p4644_p11 = scmp.eq.s32.totalorder %s3198_s22, 0 }
  0x86   : > { %3108 = dma.done.wait (%p4644_p11), [#allocation6], 4096   ;;  %p4645_p8 = pmov %p4644_p11 }
  0x88   : > { %3110 = vsyncadd (%p4645_p8), [#allocation6], 4294963200  ;;  %p4646_p13 = pmov %p4645_p8 }
  0x89   : > { %p4647_p6 = pmov %p4645_p8 }
  0x8a   : > { %3112 = dma.done.wait (%p4646_p13), [#allocation9], 1024  }
  0x8b   : > { %3114 = vsyncadd (%p4647_p6), [#allocation9], 4294966272  ;;  %v3143_v0 = vmov 0   ;;  %v2769_v1 = vld [vmem:[#allocation5 + $0x4] ss:$8 sps:$4 sm:$0xff]   ;;  %v292_v23 = vld [vmem:[%s3379_s28 + $0x10] sm:$0xff] }
  0x8c   : > { %478 = vmatprep.mubr.bf16.mxu0 %v3143_v0  ;;  %598 = vmatprep.mubr.bf16.mxu1 %v3143_v0  ;;  %v2771_v2 = vld [vmem:[#allocation5] ss:$8 sps:$4 sm:$0xff]   ;;  %v2772_v3 = vld [vmem:[#allocation5 + $0x14] ss:$8 sps:$4 sm:$0xff]   ;;  %v2774_v4 = vld [vmem:[#allocation5 + $0x10] ss:$8 sps:$4 sm:$0xff]  }
  0x8d   : > { %446 = vmatprep.subr.bf16.mxu0 %v2769_v1  ;;  %2669 = vmatprep.subr.bf16.mxu1 %v2769_v1  ;;  %v2775_v5 = vld [vmem:[#allocation5 + $0x24] ss:$8 sps:$4 sm:$0xff]   ;;  %v2777_v6 = vld [vmem:[#allocation5 + $0x20] ss:$8 sps:$4 sm:$0xff]   ;;  %v2778_v7 = vld [vmem:[#allocation5 + $0x34] ss:$8 sps:$4 sm:$0xff]  }
  0x8e   : > { %447 = vmatpush1.bf16.msra.mxu0 %v2771_v2  ;;  %2677 = vmatpush1.bf16.msra.mxu1 %v2771_v2  ;;  %v2780_v8 = vld [vmem:[#allocation5 + $0x30] ss:$8 sps:$4 sm:$0xff]   ;;  %v2781_v9 = vld [vmem:[#allocation5 + $0x44] ss:$8 sps:$4 sm:$0xff]   ;;  %v2783_v10 = vld [vmem:[#allocation5 + $0x40] ss:$8 sps:$4 sm:$0xff]   ;;  %v356_v2 = vlaneseq }
  0x8f   : > { %448 = vmatprep.subr.bf16.mxu0 %v2772_v3  ;;  %2670 = vmatprep.subr.bf16.mxu1 %v2772_v3  ;;  %v2784_v11 = vld [vmem:[#allocation5 + $0x54] ss:$8 sps:$4 sm:$0xff]   ;;  %v2786_v12 = vld [vmem:[#allocation5 + $0x50] ss:$8 sps:$4 sm:$0xff]   ;;  %v2787_v13 = vld [vmem:[#allocation5 + $0x64] ss:$8 sps:$4 sm:$0xff]  }
  0x90   : > { %v2789_v14 = vld [vmem:[#allocation5 + $0x60] ss:$8 sps:$4 sm:$0xff]   ;;  %v2790_v15 = vld [vmem:[#allocation5 + $0x74] ss:$8 sps:$4 sm:$0xff]   ;;  %v2792_v16 = vld [vmem:[#allocation5 + $0x70] ss:$8 sps:$4 sm:$0xff]  }
  0x91   : > { %v290_v17 = vld [vmem:[%s3379_s28] sm:$0xff]  ;;  %v291_v18 = vld [vmem:[%s3379_s28 + $0x8] sm:$0xff]  ;;  %v293_v24 = vld [vmem:[%s3379_s28 + $0x18] sm:$0xff]  ;;  %v357_v3 = vshrl.u32 %v356_v2, 7  ;;  %s4470_s30 = scalar_lea.vmem [#allocation10], %s2431_s16  ;;  %s2484_s11 = sshll.u32 %s3198_s22, 12 }
  0x92   : > { %449 = vmatpush1.bf16.msra.mxu0 %v2774_v4  ;;  %2678 = vmatpush1.bf16.msra.mxu1 %v2774_v4  ;;  %v314_v19 = vld [vmem:[%s3379_s28 + $0xc0] sm:$0xff]  ;;  %v315_v20 = vld [vmem:[%s3379_s28 + $0xc8] sm:$0xff]  ;;  %v322_v21 = vpack.c.bf16 %v291_v18, %v290_v17  ;;  %v316_v25 = vld [vmem:[%s3379_s28 + $0xd0] sm:$0xff]  ;;  %v323_v27 = vpack.c.bf16 %v293_v24, %v292_v23  ;;  %s2319_s13 = sshll.u32 %s4470_s30, 4  ;;  %s4535_s27 = scalar_lea.hbm %s4590_s5, %s2484_s11  ;;  %s4537_s13 = int_to_ptr.vmem [resolvable:$true] %s2319_s13 }
  0x93   : > { %450 = vmatprep.subr.bf16.mxu0 %v2775_v5  ;;  %2671 = vmatprep.subr.bf16.mxu1 %v2775_v5  ;;  %v334_v22 = vpack.c.bf16 %v315_v20, %v314_v19  ;;  %v317_v26 = vld [vmem:[%s3379_s28 + $0xd8] sm:$0xff]  ;;  %v294_v29 = vld [vmem:[%s3379_s28 + $0x20] sm:$0xff]  ;;  %v295_v30 = vld [vmem:[%s3379_s28 + $0x28] sm:$0xff]  ;;  %v358_v4 = vsub.s32 0, %v357_v3  ;;  %s2306_s22 = scalar_lea.sflag [#allocation4], %s3373_s12  ;;  %s3059_s16 = scalar_lea.vmem %s4537_s13, 4096 }
  0x94   : > { %v335_v28 = vpack.c.bf16 %v317_v26, %v316_v25  ;;  %v318_v31 = vld [vmem:[%s3379_s28 + $0xe0] sm:$0xff]  ;;  %v319_v32 = vld [vmem:[%s3379_s28 + $0xe8] sm:$0xff]  ;;  %v324_v33 = vpack.c.bf16 %v295_v30, %v294_v29  ;;  %v296_v35 = vld [vmem:[%s3379_s28 + $0x30] sm:$0xff]  ;;  %p3060_p10 = scmp.ne.s32.totalorder %s4537_s13, %s3059_s16  ;;  %s3144_s9 = smov [#allocation10]  }
  0x95   : > { %v336_v34 = vpack.c.bf16 %v319_v32, %v318_v31  ;;  %v297_v36 = vld [vmem:[%s3379_s28 + $0x38] sm:$0xff]  ;;  %v320_v37 = vld [vmem:[%s3379_s28 + $0xf0] sm:$0xff]  ;;  %v298_v41 = vld [vmem:[%s3379_s28 + $0x40] sm:$0xff] }
  0x96   : > { %451 = vmatpush1.bf16.msra.mxu0 %v2777_v6  ;;  %2679 = vmatpush1.bf16.msra.mxu1 %v2777_v6  ;;  %v321_v38 = vld [vmem:[%s3379_s28 + $0xf8] sm:$0xff]  ;;  %v325_v39 = vpack.c.bf16 %v297_v36, %v296_v35  ;;  %v299_v42 = vld [vmem:[%s3379_s28 + $0x48] sm:$0xff]  ;;  %v300_v44 = vld [vmem:[%s3379_s28 + $0x50] sm:$0xff]  ;;  %v362_v6 = vsub.s32 1, %v357_v3  ;;  %p3061_p3 = pnand %p3060_p10, %p3322_p5 }
  0x97   : > { %452 = vmatprep.subr.bf16.mxu0 %v2778_v7  ;;  %2672 = vmatprep.subr.bf16.mxu1 %v2778_v7  ;;  %v337_v40 = vpack.c.bf16 %v321_v38, %v320_v37  ;;  %v326_v43 = vpack.c.bf16 %v299_v42, %v298_v41  ;;  %v301_v45 = vld [vmem:[%s3379_s28 + $0x58] sm:$0xff]  ;;  %v302_v47 = vld [vmem:[%s3379_s28 + $0x60] sm:$0xff]  ;;  %v303_v48 = vld [vmem:[%s3379_s28 + $0x68] sm:$0xff] }
  0x98   : > { %v327_v46 = vpack.c.bf16 %v301_v45, %v300_v44  ;;  %v328_v49 = vpack.c.bf16 %v303_v48, %v302_v47  ;;  %v304_v50 = vld [vmem:[%s3379_s28 + $0x70] sm:$0xff]  ;;  %v305_v51 = vld [vmem:[%s3379_s28 + $0x78] sm:$0xff]  ;;  %v306_v53 = vld [vmem:[%s3379_s28 + $0x80] sm:$0xff]  ;;  %p3062_p7 = pneg %p3061_p3 }
  0x99   : > { %v329_v52 = vpack.c.bf16 %v305_v51, %v304_v50  ;;  %v307_v54 = vld [vmem:[%s3379_s28 + $0x88] sm:$0xff]  ;;  %v308_v56 = vld [vmem:[%s3379_s28 + $0x90] sm:$0xff]  ;;  %v309_v57 = vld [vmem:[%s3379_s28 + $0x98] sm:$0xff] }
  0x9a   : > { %453 = vmatpush1.bf16.msra.mxu0 %v2780_v8  ;;  %2680 = vmatpush1.bf16.msra.mxu1 %v2780_v8  ;;  %v330_v55 = vpack.c.bf16 %v307_v54, %v306_v53  ;;  %v331_v58 = vpack.c.bf16 %v309_v57, %v308_v56  ;;  %v310_v59 = vld [vmem:[%s3379_s28 + $0xa0] sm:$0xff]  ;;  %v311_v60 = vld [vmem:[%s3379_s28 + $0xa8] sm:$0xff]  ;;  %v312_v62 = vld [vmem:[%s3379_s28 + $0xb0] sm:$0xff] }
  0x9b   : > { %454 = vmatprep.subr.bf16.mxu0 %v2781_v9  ;;  %2673 = vmatprep.subr.bf16.mxu1 %v2781_v9  ;;  %v332_v61 = vpack.c.bf16 %v311_v60, %v310_v59  ;;  %v313_v63 = vld [vmem:[%s3379_s28 + $0xb8] sm:$0xff]  ;;  %v354_v5 = vld [vmem:[%s4589_s4] sm:$0x3]  ;;  %s3063_s28 = sshll.u32 %s3144_s9, 4  ;;  %s3064_s28 = int_to_ptr.vmem [resolvable:$false] %s3063_s28 }
  0x9c   : > { %v333_v1 = vpack.c.bf16 %v313_v63, %v312_v62  ;;  %v3444_v7 = vrot.slane %v354_v5, %v358_v4  ;;  %v3446_v8 = vrot.slane %v354_v5, %v362_v6  ;;  %s3065_s24 = scalar_lea.vmem %s3064_s28, 8192  ;;  %p3066_p12 = scmp.lt.s32.totalorder %s4537_s13, %s3064_s28 }
  0x9d   : > { %p3067_p1 = scmp.lt.s32.totalorder %s3065_s24, %s3059_s16 }
  0x9e   : > { %455 = vmatpush1.bf16.msra.mxu0 %v2783_v10  ;;  %2681 = vmatpush1.bf16.msra.mxu1 %v2783_v10 }
  0x9f   : > { %456 = vmatprep.subr.bf16.mxu0 %v2784_v11  ;;  %2674 = vmatprep.subr.bf16.mxu1 %v2784_v11  ;;  %p3068_p2 = por %p3067_p1, %p3066_p12 }
  0xa1   : > { %p3069_p4 = pnand %p3068_p2, %p3062_p7 }
  0xa2   : > { %457 = vmatpush1.bf16.msra.mxu0 %v2786_v12  ;;  %2682 = vmatpush1.bf16.msra.mxu1 %v2786_v12 }
  0xa3   : > { %458 = vmatprep.subr.bf16.mxu0 %v2787_v13  ;;  %2675 = vmatprep.subr.bf16.mxu1 %v2787_v13 }
  0xa6   : > { %459 = vmatpush1.bf16.msra.mxu0 %v2789_v14  ;;  %2683 = vmatpush1.bf16.msra.mxu1 %v2789_v14 }
  0xa7   : > { %460 = vmatprep.subr.bf16.mxu0 %v2790_v15  ;;  %2676 = vmatprep.subr.bf16.mxu1 %v2790_v15 }
  0xaa   : > { %461 = vmatpush1.bf16.msra.mxu0 %v2792_v16  ;;  %2684 = vmatpush1.bf16.msra.mxu1 %v2792_v16 }
  0xad   : > { %479 = vmatmul.mubr.bf16.vlgmr.msra.gmra.mrb[0].mxu0 %v322_v21  ;;  %599 = vmatmul.mubr.bf16.vlgmr.msra.gmra.mrb[0].mxu1 %v334_v22 }
  0xae   : > { %488 = vmatprep.mubr.bf16.mxu0 %v3143_v0  ;;  %608 = vmatprep.mubr.bf16.mxu1 %v3143_v0 }
  0xb5   : > { %489 = vmatmul.mubr.bf16.gmra.mrb[4].mxu0 %v323_v27  ;;  %609 = vmatmul.mubr.bf16.gmra.mrb[4].mxu1 %v335_v28 }
  0xb6   : > { %498 = vmatprep.mubr.bf16.mxu0 %v3143_v0  ;;  %618 = vmatprep.mubr.bf16.mxu1 %v3143_v0 }
  0xbd   : > { %499 = vmatmul.mubr.bf16.gmra.mrb[8].mxu0 %v324_v33  ;;  %619 = vmatmul.mubr.bf16.gmra.mrb[8].mxu1 %v336_v34 }
  0xbe   : > { %508 = vmatprep.mubr.bf16.mxu0 %v3143_v0  ;;  %628 = vmatprep.mubr.bf16.mxu1 %v3143_v0 }
  0xc5   : > { %509 = vmatmul.mubr.bf16.gmra.mrb[12].mxu0 %v325_v39  ;;  %629 = vmatmul.mubr.bf16.gmra.mrb[12].mxu1 %v337_v40 }
  0xc6   : > { %518 = vmatprep.mubr.bf16.mxu0 %v3143_v0 }
  0xcd   : > { %519 = vmatmul.mubr.bf16.gmra.mrb[16].mxu0 %v326_v43 }
  0xce   : > { %528 = vmatprep.mubr.bf16.mxu0 %v3143_v0 }
  0xd5   : > { %529 = vmatmul.mubr.bf16.gmra.mrb[20].mxu0 %v327_v46 }
  0xd6   : > { %538 = vmatprep.mubr.bf16.mxu0 %v3143_v0 }
  0xdd   : > { %539 = vmatmul.mubr.bf16.gmra.mrb[24].mxu0 %v328_v49 }
  0xde   : > { %548 = vmatprep.mubr.bf16.mxu0 %v3143_v0 }
  0xe5   : > { %549 = vmatmul.mubr.bf16.gmra.mrb[28].mxu0 %v329_v52 }
  0xe6   : > { %558 = vmatprep.mubr.bf16.mxu0 %v3143_v0 }
  0xed   : > { %559 = vmatmul.mubr.bf16.gmra.mrb[32].mxu0 %v330_v55 }
  0xee   : > { %568 = vmatprep.mubr.bf16.mxu0 %v3143_v0 }
  0xf5   : > { %569 = vmatmul.mubr.bf16.gmra.mrb[36].mxu0 %v331_v58 }
  0xf6   : > { %578 = vmatprep.mubr.bf16.mxu0 %v3143_v0 }
  0xfd   : > { %579 = vmatmul.mubr.bf16.gmra.mrb[40].mxu0 %v332_v61 }
  0xfe   : > { %588 = vmatprep.mubr.bf16.mxu0 %v3143_v0 }
 0x105   : > { %589 = vmatmul.mubr.bf16.gmra.mrb[44].mxu0 %v333_v1 }
 0x180   : > { %v480_v9 = vpop.f32.mrb[0].mxu0 }
 0x181   : > { %v481_v10 = vadd.f32 %v480_v9, %v3444_v7  ;;  %v482_v0 = vpop.f32.mrb[1].mxu0 }
 0x182   : > { %v483_v11 = vadd.f32 %v482_v0, %v3446_v8  ;;  %v484_v12 = vpop.f32.mrb[2].mxu0 }
 0x183   : > { %v639_v13 = vmul.f32 0.01, %v481_v10  ;;  %v485_v14 = vadd.f32 %v484_v12, %v3444_v7  ;;  %v486_v15 = vpop.f32.mrb[3].mxu0 }
 0x184   : > { %v640_v16 = vmul.f32 0.01, %v483_v11  ;;  %v487_v17 = vadd.f32 %v486_v15, %v3446_v8 }
 0x185   : > { %v641_v18 = vmul.f32 0.01, %v485_v14  ;;  %v3452_v19 = vmax.f32 %v481_v10, %v639_v13 }
 0x186   : > { %v642_v20 = vmul.f32 0.01, %v487_v17  ;;  %v3454_v21 = vmax.f32 %v483_v11, %v640_v16 }
 0x187   : > { %v3456_v22 = vmax.f32 %v485_v14, %v641_v18  ;;  %v3504_v14 = vpop.f32.mrb[0].mxu1 }
 0x188   : > { %v3458_v23 = vmax.f32 %v487_v17, %v642_v20  ;;  %v490_v24 = vpop.f32.mrb[4].mxu0  ;;  %v767_v25 = vadd.f32 %v3454_v21, %v3452_v19  ;;  %v3512_v20 = vpop.f32.mrb[1].mxu1 }
 0x189   : > { %v491_v26 = vadd.f32 %v490_v24, %v3444_v7  ;;  %v492_v27 = vpop.f32.mrb[5].mxu0 }
 0x18a   : > { %v493_v28 = vadd.f32 %v492_v27, %v3446_v8  ;;  %v494_v29 = vpop.f32.mrb[6].mxu0  ;;  %768 = vadd.xlane.f32.xlu0 %v767_v25  ;;  %v770_v35 = vadd.f32 %v3458_v23, %v3456_v22 }
 0x18b   : > { %v643_v30 = vmul.f32 0.01, %v491_v26  ;;  %v495_v31 = vadd.f32 %v494_v29, %v3444_v7  ;;  %v496_v32 = vpop.f32.mrb[7].mxu0 }
 0x18c   : > { %v644_v33 = vmul.f32 0.01, %v493_v28  ;;  %v497_v34 = vadd.f32 %v496_v32, %v3446_v8 }
 0x18d   : > { %v645_v36 = vmul.f32 0.01, %v495_v31  ;;  %v3468_v37 = vmax.f32 %v491_v26, %v643_v30  ;;  %v3515_v26 = vpop.f32.mrb[2].mxu1 }
 0x18e   : > { %v646_v38 = vmul.f32 0.01, %v497_v34  ;;  %771 = vadd.xlane.f32.xlu0 %v770_v35  ;;  %v3470_v39 = vmax.f32 %v493_v28, %v644_v33  ;;  %v3520_v30 = vpop.f32.mrb[3].mxu1 }
 0x18f   : > { %v3472_v40 = vmax.f32 %v495_v31, %v645_v36 }
 0x190   : > { %v3474_v41 = vmax.f32 %v497_v34, %v646_v38  ;;  %v500_v42 = vpop.f32.mrb[8].mxu0  ;;  %v773_v43 = vadd.f32 %v3470_v39, %v3468_v37 }
 0x191   : > { %v501_v44 = vadd.f32 %v500_v42, %v3444_v7  ;;  %v502_v45 = vpop.f32.mrb[9].mxu0 }
 0x192   : > { %v503_v46 = vadd.f32 %v502_v45, %v3446_v8  ;;  %v504_v47 = vpop.f32.mrb[10].mxu0  ;;  %774 = vadd.xlane.f32.xlu1 %v773_v43  ;;  %v776_v53 = vadd.f32 %v3474_v41, %v3472_v40 }
 0x193   : > { %v647_v48 = vmul.f32 0.01, %v501_v44  ;;  %v505_v49 = vadd.f32 %v504_v47, %v3444_v7  ;;  %v506_v50 = vpop.f32.mrb[11].mxu0 }
 0x194   : > { %v648_v51 = vmul.f32 0.01, %v503_v46  ;;  %v507_v52 = vadd.f32 %v506_v50, %v3446_v8 }
 0x195   : > { %v3484_v54 = vmax.f32 %v501_v44, %v647_v48  ;;  %v649_v55 = vmul.f32 0.01, %v505_v49  ;;  %v3528_v44 = vpop.f32.mrb[4].mxu1 }
 0x196   : > { %v3486_v56 = vmax.f32 %v503_v46, %v648_v51  ;;  %v650_v57 = vmul.f32 0.01, %v507_v52  ;;  %777 = vadd.xlane.f32.xlu1 %v776_v53 }
 0x197   : > { %v3488_v58 = vmax.f32 %v505_v49, %v649_v55  ;;  %v3536_v49 = vpop.f32.mrb[5].mxu1 }
 0x198   : > { %v3490_v59 = vmax.f32 %v507_v52, %v650_v57  ;;  %v510_v60 = vpop.f32.mrb[12].mxu0  ;;  %v779_v61 = vadd.f32 %v3486_v56, %v3484_v54  ;;  %v3539_v52 = vpop.f32.mrb[6].mxu1 }
 0x199   : > { %v511_v62 = vadd.f32 %v510_v60, %v3444_v7  ;;  %v512_v63 = vpop.f32.mrb[13].mxu0  ;;  %v3544_v60 = vpop.f32.mrb[7].mxu1 }
 0x19a   : > { %v513_v1 = vadd.f32 %v512_v63, %v3446_v8  ;;  %v514_v2 = vpop.f32.mrb[14].mxu0  ;;  %780 = vadd.xlane.f32.xlu0 %v779_v61  ;;  %v782_v3 = vadd.f32 %v3490_v59, %v3488_v58 }
 0x19b   : > { %v651_v4 = vmul.f32 0.01, %v511_v62  ;;  %v515_v5 = vadd.f32 %v514_v2, %v3444_v7  ;;  %v516_v6 = vpop.f32.mrb[15].mxu0 }
 0x19c   : > { %v652_v9 = vmul.f32 0.01, %v513_v1  ;;  %v517_v10 = vadd.f32 %v516_v6, %v3446_v8  ;;  %783 = vadd.xlane.f32.xlu1 %v782_v3 }
 0x19d   : > { %v3500_v0 = vmax.f32 %v511_v62, %v651_v4  ;;  %v653_v11 = vmul.f32 0.01, %v515_v5 }
 0x19e   : > { %v3502_v12 = vmax.f32 %v513_v1, %v652_v9  ;;  %v654_v13 = vmul.f32 0.01, %v517_v10 }
 0x19f   : > { %v3506_v15 = vmax.f32 %v515_v5, %v653_v11  ;;  %v3550_v5 = vpop.f32.mrb[8].mxu1 }
 0x1a0   : > { %v3508_v16 = vmax.f32 %v517_v10, %v654_v13  ;;  %v520_v17 = vpop.f32.mrb[16].mxu0  ;;  %v785_v18 = vadd.f32 %v3502_v12, %v3500_v0 }
 0x1a1   : > { %v521_v24 = vadd.f32 %v520_v17, %v3444_v7  ;;  %v522_v25 = vpop.f32.mrb[17].mxu0 }
 0x1a2   : > { %v523_v27 = vadd.f32 %v522_v25, %v3446_v8  ;;  %v524_v28 = vpop.f32.mrb[18].mxu0  ;;  %786 = vadd.xlane.f32.xlu0 %v785_v18  ;;  %v788_v29 = vadd.f32 %v3508_v16, %v3506_v15  ;;  %v3560_v18 = vpop.f32.mrb[9].mxu1 }
 0x1a3   : > { %v655_v31 = vmul.f32 0.01, %v521_v24  ;;  %v525_v32 = vadd.f32 %v524_v28, %v3444_v7  ;;  %v526_v33 = vpop.f32.mrb[19].mxu0 }
 0x1a4   : > { %v656_v34 = vmul.f32 0.01, %v523_v27  ;;  %v527_v35 = vadd.f32 %v526_v33, %v3446_v8  ;;  %789 = vadd.xlane.f32.xlu1 %v788_v29 }
 0x1a5   : > { %v3524_v36 = vmax.f32 %v521_v24, %v655_v31  ;;  %v657_v38 = vmul.f32 0.01, %v525_v32  ;;  %v3566_v31 = vpop.f32.mrb[10].mxu1 }
 0x1a6   : > { %v3526_v42 = vmax.f32 %v523_v27, %v656_v34  ;;  %v658_v43 = vmul.f32 0.01, %v527_v35 }
 0x1a7   : > { %v3530_v45 = vmax.f32 %v525_v32, %v657_v38 }
 0x1a8   : > { %v3532_v46 = vmax.f32 %v527_v35, %v658_v43  ;;  %v530_v47 = vpop.f32.mrb[20].mxu0  ;;  %v791_v48 = vadd.f32 %v3526_v42, %v3524_v36  ;;  %v3569_v35 = vpop.f32.mrb[11].mxu1 }
 0x1a9   : > { %v531_v50 = vadd.f32 %v530_v47, %v3444_v7  ;;  %v532_v51 = vpop.f32.mrb[21].mxu0 }
 0x1aa   : > { %v533_v53 = vadd.f32 %v532_v51, %v3446_v8  ;;  %v534_v55 = vpop.f32.mrb[22].mxu0  ;;  %792 = vadd.xlane.f32.xlu0 %v791_v48  ;;  %v794_v57 = vadd.f32 %v3532_v46, %v3530_v45 }
 0x1ab   : > { %v659_v61 = vmul.f32 0.01, %v531_v50  ;;  %v535_v62 = vadd.f32 %v534_v55, %v3444_v7  ;;  %v536_v63 = vpop.f32.mrb[23].mxu0 }
 0x1ac   : > { %v660_v1 = vmul.f32 0.01, %v533_v53  ;;  %v537_v2 = vadd.f32 %v536_v63, %v3446_v8  ;;  %795 = vadd.xlane.f32.xlu1 %v794_v57 }
 0x1ad   : > { %v3548_v3 = vmax.f32 %v531_v50, %v659_v61  ;;  %v661_v4 = vmul.f32 0.01, %v535_v62  ;;  %v3574_v50 = vpop.f32.mrb[12].mxu1 }
 0x1ae   : > { %v3552_v6 = vmax.f32 %v533_v53, %v660_v1  ;;  %v662_v9 = vmul.f32 0.01, %v537_v2 }
 0x1af   : > { %v3554_v10 = vmax.f32 %v535_v62, %v661_v4 }
 0x1b0   : > { %v3556_v11 = vmax.f32 %v537_v2, %v662_v9  ;;  %v540_v13 = vpop.f32.mrb[24].mxu0  ;;  %v797_v17 = vadd.f32 %v3552_v6, %v3548_v3  ;;  %v3585_v2 = vpop.f32.mrb[13].mxu1 }
 0x1b1   : > { %v541_v24 = vadd.f32 %v540_v13, %v3444_v7  ;;  %v542_v25 = vpop.f32.mrb[25].mxu0 }
 0x1b2   : > { %v543_v27 = vadd.f32 %v542_v25, %v3446_v8  ;;  %v544_v28 = vpop.f32.mrb[26].mxu0  ;;  %798 = vadd.xlane.f32.xlu0 %v797_v17  ;;  %v800_v29 = vadd.f32 %v3556_v11, %v3554_v10  ;;  %v3590_v17 = vpop.f32.mrb[14].mxu1 }
 0x1b3   : > { %v663_v32 = vmul.f32 0.01, %v541_v24  ;;  %v545_v33 = vadd.f32 %v544_v28, %v3444_v7  ;;  %v546_v34 = vpop.f32.mrb[27].mxu0  ;;  %v3593_v28 = vpop.f32.mrb[15].mxu1 }
 0x1b4   : > { %v664_v38 = vmul.f32 0.01, %v543_v27  ;;  %v547_v43 = vadd.f32 %v546_v34, %v3446_v8  ;;  %801 = vadd.xlane.f32.xlu1 %v800_v29 }
 0x1b5   : > { %v3572_v47 = vmax.f32 %v541_v24, %v663_v32  ;;  %v665_v48 = vmul.f32 0.01, %v545_v33 }
 0x1b6   : > { %v3576_v51 = vmax.f32 %v543_v27, %v664_v38  ;;  %v666_v53 = vmul.f32 0.01, %v547_v43 }
 0x1b7   : > { %v3578_v55 = vmax.f32 %v545_v33, %v665_v48 }
 0x1b8   : > { %v3580_v57 = vmax.f32 %v547_v43, %v666_v53  ;;  %v550_v61 = vpop.f32.mrb[28].mxu0  ;;  %v803_v62 = vadd.f32 %v3576_v51, %v3572_v47 }
 0x1b9   : > { %v551_v63 = vadd.f32 %v550_v61, %v3444_v7  ;;  %v552_v1 = vpop.f32.mrb[29].mxu0 }
 0x1ba   : > { %v553_v4 = vadd.f32 %v552_v1, %v3446_v8  ;;  %v554_v9 = vpop.f32.mrb[30].mxu0  ;;  %804 = vadd.xlane.f32.xlu0 %v803_v62  ;;  %v806_v13 = vadd.f32 %v3580_v57, %v3578_v55 }
 0x1bb   : > { %v667_v24 = vmul.f32 0.01, %v551_v63  ;;  %v555_v25 = vadd.f32 %v554_v9, %v3444_v7  ;;  %v556_v27 = vpop.f32.mrb[31].mxu0 }
 0x1bc   : > { %v668_v29 = vmul.f32 0.01, %v553_v4  ;;  %v557_v32 = vadd.f32 %v556_v27, %v3446_v8  ;;  %807 = vadd.xlane.f32.xlu1 %v806_v13 }
 0x1bd   : > { %v3596_v33 = vmax.f32 %v551_v63, %v667_v24  ;;  %v669_v34 = vmul.f32 0.01, %v555_v25 }
 0x1be   : > { %v3598_v38 = vmax.f32 %v553_v4, %v668_v29  ;;  %v670_v43 = vmul.f32 0.01, %v557_v32 }
 0x1bf   : > { %4648 = vst [vmem:[#allocation15_spill] sm:$0xff] %v3596_v33  ;;  %v3600_v48 = vmax.f32 %v555_v25, %v669_v34 }
 0x1c0   : > { %4649 = vst [vmem:[#allocation16_spill] sm:$0xff] %v3598_v38  ;;  %v3602_v53 = vmax.f32 %v557_v32, %v670_v43  ;;  %v560_v61 = vpop.f32.mrb[32].mxu0  ;;  %v809_v62 = vadd.f32 %v3598_v38, %v3596_v33 }
 0x1c1   : > { %4650 = vst [vmem:[#allocation17_spill] sm:$0xff] %v3600_v48  ;;  %v561_v1 = vadd.f32 %v560_v61, %v3444_v7  ;;  %v562_v9 = vpop.f32.mrb[33].mxu0 }
 0x1c2   : > { %4651 = vst [vmem:[#allocation18_spill] sm:$0xff] %v3602_v53  ;;  %v563_v27 = vadd.f32 %v562_v9, %v3446_v8  ;;  %v564_v13 = vpop.f32.mrb[34].mxu0  ;;  %810 = vadd.xlane.f32.xlu0 %v809_v62  ;;  %v812_v63 = vadd.f32 %v3602_v53, %v3600_v48 }
 0x1c3   : > { %v671_v4 = vmul.f32 0.01, %v561_v1  ;;  %v565_v24 = vadd.f32 %v564_v13, %v3444_v7  ;;  %v566_v25 = vpop.f32.mrb[35].mxu0 }
 0x1c4   : > { %v672_v29 = vmul.f32 0.01, %v563_v27  ;;  %v567_v32 = vadd.f32 %v566_v25, %v3446_v8  ;;  %813 = vadd.xlane.f32.xlu1 %v812_v63 }
 0x1c5   : > { %v3612_v34 = vmax.f32 %v561_v1, %v671_v4  ;;  %v673_v43 = vmul.f32 0.01, %v565_v24 }
 0x1c6   : > { %v3614_v61 = vmax.f32 %v563_v27, %v672_v29  ;;  %v674_v38 = vmul.f32 0.01, %v567_v32 }
 0x1c7   : > { %4652 = vst [vmem:[#allocation19_spill] sm:$0xff] %v3612_v34  ;;  %v3616_v9 = vmax.f32 %v565_v24, %v673_v43 }
 0x1c8   : > { %4653 = vst [vmem:[#allocation20_spill] sm:$0xff] %v3614_v61  ;;  %v3618_v62 = vmax.f32 %v567_v32, %v674_v38  ;;  %v570_v33 = vpop.f32.mrb[36].mxu0  ;;  %v815_v53 = vadd.f32 %v3614_v61, %v3612_v34 }
 0x1c9   : > { %4654 = vst [vmem:[#allocation21_spill] sm:$0xff] %v3616_v9  ;;  %v571_v13 = vadd.f32 %v570_v33, %v3444_v7  ;;  %v572_v48 = vpop.f32.mrb[37].mxu0 }
 0x1ca   : > { %4655 = vst [vmem:[#allocation22_spill] sm:$0xff] %v3618_v62  ;;  %v573_v25 = vadd.f32 %v572_v48, %v3446_v8  ;;  %v574_v63 = vpop.f32.mrb[38].mxu0  ;;  %816 = vadd.xlane.f32.xlu0 %v815_v53  ;;  %v818_v1 = vadd.f32 %v3618_v62, %v3616_v9 }
 0x1cb   : > { %v675_v27 = vmul.f32 0.01, %v571_v13  ;;  %v575_v4 = vadd.f32 %v574_v63, %v3444_v7  ;;  %v576_v24 = vpop.f32.mrb[39].mxu0 }
 0x1cc   : > { %v676_v38 = vmul.f32 0.01, %v573_v25  ;;  %v577_v29 = vadd.f32 %v576_v24, %v3446_v8  ;;  %819 = vadd.xlane.f32.xlu1 %v818_v1 }
 0x1cd   : > { %v3628_v32 = vmax.f32 %v571_v13, %v675_v27  ;;  %v677_v43 = vmul.f32 0.01, %v575_v4 }
 0x1ce   : > { %v3630_v33 = vmax.f32 %v573_v25, %v676_v38  ;;  %v678_v61 = vmul.f32 0.01, %v577_v29 }
 0x1cf   : > { %v3632_v48 = vmax.f32 %v575_v4, %v677_v43 }
 0x1d0   : > { %4656 = vst [vmem:[#allocation23_spill] sm:$0xff] %v3630_v33  ;;  %v3634_v53 = vmax.f32 %v577_v29, %v678_v61  ;;  %v580_v34 = vpop.f32.mrb[40].mxu0  ;;  %v821_v62 = vadd.f32 %v3630_v33, %v3628_v32 }
 0x1d1   : > { %4657 = vst [vmem:[#allocation24_spill] sm:$0xff] %v3632_v48  ;;  %v581_v63 = vadd.f32 %v580_v34, %v3444_v7  ;;  %v582_v9 = vpop.f32.mrb[41].mxu0 }
 0x1d2   : > { %4658 = vst [vmem:[#allocation25_spill] sm:$0xff] %v3634_v53  ;;  %v583_v24 = vadd.f32 %v582_v9, %v3446_v8  ;;  %v584_v1 = vpop.f32.mrb[42].mxu0  ;;  %822 = vadd.xlane.f32.xlu0 %v821_v62  ;;  %v824_v13 = vadd.f32 %v3634_v53, %v3632_v48 }
 0x1d3   : > { %v679_v25 = vmul.f32 0.01, %v581_v63  ;;  %v585_v27 = vadd.f32 %v584_v1, %v3444_v7  ;;  %v586_v4 = vpop.f32.mrb[43].mxu0 }
 0x1d4   : > { %v680_v61 = vmul.f32 0.01, %v583_v24  ;;  %v587_v38 = vadd.f32 %v586_v4, %v3446_v8  ;;  %825 = vadd.xlane.f32.xlu1 %v824_v13 }
 0x1d5   : > { %v3644_v29 = vmax.f32 %v581_v63, %v679_v25  ;;  %v681_v43 = vmul.f32 0.01, %v585_v27  ;;  %v2793_v25 = vld [vmem:[#allocation7 + $0x40] sm:$0xff]  }
 0x1d6   : > { %v3646_v34 = vmax.f32 %v583_v24, %v680_v61  ;;  %v682_v33 = vmul.f32 0.01, %v587_v38  ;;  %v2794_v24 = vld [vmem:[#allocation7] sm:$0xff]   ;;  %v2795_v61 = vld [vmem:[#allocation7 + $0x48] sm:$0xff]   ;;  %2485 = vmatprep.subr.bf16.mxu1 %v2793_v25 }
 0x1d7   : > { %4659 = vst [vmem:[#allocation26_spill] sm:$0xff] %v3644_v29  ;;  %v3648_v9 = vmax.f32 %v585_v27, %v681_v43  ;;  %2486 = vmatpush3.bf16.msra.mxu1 %v2794_v24  ;;  %v2796_v27 = vld [vmem:[#allocation7 + $0x8] sm:$0xff]  }
 0x1d8   : > { %4660 = vst [vmem:[#allocation27_spill] sm:$0xff] %v3646_v34  ;;  %v3650_v62 = vmax.f32 %v587_v38, %v682_v33  ;;  %v827_v53 = vadd.f32 %v3646_v34, %v3644_v29  ;;  %v590_v48 = vpop.f32.mrb[44].mxu0  ;;  %2487 = vmatprep.subr.bf16.mxu1 %v2795_v61 }
 0x1d9   : > { %4661 = vst [vmem:[#allocation28_spill] sm:$0xff] %v3648_v9  ;;  %v592_v1 = vpop.f32.mrb[45].mxu0  ;;  %v591_v33 = vadd.f32 %v590_v48, %v3444_v7  ;;  %v601_v48 = vadd.f32 %v3504_v14, %v3444_v7 }
 0x1da   : > { %4662 = vst [vmem:[#allocation29_spill] sm:$0xff] %v3650_v62  ;;  %828 = vadd.xlane.f32.xlu0 %v827_v53  ;;  %v830_v4 = vadd.f32 %v3650_v62, %v3648_v9  ;;  %v594_v13 = vpop.f32.mrb[46].mxu0  ;;  %v593_v38 = vadd.f32 %v592_v1, %v3446_v8  ;;  %v603_v1 = vadd.f32 %v3512_v20, %v3446_v8 }
 0x1db   : > { %v596_v63 = vpop.f32.mrb[47].mxu0  ;;  %2488 = vmatpush3.bf16.msra.mxu1 %v2796_v27  ;;  %v683_v43 = vmul.f32 0.01, %v591_v33  ;;  %v595_v62 = vadd.f32 %v594_v13, %v3444_v7 }
 0x1dc   : > { %831 = vadd.xlane.f32.xlu1 %v830_v4  ;;  %v684_v29 = vmul.f32 0.01, %v593_v38  ;;  %v597_v25 = vadd.f32 %v596_v63, %v3446_v8 }
 0x1dd   : > { %v3666_v24 = vmax.f32 %v591_v33, %v683_v43 }
 0x1de   : > { %v3672_v27 = vmax.f32 %v593_v38, %v684_v29  ;;  %v686_v63 = vmul.f32 0.01, %v597_v25  ;;  %v688_v29 = vmul.f32 0.01, %v603_v1 }
 0x217   : > { %v769_v53 = vpop.xlane.xlu0 %768 }
 0x218   : > { %v864_v34 = vmul.f32 0.00390625, %v769_v53  ;;  %v687_v53 = vmul.f32 0.01, %v601_v48 }
 0x21a   : > { %v3660_v4 = vsub.f32 %v3452_v19, %v864_v34  ;;  %v3663_v9 = vsub.f32 %v3454_v21, %v864_v34  ;;  %v685_v34 = vmul.f32 0.01, %v595_v62 }
 0x21b   : > { %v772_v61 = vpop.xlane.xlu0 %771 }
 0x21c   : > { %4663 = vst [vmem:[#allocation30_spill] sm:$0xff] %v3660_v4  ;;  %4664 = vst [vmem:[#allocation31_spill] sm:$0xff] %v3663_v9  ;;  %v865_v13 = vmul.f32 0.00390625, %v772_v61  ;;  %v960_v19 = vmul.f32 %v3660_v4, %v3660_v4  ;;  %v961_v21 = vmul.f32 %v3663_v9, %v3663_v9  ;;  %v833_v61 = vadd.f32 %v3672_v27, %v3666_v24 }
 0x21e   : > { %v3679_v33 = vsub.f32 %v3456_v22, %v865_v13  ;;  %v3682_v43 = vsub.f32 %v3458_v23, %v865_v13  ;;  %v1024_v14 = vadd.f32 %v961_v21, %v960_v19  ;;  %v3690_v22 = vmax.f32 %v595_v62, %v685_v34 }
 0x21f   : > { %v775_v20 = vpop.xlane.xlu1 %774  ;;  %v605_v23 = vadd.f32 %v3515_v26, %v3444_v7  ;;  %v607_v13 = vadd.f32 %v3520_v30, %v3446_v8  ;;  %v3696_v19 = vmax.f32 %v597_v25, %v686_v63  ;;  %v611_v26 = vadd.f32 %v3528_v44, %v3444_v7 }
 0x220   : > { %4665 = vst [vmem:[#allocation32_spill] sm:$0xff] %v3679_v33  ;;  %4666 = vst [vmem:[#allocation33_spill] sm:$0xff] %v3682_v43  ;;  %v866_v38 = vmul.f32 0.00390625, %v775_v20  ;;  %1025 = vadd.xlane.f32.xlu0 %v1024_v14  ;;  %v962_v9 = vmul.f32 %v3679_v33, %v3679_v33  ;;  %v963_v4 = vmul.f32 %v3682_v43, %v3682_v43 }
 0x221   : > { %v3704_v33 = vmax.f32 %v601_v48, %v687_v53  ;;  %v3706_v43 = vmax.f32 %v603_v1, %v688_v29  ;;  %v690_v25 = vmul.f32 0.01, %v607_v13  ;;  %v836_v1 = vadd.f32 %v3696_v19, %v3690_v22 }
 0x222   : > { %v3699_v21 = vsub.f32 %v3468_v37, %v866_v38  ;;  %v3702_v14 = vsub.f32 %v3470_v39, %v866_v38  ;;  %v1027_v20 = vadd.f32 %v963_v4, %v962_v9  ;;  %v689_v39 = vmul.f32 0.01, %v605_v23 }
 0x223   : > { %v778_v62 = vpop.xlane.xlu1 %777  ;;  %v613_v9 = vadd.f32 %v3536_v49, %v3446_v8  ;;  %v691_v63 = vmul.f32 0.01, %v611_v26  ;;  %v615_v29 = vadd.f32 %v3539_v52, %v3444_v7  ;;  %v839_v38 = vadd.f32 %v3706_v43, %v3704_v33 }
 0x224   : > { %v867_v34 = vmul.f32 0.00390625, %v778_v62  ;;  %834 = vadd.xlane.f32.xlu0 %v833_v61  ;;  %1028 = vadd.xlane.f32.xlu1 %v1027_v20  ;;  %v964_v30 = vmul.f32 %v3699_v21, %v3699_v21  ;;  %v965_v37 = vmul.f32 %v3702_v14, %v3702_v14  ;;  %v3734_v20 = vmax.f32 %v605_v23, %v689_v39 }
 0x225   : > { %v3736_v62 = vmax.f32 %v607_v13, %v690_v25  ;;  %v692_v52 = vmul.f32 0.01, %v613_v9  ;;  %v2797_v25 = vld [vmem:[#allocation7 + $0x50] sm:$0xff]  }
 0x226   : > { %v3717_v4 = vsub.f32 %v3472_v40, %v867_v34  ;;  %v3720_v48 = vsub.f32 %v3474_v41, %v867_v34  ;;  %v1030_v44 = vadd.f32 %v965_v37, %v964_v30  ;;  %v617_v40 = vadd.f32 %v3544_v60, %v3446_v8  ;;  %2489 = vmatprep.subr.bf16.mxu1 %v2797_v25  ;;  %v2800_v25 = vld [vmem:[#allocation7 + $0x18] sm:$0xff]  }
 0x227   : > { %v781_v53 = vpop.xlane.xlu0 %780  ;;  %v3754_v39 = vmax.f32 %v613_v9, %v692_v52 }
 0x228   : > { %4667 = vst [vmem:[#allocation34_spill] sm:$0xff] %v3717_v4  ;;  %v868_v61 = vmul.f32 0.00390625, %v781_v53  ;;  %1031 = vadd.xlane.f32.xlu0 %v1030_v44  ;;  %837 = vadd.xlane.f32.xlu1 %v836_v1  ;;  %v966_v41 = vmul.f32 %v3717_v4, %v3717_v4  ;;  %v967_v49 = vmul.f32 %v3720_v48, %v3720_v48  ;;  %v693_v53 = vmul.f32 0.01, %v615_v29 }
 0x229   : > { %v784_v34 = vpop.xlane.xlu1 %783  ;;  %v3744_v1 = vmax.f32 %v611_v26, %v691_v63  ;;  %v694_v13 = vmul.f32 0.01, %v617_v40  ;;  %v623_v26 = vadd.f32 %v3560_v18, %v3446_v8  ;;  %v627_v18 = vadd.f32 %v3569_v35, %v3446_v8 }
 0x22a   : > { %v3739_v30 = vsub.f32 %v3484_v54, %v868_v61  ;;  %v3742_v37 = vsub.f32 %v3486_v56, %v868_v61  ;;  %v869_v44 = vmul.f32 0.00390625, %v784_v34  ;;  %v1033_v60 = vadd.f32 %v967_v49, %v966_v41 }
 0x22b   : > { %v621_v56 = vadd.f32 %v3550_v5, %v3444_v7  ;;  %v625_v5 = vadd.f32 %v3566_v31, %v3444_v7  ;;  %v3772_v49 = vmax.f32 %v615_v29, %v693_v53  ;;  %v3774_v34 = vmax.f32 %v617_v40, %v694_v13 }
 0x22c   : > { %v3747_v4 = vsub.f32 %v3488_v58, %v869_v44  ;;  %v3750_v23 = vsub.f32 %v3490_v59, %v869_v44  ;;  %840 = vadd.xlane.f32.xlu0 %v839_v38  ;;  %1034 = vadd.xlane.f32.xlu1 %v1033_v60  ;;  %v968_v54 = vmul.f32 %v3739_v30, %v3739_v30  ;;  %v2798_v38 = vld [vmem:[#allocation7 + $0x10] sm:$0xff]   ;;  %v696_v60 = vmul.f32 0.01, %v623_v26 }
 0x22d   : > { %v969_v58 = vmul.f32 %v3742_v37, %v3742_v37  ;;  %v842_v59 = vadd.f32 %v3736_v62, %v3734_v20  ;;  %2490 = vmatpush3.bf16.msra.mxu1 %v2798_v38  ;;  %v695_v44 = vmul.f32 0.01, %v621_v56  ;;  %v698_v40 = vmul.f32 0.01, %v627_v18 }
 0x22e   : > { %4668 = vst [vmem:[#allocation35_spill] sm:$0xff] %v3747_v4  ;;  %v970_v63 = vmul.f32 %v3747_v4, %v3747_v4  ;;  %v971_v9 = vmul.f32 %v3750_v23, %v3750_v23  ;;  %v631_v13 = vadd.f32 %v3574_v50, %v3444_v7  ;;  %v633_v50 = vadd.f32 %v3585_v2, %v3446_v8 }
 0x22f   : > { %v787_v61 = vpop.xlane.xlu0 %786  ;;  %v1036_v41 = vadd.f32 %v969_v58, %v968_v54  ;;  %v845_v54 = vadd.f32 %v3754_v39, %v3744_v1  ;;  %v2799_v58 = vld [vmem:[#allocation7 + $0x58] sm:$0xff]  }
 0x230   : > { %v870_v52 = vmul.f32 0.00390625, %v787_v61  ;;  %843 = vadd.xlane.f32.xlu1 %v842_v59  ;;  %v1039_v53 = vadd.f32 %v971_v9, %v970_v63  ;;  %v697_v59 = vmul.f32 0.01, %v625_v5  ;;  %2491 = vmatprep.subr.bf16.mxu1 %v2799_v58  ;;  %v3798_v63 = vmax.f32 %v623_v26, %v696_v60 }
 0x231   : > { %1037 = vadd.xlane.f32.xlu0 %v1036_v41  ;;  %v790_v4 = vpop.xlane.xlu1 %789  ;;  %2492 = vmatpush3.bf16.msra.mxu1 %v2800_v25  ;;  %v3810_v60 = vmax.f32 %v627_v18, %v698_v40  ;;  %v699_v2 = vmul.f32 0.01, %v631_v13  ;;  %v700_v58 = vmul.f32 0.01, %v633_v50  ;;  %v637_v25 = vadd.f32 %v3593_v28, %v3446_v8 }
 0x232   : > { %v3779_v31 = vsub.f32 %v3500_v0, %v870_v52  ;;  %v3782_v35 = vsub.f32 %v3502_v12, %v870_v52  ;;  %v871_v29 = vmul.f32 0.00390625, %v790_v4  ;;  %v3796_v4 = vmax.f32 %v621_v56, %v695_v44  ;;  %v2802_v56 = vld [vmem:[#allocation7 + $0x20] sm:$0xff]  }
 0x233   : > { %v3808_v26 = vmax.f32 %v625_v5, %v697_v59  ;;  %v2803_v5 = vld [vmem:[#allocation7 + $0x68] sm:$0xff]   ;;  %v3834_v28 = vmax.f32 %v631_v13, %v699_v2 }
 0x234   : > { %v3787_v38 = vsub.f32 %v3506_v15, %v871_v29  ;;  %v3790_v61 = vsub.f32 %v3508_v16, %v871_v29  ;;  %1040 = vadd.xlane.f32.xlu1 %v1039_v53  ;;  %v972_v0 = vmul.f32 %v3779_v31, %v3779_v31  ;;  %v973_v12 = vmul.f32 %v3782_v35, %v3782_v35  ;;  %v2801_v15 = vld [vmem:[#allocation7 + $0x60] sm:$0xff]  }
 0x235   : > { %846 = vadd.xlane.f32.xlu0 %v845_v54  ;;  %v848_v16 = vadd.f32 %v3774_v34, %v3772_v49  ;;  %2493 = vmatprep.subr.bf16.mxu1 %v2801_v15  ;;  %v635_v29 = vadd.f32 %v3590_v17, %v3444_v7  ;;  %v2804_v15 = vld [vmem:[#allocation7 + $0x28] sm:$0xff]  }
 0x236   : > { %v1042_v9 = vadd.f32 %v973_v12, %v972_v0  ;;  %v974_v41 = vmul.f32 %v3787_v38, %v3787_v38  ;;  %v975_v52 = vmul.f32 %v3790_v61, %v3790_v61  ;;  %v851_v0 = vadd.f32 %v3798_v63, %v3796_v4  ;;  %2494 = vmatpush3.bf16.msra.mxu1 %v2802_v56 }
 0x237   : > { %v793_v44 = vpop.xlane.xlu0 %792  ;;  %2495 = vmatprep.subr.bf16.mxu1 %v2803_v5 }
 0x238   : > { %v872_v54 = vmul.f32 0.00390625, %v793_v44  ;;  %849 = vadd.xlane.f32.xlu1 %v848_v16  ;;  %v1045_v12 = vadd.f32 %v975_v52, %v974_v41  ;;  %v701_v16 = vmul.f32 0.01, %v635_v29  ;;  %v2806_v44 = vld [vmem:[#allocation7 + $0x30] sm:$0xff]  }
 0x239   : > { %1043 = vadd.xlane.f32.xlu0 %v1042_v9  ;;  %v796_v53 = vpop.xlane.xlu1 %795  ;;  %v702_v9 = vmul.f32 0.01, %v637_v25 }
 0x23a   : > { %v3819_v18 = vsub.f32 %v3524_v36, %v872_v54  ;;  %v3822_v59 = vsub.f32 %v3526_v42, %v872_v54  ;;  %v873_v40 = vmul.f32 0.00390625, %v796_v53  ;;  %v3836_v42 = vmax.f32 %v633_v50, %v700_v58  ;;  %2496 = vmatpush3.bf16.msra.mxu1 %v2804_v15 }
 0x23b   : > { %v3844_v2 = vmax.f32 %v635_v29, %v701_v16  ;;  %v3846_v54 = vmax.f32 %v637_v25, %v702_v9 }
 0x23c   : > { %v3825_v7 = vsub.f32 %v3530_v45, %v873_v40  ;;  %v3828_v8 = vsub.f32 %v3532_v46, %v873_v40  ;;  %1046 = vadd.xlane.f32.xlu1 %v1045_v12  ;;  %v976_v17 = vmul.f32 %v3819_v18, %v3819_v18  ;;  %v977_v36 = vmul.f32 %v3822_v59, %v3822_v59  ;;  %v2805_v45 = vld [vmem:[#allocation7 + $0x70] sm:$0xff]  }
 0x23d   : > { %852 = vadd.xlane.f32.xlu0 %v851_v0  ;;  %v854_v46 = vadd.f32 %v3810_v60, %v3808_v26  ;;  %2497 = vmatprep.subr.bf16.mxu1 %v2805_v45  ;;  %v857_v53 = vadd.f32 %v3836_v42, %v3834_v28  ;;  %v2807_v0 = vld [vmem:[#allocation7 + $0x78] sm:$0xff]  }
 0x23e   : > { %v1048_v41 = vadd.f32 %v977_v36, %v976_v17  ;;  %v978_v52 = vmul.f32 %v3825_v7, %v3825_v7  ;;  %v979_v56 = vmul.f32 %v3828_v8, %v3828_v8  ;;  %2498 = vmatpush3.bf16.msra.mxu1 %v2806_v44  ;;  %v2808_v17 = vld [vmem:[#allocation7 + $0x38] sm:$0xff]  }
 0x23f   : > { %v799_v13 = vpop.xlane.xlu0 %798  ;;  %2499 = vmatprep.subr.bf16.mxu1 %v2807_v0 }
 0x240   : > { %v874_v50 = vmul.f32 0.00390625, %v799_v13  ;;  %855 = vadd.xlane.f32.xlu1 %v854_v46  ;;  %v1051_v15 = vadd.f32 %v979_v56, %v978_v52 }
 0x241   : > { %1049 = vadd.xlane.f32.xlu0 %v1048_v41  ;;  %v802_v58 = vpop.xlane.xlu1 %801 }
 0x242   : > { %v3851_v5 = vsub.f32 %v3548_v3, %v874_v50  ;;  %v3854_v40 = vsub.f32 %v3552_v6, %v874_v50  ;;  %v875_v12 = vmul.f32 0.00390625, %v802_v58  ;;  %2500 = vmatpush3.bf16.msra.mxu1 %v2808_v17  ;;  %v860_v6 = vadd.f32 %v3846_v54, %v3844_v2  ;;  %v4669_v17 = vld [vmem:[#allocation15_spill] sm:$0xff] }
 0x244   : > { %v3857_v29 = vsub.f32 %v3554_v10, %v875_v12  ;;  %v3860_v25 = vsub.f32 %v3556_v11, %v875_v12  ;;  %1052 = vadd.xlane.f32.xlu1 %v1051_v15  ;;  %v980_v36 = vmul.f32 %v3851_v5, %v3851_v5  ;;  %v981_v3 = vmul.f32 %v3854_v40, %v3854_v40 }
 0x245   : > { %858 = vadd.xlane.f32.xlu0 %v857_v53 }
 0x246   : > { %v1054_v16 = vadd.f32 %v981_v3, %v980_v36  ;;  %v982_v10 = vmul.f32 %v3857_v29, %v3857_v29  ;;  %v983_v11 = vmul.f32 %v3860_v25, %v3860_v25  ;;  %v4670_v3 = vld [vmem:[#allocation16_spill] sm:$0xff] }
 0x247   : > { %v805_v9 = vpop.xlane.xlu0 %804 }
 0x248   : > { %v876_v45 = vmul.f32 0.00390625, %v805_v9  ;;  %861 = vadd.xlane.f32.xlu1 %v860_v6  ;;  %v1057_v44 = vadd.f32 %v983_v11, %v982_v10  ;;  %v4671_v10 = vld [vmem:[#allocation17_spill] sm:$0xff]  ;;  %v4672_v9 = vld [vmem:[#allocation18_spill] sm:$0xff] }
 0x249   : > { %1055 = vadd.xlane.f32.xlu0 %v1054_v16  ;;  %v808_v46 = vpop.xlane.xlu1 %807 }
 0x24a   : > { %v3873_v41 = vsub.f32 %v3572_v47, %v876_v45  ;;  %v3876_v52 = vsub.f32 %v3576_v51, %v876_v45  ;;  %v877_v56 = vmul.f32 0.00390625, %v808_v46 }
 0x24c   : > { %v3879_v13 = vsub.f32 %v3578_v55, %v877_v56  ;;  %v3882_v50 = vsub.f32 %v3580_v57, %v877_v56  ;;  %1058 = vadd.xlane.f32.xlu1 %v1057_v44  ;;  %v984_v58 = vmul.f32 %v3873_v41, %v3873_v41  ;;  %v985_v53 = vmul.f32 %v3876_v52, %v3876_v52 }
 0x24e   : > { %v1060_v47 = vadd.f32 %v985_v53, %v984_v58  ;;  %v986_v51 = vmul.f32 %v3879_v13, %v3879_v13  ;;  %v987_v0 = vmul.f32 %v3882_v50, %v3882_v50 }
 0x24f   : > { %v811_v12 = vpop.xlane.xlu0 %810 }
 0x250   : > { %v878_v55 = vmul.f32 0.00390625, %v811_v12  ;;  %1061 = vadd.xlane.f32.xlu0 %v1060_v47  ;;  %v1063_v15 = vadd.f32 %v987_v0, %v986_v51 }
 0x251   : > { %v814_v57 = vpop.xlane.xlu1 %813 }
 0x252   : > { %v3893_v36 = vsub.f32 %v4669_v17, %v878_v55  ;;  %v3896_v6 = vsub.f32 %v4670_v3, %v878_v55  ;;  %v879_v16 = vmul.f32 0.00390625, %v814_v57  ;;  %1064 = vadd.xlane.f32.xlu1 %v1063_v15  ;;  %v4673_v55 = vld [vmem:[#allocation19_spill] sm:$0xff]  ;;  %v4675_v57 = vld [vmem:[#allocation20_spill] sm:$0xff] }
 0x254   : > { %v3899_v11 = vsub.f32 %v4671_v10, %v879_v16  ;;  %v3902_v45 = vsub.f32 %v4672_v9, %v879_v16  ;;  %v988_v46 = vmul.f32 %v3893_v36, %v3893_v36  ;;  %v989_v56 = vmul.f32 %v3896_v6, %v3896_v6  ;;  %v4676_v16 = vld [vmem:[#allocation21_spill] sm:$0xff]  ;;  %v4678_v9 = vld [vmem:[#allocation22_spill] sm:$0xff] }
 0x256   : > { %v1066_v44 = vadd.f32 %v989_v56, %v988_v46  ;;  %v990_v58 = vmul.f32 %v3899_v11, %v3899_v11  ;;  %v991_v53 = vmul.f32 %v3902_v45, %v3902_v45 }
 0x257   : > { %v817_v47 = vpop.xlane.xlu0 %816 }
 0x258   : > { %v880_v51 = vmul.f32 0.00390625, %v817_v47  ;;  %1067 = vadd.xlane.f32.xlu0 %v1066_v44  ;;  %v1069_v0 = vadd.f32 %v991_v53, %v990_v58 }
 0x259   : > { %v820_v12 = vpop.xlane.xlu1 %819 }
 0x25a   : > { %v3913_v15 = vsub.f32 %v4673_v55, %v880_v51  ;;  %v3916_v17 = vsub.f32 %v4675_v57, %v880_v51  ;;  %v881_v3 = vmul.f32 0.00390625, %v820_v12  ;;  %1070 = vadd.xlane.f32.xlu1 %v1069_v0 }
 0x25c   : > { %4674 = vst [vmem:[#allocation15_spill] sm:$0xff] %v3913_v15  ;;  %v3919_v10 = vsub.f32 %v4676_v16, %v881_v3  ;;  %v3922_v46 = vsub.f32 %v4678_v9, %v881_v3  ;;  %v992_v56 = vmul.f32 %v3913_v15, %v3913_v15  ;;  %v993_v44 = vmul.f32 %v3916_v17, %v3916_v17  ;;  %v4681_v3 = vld [vmem:[#allocation23_spill] sm:$0xff]  ;;  %v4685_v15 = vld [vmem:[#allocation25_spill] sm:$0xff] }
 0x25e   : > { %4677 = vst [vmem:[#allocation16_spill] sm:$0xff] %v3919_v10  ;;  %4679 = vst [vmem:[#allocation17_spill] sm:$0xff] %v3922_v46  ;;  %v1072_v58 = vadd.f32 %v993_v44, %v992_v56  ;;  %v994_v53 = vmul.f32 %v3919_v10, %v3919_v10  ;;  %v995_v47 = vmul.f32 %v3922_v46, %v3922_v46  ;;  %v4683_v56 = vld [vmem:[#allocation24_spill] sm:$0xff] }
 0x25f   : > { %v823_v51 = vpop.xlane.xlu0 %822 }
 0x260   : > { %v882_v0 = vmul.f32 0.00390625, %v823_v51  ;;  %1073 = vadd.xlane.f32.xlu0 %v1072_v58  ;;  %v1075_v12 = vadd.f32 %v995_v47, %v994_v53 }
 0x261   : > { %v826_v55 = vpop.xlane.xlu1 %825 }
 0x262   : > { %v3933_v57 = vsub.f32 %v3628_v32, %v882_v0  ;;  %v3936_v16 = vsub.f32 %v4681_v3, %v882_v0  ;;  %v883_v9 = vmul.f32 0.00390625, %v826_v55  ;;  %1076 = vadd.xlane.f32.xlu1 %v1075_v12 }
 0x264   : > { %4680 = vst [vmem:[#allocation18_spill] sm:$0xff] %v3933_v57  ;;  %4682 = vst [vmem:[#allocation19_spill] sm:$0xff] %v3936_v16  ;;  %v3939_v44 = vsub.f32 %v4683_v56, %v883_v9  ;;  %v3942_v10 = vsub.f32 %v4685_v15, %v883_v9  ;;  %v996_v51 = vmul.f32 %v3933_v57, %v3933_v57  ;;  %v4687_v15 = vld [vmem:[#allocation26_spill] sm:$0xff]  ;;  %v4689_v56 = vld [vmem:[#allocation27_spill] sm:$0xff] }
 0x265   : > { %v997_v58 = vmul.f32 %v3936_v16, %v3936_v16 }
 0x266   : > { %4684 = vst [vmem:[#allocation20_spill] sm:$0xff] %v3939_v44  ;;  %4686 = vst [vmem:[#allocation21_spill] sm:$0xff] %v3942_v10  ;;  %v998_v32 = vmul.f32 %v3939_v44, %v3939_v44  ;;  %v999_v47 = vmul.f32 %v3942_v10, %v3942_v10  ;;  %v4692_v44 = vld [vmem:[#allocation29_spill] sm:$0xff] }
 0x267   : > { %v1078_v53 = vadd.f32 %v997_v58, %v996_v51  ;;  %v829_v0 = vpop.xlane.xlu0 %828  ;;  %v4690_v51 = vld [vmem:[#allocation28_spill] sm:$0xff] }
 0x268   : > { %v884_v12 = vmul.f32 0.00390625, %v829_v0  ;;  %v1081_v55 = vadd.f32 %v999_v47, %v998_v32 }
 0x269   : > { %1079 = vadd.xlane.f32.xlu0 %v1078_v53  ;;  %v832_v3 = vpop.xlane.xlu1 %831 }
 0x26a   : > { %v3953_v9 = vsub.f32 %v4687_v15, %v884_v12  ;;  %v3956_v57 = vsub.f32 %v4689_v56, %v884_v12  ;;  %v885_v46 = vmul.f32 0.00390625, %v832_v3  ;;  %1082 = vadd.xlane.f32.xlu1 %v1081_v55 }
 0x26c   : > { %4688 = vst [vmem:[#allocation22_spill] sm:$0xff] %v3953_v9  ;;  %v3959_v58 = vsub.f32 %v4690_v51, %v885_v46  ;;  %v3962_v16 = vsub.f32 %v4692_v44, %v885_v46  ;;  %v1000_v0 = vmul.f32 %v3953_v9, %v3953_v9  ;;  %v1001_v53 = vmul.f32 %v3956_v57, %v3956_v57 }
 0x26e   : > { %4691 = vst [vmem:[#allocation23_spill] sm:$0xff] %v3959_v58  ;;  %4693 = vst [vmem:[#allocation24_spill] sm:$0xff] %v3962_v16  ;;  %v1084_v32 = vadd.f32 %v1001_v53, %v1000_v0  ;;  %v1002_v47 = vmul.f32 %v3959_v58, %v3959_v58  ;;  %v1003_v12 = vmul.f32 %v3962_v16, %v3962_v16 }
 0x270   : > { %1085 = vadd.xlane.f32.xlu0 %v1084_v32  ;;  %v1087_v55 = vadd.f32 %v1003_v12, %v1002_v47 }
 0x272   : > { %1088 = vadd.xlane.f32.xlu1 %v1087_v55 }
 0x2ad   : > { %v1026_v3 = vpop.xlane.xlu0 %1025 }
 0x2ae   : > { %v1120_v15 = vmul.f32 0.00390625, %v1026_v3 }
 0x2b0   : > { %v1152_v46 = vadd.f32 1e-05, %v1120_v15 }
 0x2b1   : > { %v1029_v44 = vpop.xlane.xlu1 %1028  ;;  %v835_v56 = vpop.xlane.xlu0 %834 }
 0x2b2   : > { %v1121_v51 = vmul.f32 0.00390625, %v1029_v44  ;;  %v886_v9 = vmul.f32 0.00390625, %v835_v56  ;;  %2817 = vrsqrt.f32 %v1152_v46 }
 0x2b4   : > { %v1153_v10 = vadd.f32 1e-05, %v1121_v51  ;;  %v3973_v0 = vsub.f32 %v3666_v24, %v886_v9  ;;  %v3976_v53 = vsub.f32 %v3672_v27, %v886_v9 }
 0x2b5   : > { %v838_v58 = vpop.xlane.xlu1 %837  ;;  %v1032_v16 = vpop.xlane.xlu0 %1031 }
 0x2b6   : > { %4694 = vst [vmem:[#allocation25_spill] sm:$0xff] %v3973_v0  ;;  %2819 = vrsqrt.f32 %v1153_v10  ;;  %v887_v32 = vmul.f32 0.00390625, %v838_v58  ;;  %v1122_v47 = vmul.f32 0.00390625, %v1032_v16  ;;  %v1004_v12 = vmul.f32 %v3973_v0, %v3973_v0 }
 0x2b7   : > { %v1005_v55 = vmul.f32 %v3976_v53, %v3976_v53 }
 0x2b8   : > { %v3983_v3 = vsub.f32 %v3690_v22, %v887_v32  ;;  %v3986_v24 = vsub.f32 %v3696_v19, %v887_v32  ;;  %v1154_v15 = vadd.f32 1e-05, %v1122_v47 }
 0x2b9   : > { %v1035_v27 = vpop.xlane.xlu1 %1034  ;;  %v841_v9 = vpop.xlane.xlu0 %840  ;;  %v1090_v46 = vadd.f32 %v1005_v55, %v1004_v12 }
 0x2ba   : > { %4695 = vst [vmem:[#allocation26_spill] sm:$0xff] %v3983_v3  ;;  %4696 = vst [vmem:[#allocation27_spill] sm:$0xff] %v3986_v24  ;;  %v1123_v44 = vmul.f32 0.00390625, %v1035_v27  ;;  %v888_v10 = vmul.f32 0.00390625, %v841_v9  ;;  %v1006_v16 = vmul.f32 %v3983_v3, %v3983_v3  ;;  %2821 = vrsqrt.f32 %v1154_v15 }
 0x2bb   : > { %1091 = vadd.xlane.f32.xlu0 %v1090_v46  ;;  %v1007_v58 = vmul.f32 %v3986_v24, %v3986_v24  ;;  %v4702_v24 = vld [vmem:[#allocation33_spill] sm:$0xff] }
 0x2bc   : > { %v1155_v56 = vadd.f32 1e-05, %v1123_v44  ;;  %v3993_v22 = vsub.f32 %v3704_v33, %v888_v10  ;;  %v3996_v19 = vsub.f32 %v3706_v43, %v888_v10  ;;  %v2818_v51 = vpop.eup %2817  ;;  %v4699_v33 = vld [vmem:[#allocation30_spill] sm:$0xff] }
 0x2bd   : > { %v844_v32 = vpop.xlane.xlu1 %843  ;;  %v1093_v47 = vadd.f32 %v1007_v58, %v1006_v16  ;;  %v1216_v44 = vmul.f32 %v2818_v51, %v4699_v33  ;;  %v4700_v58 = vld [vmem:[#allocation32_spill] sm:$0xff] }
 0x2be   : > { %4697 = vst [vmem:[#allocation28_spill] sm:$0xff] %v3993_v22  ;;  %4698 = vst [vmem:[#allocation29_spill] sm:$0xff] %v3996_v19  ;;  %2823 = vrsqrt.f32 %v1155_v56  ;;  %v889_v12 = vmul.f32 0.00390625, %v844_v32  ;;  %v1038_v55 = vpop.xlane.xlu0 %1037  ;;  %v1008_v15 = vmul.f32 %v3993_v22, %v3993_v22  ;;  %v1009_v27 = vmul.f32 %v3996_v19, %v3996_v19  ;;  %v4701_v22 = vld [vmem:[#allocation31_spill] sm:$0xff] }
 0x2bf   : > { %v1124_v9 = vmul.f32 0.00390625, %v1038_v55  ;;  %1094 = vadd.xlane.f32.xlu1 %v1093_v47  ;;  %v1217_v0 = vmul.f32 %v2818_v51, %v4701_v22 }
 0x2c0   : > { %v2820_v46 = vpop.eup %2819  ;;  %v4004_v43 = vsub.f32 %v3734_v20, %v889_v12  ;;  %v4007_v10 = vsub.f32 %v3736_v62, %v889_v12  ;;  %v1096_v16 = vadd.f32 %v1009_v27, %v1008_v15 }
 0x2c1   : > { %v1218_v56 = vmul.f32 %v2820_v46, %v4700_v58  ;;  %v1156_v32 = vadd.f32 1e-05, %v1124_v9  ;;  %v1041_v3 = vpop.xlane.xlu1 %1040  ;;  %v1219_v19 = vmul.f32 %v2820_v46, %v4702_v24 }
 0x2c2   : > { %v1125_v55 = vmul.f32 0.00390625, %v1041_v3  ;;  %v847_v47 = vpop.xlane.xlu0 %846  ;;  %1097 = vadd.xlane.f32.xlu0 %v1096_v16  ;;  %v1010_v33 = vmul.f32 %v4004_v43, %v4004_v43  ;;  %v1011_v20 = vmul.f32 %v4007_v10, %v4007_v10 }
 0x2c3   : > { %2825 = vrsqrt.f32 %v1156_v32  ;;  %v890_v62 = vmul.f32 0.00390625, %v847_v47  ;;  %v1281_v12 = vpack.c.bf16 %v1219_v19, %v1217_v0  ;;  %v1280_v15 = vpack.c.bf16 %v1218_v56, %v1216_v44 }
 0x2c4   : > { %v1157_v27 = vadd.f32 1e-05, %v1125_v55  ;;  %v1099_v9 = vadd.f32 %v1011_v20, %v1010_v33  ;;  %v2822_v58 = vpop.eup %2821 }
 0x2c5   : > { %v4017_v22 = vsub.f32 %v3744_v1, %v890_v62  ;;  %v4020_v3 = vsub.f32 %v3754_v39, %v890_v62  ;;  %v850_v24 = vpop.xlane.xlu1 %849  ;;  %1479 = vmatprep.mubr.bf16.mxu1 %v1281_v12  ;;  %v1221_v56 = vmul.f32 %v2822_v58, %v3702_v14  ;;  %v1220_v32 = vmul.f32 %v2822_v58, %v3699_v21  ;;  %v4703_v62 = vld [vmem:[#allocation34_spill] sm:$0xff] }
 0x2c6   : > { %2827 = vrsqrt.f32 %v1157_v27  ;;  %v891_v51 = vmul.f32 0.00390625, %v850_v24  ;;  %v1044_v46 = vpop.xlane.xlu0 %1043  ;;  %1100 = vadd.xlane.f32.xlu1 %v1099_v9  ;;  %1480 = vmatmul.mubr.bf16.vlgmr.msra.gmra.mrb[16].mxu1 %v1280_v15 }
 0x2c7   : > { %v1126_v16 = vmul.f32 0.00390625, %v1044_v46  ;;  %v1012_v0 = vmul.f32 %v4017_v22, %v4017_v22  ;;  %v1013_v19 = vmul.f32 %v4020_v3, %v4020_v3 }
 0x2c8   : > { %v2824_v44 = vpop.eup %2823  ;;  %v4027_v1 = vsub.f32 %v3772_v49, %v891_v51  ;;  %v4030_v39 = vsub.f32 %v3774_v34, %v891_v51 }
 0x2c9   : > { %v1158_v55 = vadd.f32 1e-05, %v1126_v16  ;;  %v1047_v47 = vpop.xlane.xlu1 %1046  ;;  %v1102_v33 = vadd.f32 %v1013_v19, %v1012_v0  ;;  %v1223_v20 = vmul.f32 %v2824_v44, %v3720_v48  ;;  %v1222_v12 = vmul.f32 %v2824_v44, %v4703_v62 }
 0x2ca   : > { %v1127_v15 = vmul.f32 0.00390625, %v1047_v47  ;;  %v853_v27 = vpop.xlane.xlu0 %852  ;;  %v1014_v49 = vmul.f32 %v4027_v1, %v4027_v1  ;;  %v1015_v34 = vmul.f32 %v4030_v39, %v4030_v39 }
 0x2cb   : > { %2829 = vrsqrt.f32 %v1158_v55  ;;  %v892_v9 = vmul.f32 0.00390625, %v853_v27  ;;  %1103 = vadd.xlane.f32.xlu0 %v1102_v33  ;;  %v1283_v14 = vpack.c.bf16 %v1223_v20, %v1221_v56  ;;  %v1282_v21 = vpack.c.bf16 %v1222_v12, %v1220_v32  ;;  %v4704_v27 = vld [vmem:[#allocation35_spill] sm:$0xff] }
 0x2cc   : > { %v1159_v58 = vadd.f32 1e-05, %v1127_v15  ;;  %v1105_v24 = vadd.f32 %v1015_v34, %v1014_v49 }
 0x2cd   : > { %v2826_v51 = vpop.eup %2825  ;;  %v4041_v48 = vsub.f32 %v3796_v4, %v892_v9  ;;  %v4044_v46 = vsub.f32 %v3798_v63, %v892_v9  ;;  %v856_v16 = vpop.xlane.xlu1 %855  ;;  %1487 = vmatprep.mubr.bf16.mxu1 %v1283_v14 }
 0x2ce   : > { %2831 = vrsqrt.f32 %v1159_v58  ;;  %v893_v0 = vmul.f32 0.00390625, %v856_v16  ;;  %v1050_v19 = vpop.xlane.xlu0 %1049  ;;  %1106 = vadd.xlane.f32.xlu1 %v1105_v24  ;;  %1488 = vmatmul.mubr.bf16.gmra.mrb[20].mxu1 %v1282_v21  ;;  %v1225_v47 = vmul.f32 %v2826_v51, %v3742_v37  ;;  %v1224_v33 = vmul.f32 %v2826_v51, %v3739_v30 }
 0x2cf   : > { %v1128_v44 = vmul.f32 0.00390625, %v1050_v19  ;;  %v1016_v56 = vmul.f32 %v4041_v48, %v4041_v48  ;;  %v1017_v32 = vmul.f32 %v4044_v46, %v4044_v46 }
 0x2d0   : > { %v2828_v55 = vpop.eup %2827  ;;  %v4051_v4 = vsub.f32 %v3808_v26, %v893_v0  ;;  %v4054_v63 = vsub.f32 %v3810_v60, %v893_v0 }
 0x2d1   : > { %v1160_v20 = vadd.f32 1e-05, %v1128_v44  ;;  %v1053_v62 = vpop.xlane.xlu1 %1052  ;;  %v1108_v12 = vadd.f32 %v1017_v32, %v1016_v56  ;;  %v1227_v15 = vmul.f32 %v2828_v55, %v3750_v23  ;;  %v1226_v49 = vmul.f32 %v2828_v55, %v4704_v27 }
 0x2d2   : > { %v1129_v34 = vmul.f32 0.00390625, %v1053_v62  ;;  %v859_v9 = vpop.xlane.xlu0 %858  ;;  %v1018_v26 = vmul.f32 %v4051_v4, %v4051_v4  ;;  %v1019_v60 = vmul.f32 %v4054_v63, %v4054_v63 }
 0x2d3   : > { %v894_v14 = vmul.f32 0.00390625, %v859_v9  ;;  %1109 = vadd.xlane.f32.xlu0 %v1108_v12  ;;  %v1285_v37 = vpack.c.bf16 %v1227_v15, %v1225_v47  ;;  %v1284_v21 = vpack.c.bf16 %v1226_v49, %v1224_v33  ;;  %2833 = vrsqrt.f32 %v1160_v20 }
 0x2d4   : > { %v1161_v30 = vadd.f32 1e-05, %v1129_v34  ;;  %v1111_v58 = vadd.f32 %v1019_v60, %v1018_v26 }
 0x2d5   : > { %v2830_v24 = vpop.eup %2829  ;;  %v4065_v23 = vsub.f32 %v3834_v28, %v894_v14  ;;  %v4068_v51 = vsub.f32 %v3836_v42, %v894_v14  ;;  %v862_v16 = vpop.xlane.xlu1 %861  ;;  %1495 = vmatprep.mubr.bf16.mxu1 %v1285_v37 }
 0x2d6   : > { %2835 = vrsqrt.f32 %v1161_v30  ;;  %v895_v0 = vmul.f32 0.00390625, %v862_v16  ;;  %v1056_v19 = vpop.xlane.xlu0 %1055  ;;  %1112 = vadd.xlane.f32.xlu1 %v1111_v58  ;;  %1496 = vmatmul.mubr.bf16.gmra.mrb[24].mxu1 %v1284_v21  ;;  %v1229_v47 = vmul.f32 %v2830_v24, %v3782_v35  ;;  %v1228_v33 = vmul.f32 %v2830_v24, %v3779_v31 }
 0x2d7   : > { %v1130_v44 = vmul.f32 0.00390625, %v1056_v19  ;;  %v1020_v56 = vmul.f32 %v4065_v23, %v4065_v23  ;;  %v1021_v32 = vmul.f32 %v4068_v51, %v4068_v51 }
 0x2d8   : > { %v2832_v55 = vpop.eup %2831  ;;  %v4075_v28 = vsub.f32 %v3844_v2, %v895_v0  ;;  %v4078_v42 = vsub.f32 %v3846_v54, %v895_v0 }
 0x2d9   : > { %v1162_v20 = vadd.f32 1e-05, %v1130_v44  ;;  %v1059_v62 = vpop.xlane.xlu1 %1058  ;;  %v1114_v12 = vadd.f32 %v1021_v32, %v1020_v56  ;;  %v1231_v15 = vmul.f32 %v2832_v55, %v3790_v61  ;;  %v1230_v27 = vmul.f32 %v2832_v55, %v3787_v38 }
 0x2da   : > { %v1131_v49 = vmul.f32 0.00390625, %v1059_v62  ;;  %v1022_v34 = vmul.f32 %v4075_v28, %v4075_v28  ;;  %v1023_v2 = vmul.f32 %v4078_v42, %v4078_v42 }
 0x2db   : > { %1115 = vadd.xlane.f32.xlu0 %v1114_v12  ;;  %v1287_v54 = vpack.c.bf16 %v1231_v15, %v1229_v47  ;;  %v1286_v9 = vpack.c.bf16 %v1230_v27, %v1228_v33  ;;  %2837 = vrsqrt.f32 %v1162_v20 }
 0x2dc   : > { %v1163_v35 = vadd.f32 1e-05, %v1131_v49  ;;  %v1117_v31 = vadd.f32 %v1023_v2, %v1022_v34 }
 0x2dd   : > { %1503 = vmatprep.mubr.bf16.mxu1 %v1287_v54  ;;  %v1062_v26 = vpop.xlane.xlu0 %1061  ;;  %v2834_v60 = vpop.eup %2833 }
 0x2de   : > { %2839 = vrsqrt.f32 %v1163_v35  ;;  %v1132_v61 = vmul.f32 0.00390625, %v1062_v26  ;;  %1118 = vadd.xlane.f32.xlu1 %v1117_v31  ;;  %1504 = vmatmul.mubr.bf16.gmra.mrb[28].mxu1 %v1286_v9  ;;  %v1233_v30 = vmul.f32 %v2834_v60, %v3822_v59  ;;  %v1232_v24 = vmul.f32 %v2834_v60, %v3819_v18 }
 0x2df   : > { %v1065_v38 = vpop.xlane.xlu1 %1064 }
 0x2e0   : > { %v2836_v14 = vpop.eup %2835  ;;  %v1164_v37 = vadd.f32 1e-05, %v1132_v61  ;;  %v1133_v21 = vmul.f32 0.00390625, %v1065_v38 }
 0x2e1   : > { %v1235_v58 = vmul.f32 %v2836_v14, %v3828_v8  ;;  %v1234_v16 = vmul.f32 %v2836_v14, %v3825_v7 }
 0x2e2   : > { %2841 = vrsqrt.f32 %v1164_v37  ;;  %v1165_v0 = vadd.f32 1e-05, %v1133_v21 }
 0x2e3   : > { %v1289_v19 = vpack.c.bf16 %v1235_v58, %v1233_v30  ;;  %v1288_v44 = vpack.c.bf16 %v1234_v16, %v1232_v24 }
 0x2e4   : > { %2843 = vrsqrt.f32 %v1165_v0 }
 0x2e5   : > { %1511 = vmatprep.mubr.bf16.mxu1 %v1289_v19  ;;  %v1068_v56 = vpop.xlane.xlu0 %1067  ;;  %v2838_v32 = vpop.eup %2837 }
 0x2e6   : > { %v1134_v55 = vmul.f32 0.00390625, %v1068_v56  ;;  %1512 = vmatmul.mubr.bf16.gmra.mrb[32].mxu1 %v1288_v44  ;;  %v1237_v8 = vmul.f32 %v2838_v32, %v3854_v40  ;;  %v1236_v7 = vmul.f32 %v2838_v32, %v3851_v5 }
 0x2e7   : > { %v1071_v47 = vpop.xlane.xlu1 %1070 }
 0x2e8   : > { %v2840_v33 = vpop.eup %2839  ;;  %v1166_v20 = vadd.f32 1e-05, %v1134_v55  ;;  %v1135_v59 = vmul.f32 0.00390625, %v1071_v47  ;;  %v4705_v47 = vld [vmem:[#allocation17_spill] sm:$0xff] }
 0x2e9   : > { %v1239_v18 = vmul.f32 %v2840_v33, %v3860_v25  ;;  %v1238_v62 = vmul.f32 %v2840_v33, %v3857_v29 }
 0x2ea   : > { %2845 = vrsqrt.f32 %v1166_v20  ;;  %v1167_v12 = vadd.f32 1e-05, %v1135_v59  ;;  %v4706_v59 = vld [vmem:[#allocation16_spill] sm:$0xff] }
 0x2eb   : > { %v1291_v15 = vpack.c.bf16 %v1239_v18, %v1237_v8  ;;  %v1290_v27 = vpack.c.bf16 %v1238_v62, %v1236_v7  ;;  %v4707_v7 = vld [vmem:[#allocation15_spill] sm:$0xff] }
 0x2ec   : > { %v2842_v49 = vpop.eup %2841  ;;  %2847 = vrsqrt.f32 %v1167_v12 }
 0x2ed   : > { %1519 = vmatprep.mubr.bf16.mxu1 %v1291_v15  ;;  %v1074_v34 = vpop.xlane.xlu0 %1073  ;;  %v1241_v40 = vmul.f32 %v2842_v49, %v3876_v52  ;;  %v1240_v60 = vmul.f32 %v2842_v49, %v3873_v41  ;;  %v4708_v49 = vld [vmem:[#allocation19_spill] sm:$0xff] }
 0x2ee   : > { %v2844_v2 = vpop.eup %2843  ;;  %v1136_v54 = vmul.f32 0.00390625, %v1074_v34  ;;  %1520 = vmatmul.mubr.bf16.gmra.mrb[36].mxu1 %v1290_v27 }
 0x2ef   : > { %v1077_v9 = vpop.xlane.xlu1 %1076  ;;  %v1243_v25 = vmul.f32 %v2844_v2, %v3882_v50  ;;  %v1242_v29 = vmul.f32 %v2844_v2, %v3879_v13 }
 0x2f0   : > { %v1168_v35 = vadd.f32 1e-05, %v1136_v54  ;;  %v1137_v5 = vmul.f32 0.00390625, %v1077_v9  ;;  %v4710_v54 = vld [vmem:[#allocation20_spill] sm:$0xff] }
 0x2f1   : > { %v1293_v31 = vpack.c.bf16 %v1243_v25, %v1241_v40  ;;  %v1292_v38 = vpack.c.bf16 %v1242_v29, %v1240_v60  ;;  %v4711_v25 = vld [vmem:[#allocation18_spill] sm:$0xff]  ;;  %v4712_v60 = vld [vmem:[#allocation24_spill] sm:$0xff] }
 0x2f2   : > { %2849 = vrsqrt.f32 %v1168_v35  ;;  %v1169_v26 = vadd.f32 1e-05, %v1137_v5 }
 0x2f3   : > { %1527 = vmatprep.mubr.bf16.mxu1 %v1293_v31 }
 0x2f4   : > { %v2846_v61 = vpop.eup %2845  ;;  %2851 = vrsqrt.f32 %v1169_v26 }
 0x2f5   : > { %v1245_v50 = vmul.f32 %v2846_v61, %v3896_v6  ;;  %v1244_v0 = vmul.f32 %v2846_v61, %v3893_v36 }
 0x2f6   : > { %v1080_v14 = vpop.xlane.xlu0 %1079  ;;  %v2848_v37 = vpop.eup %2847  ;;  %1528 = vmatmul.mubr.bf16.gmra.mrb[40].mxu1 %v1292_v38  ;;  %v4713_v38 = vld [vmem:[#allocation23_spill] sm:$0xff] }
 0x2f7   : > { %v1138_v21 = vmul.f32 0.00390625, %v1080_v14  ;;  %v1083_v52 = vpop.xlane.xlu1 %1082  ;;  %v1247_v30 = vmul.f32 %v2848_v37, %v3902_v45  ;;  %v1246_v24 = vmul.f32 %v2848_v37, %v3899_v11 }
 0x2f8   : > { %v1139_v13 = vmul.f32 0.00390625, %v1083_v52 }
 0x2f9   : > { %v1170_v58 = vadd.f32 1e-05, %v1138_v21  ;;  %v1295_v16 = vpack.c.bf16 %v1247_v30, %v1245_v50  ;;  %v1294_v44 = vpack.c.bf16 %v1246_v24, %v1244_v0  ;;  %v4714_v21 = vld [vmem:[#allocation22_spill] sm:$0xff] }
 0x2fa   : > { %v1171_v41 = vadd.f32 1e-05, %v1139_v13 }
 0x2fb   : > { %2853 = vrsqrt.f32 %v1170_v58  ;;  %1535 = vmatprep.mubr.bf16.mxu1 %v1295_v16 }
 0x2fc   : > { %v2850_v19 = vpop.eup %2849  ;;  %2855 = vrsqrt.f32 %v1171_v41 }
 0x2fd   : > { %v1086_v56 = vpop.xlane.xlu0 %1085  ;;  %v1249_v45 = vmul.f32 %v2850_v19, %v3916_v17  ;;  %v1248_v62 = vmul.f32 %v2850_v19, %v4707_v7  ;;  %v4709_v17 = vld [vmem:[#allocation21_spill] sm:$0xff] }
 0x2fe   : > { %v2852_v32 = vpop.eup %2851  ;;  %v1140_v55 = vmul.f32 0.00390625, %v1086_v56  ;;  %1536 = vmatmul.mubr.bf16.gmra.mrb[44].mxu1 %v1294_v44 }
 0x2ff   : > { %v1089_v6 = vpop.xlane.xlu1 %1088  ;;  %v1251_v33 = vmul.f32 %v2852_v32, %v4705_v47  ;;  %v1250_v8 = vmul.f32 %v2852_v32, %v4706_v59 }
 0x300   : > { %v1172_v20 = vadd.f32 1e-05, %v1140_v55  ;;  %v1141_v11 = vmul.f32 0.00390625, %v1089_v6 }
 0x301   : > { %v1297_v18 = vpack.c.bf16 %v1251_v33, %v1249_v45  ;;  %v1296_v15 = vpack.c.bf16 %v1250_v8, %v1248_v62  ;;  %v4715_v8 = vld [vmem:[#allocation27_spill] sm:$0xff]  ;;  %v4717_v62 = vld [vmem:[#allocation26_spill] sm:$0xff] }
 0x302   : > { %2857 = vrsqrt.f32 %v1172_v20  ;;  %v1173_v36 = vadd.f32 1e-05, %v1141_v11 }
 0x303   : > { %1543 = vmatprep.mubr.bf16.mxu1 %v1297_v18 }
 0x304   : > { %2859 = vrsqrt.f32 %v1173_v36  ;;  %v4716_v36 = vld [vmem:[#allocation25_spill] sm:$0xff] }
 0x305   : > { %v2854_v12 = vpop.eup %2853 }
 0x306   : > { %v2856_v27 = vpop.eup %2855  ;;  %1544 = vmatmul.mubr.bf16.gmra.mrb[48].mxu1 %v1296_v15  ;;  %v1253_v34 = vmul.f32 %v2854_v12, %v4708_v49  ;;  %v1252_v35 = vmul.f32 %v2854_v12, %v4711_v25 }
 0x307   : > { %v1255_v2 = vmul.f32 %v2856_v27, %v4709_v17  ;;  %v1254_v9 = vmul.f32 %v2856_v27, %v4710_v54 }
 0x309   : > { %v1299_v40 = vpack.c.bf16 %v1255_v2, %v1253_v34  ;;  %v1298_v29 = vpack.c.bf16 %v1254_v9, %v1252_v35  ;;  %v4718_v9 = vld [vmem:[#allocation29_spill] sm:$0xff] }
 0x30b   : > { %1551 = vmatprep.mubr.bf16.mxu1 %v1299_v40 }
 0x30c   : > { %v2858_v5 = vpop.eup %2857 }
 0x30d   : > { %v1257_v26 = vmul.f32 %v2858_v5, %v3956_v57  ;;  %v1256_v52 = vmul.f32 %v2858_v5, %v4714_v21  ;;  %v4719_v5 = vld [vmem:[#allocation28_spill] sm:$0xff] }
 0x30e   : > { %v2860_v31 = vpop.eup %2859  ;;  %1552 = vmatmul.mubr.bf16.gmra.mrb[52].mxu1 %v1298_v29 }
 0x30f   : > { %v1259_v61 = vmul.f32 %v2860_v31, %v4712_v60  ;;  %v1258_v14 = vmul.f32 %v2860_v31, %v4713_v38 }
 0x311   : > { %v1301_v37 = vpack.c.bf16 %v1259_v61, %v1257_v26  ;;  %v1300_v50 = vpack.c.bf16 %v1258_v14, %v1256_v52 }
 0x313   : > { %1559 = vmatprep.mubr.bf16.mxu1 %v1301_v37 }
 0x316   : > { %1560 = vmatmul.mubr.bf16.gmra.mrb[56].mxu1 %v1300_v50 }
 0x348   : > { %v1092_v30 = vpop.xlane.xlu0 %1091 }
 0x349   : > { %v1142_v58 = vmul.f32 0.00390625, %v1092_v30 }
 0x34b   : > { %v1174_v13 = vadd.f32 1e-05, %v1142_v58 }
 0x34c   : > { %v1095_v24 = vpop.xlane.xlu1 %1094 }
 0x34d   : > { %v1143_v16 = vmul.f32 0.00390625, %v1095_v24  ;;  %2861 = vrsqrt.f32 %v1174_v13 }
 0x34f   : > { %v1175_v41 = vadd.f32 1e-05, %v1143_v16  ;;  %v1098_v0 = vpop.xlane.xlu0 %1097 }
 0x350   : > { %v1144_v19 = vmul.f32 0.00390625, %v1098_v0 }
 0x351   : > { %2863 = vrsqrt.f32 %v1175_v41 }
 0x352   : > { %v1176_v57 = vadd.f32 1e-05, %v1144_v19 }
 0x353   : > { %v1101_v44 = vpop.xlane.xlu1 %1100 }
 0x354   : > { %v1145_v56 = vmul.f32 0.00390625, %v1101_v44  ;;  %2865 = vrsqrt.f32 %v1176_v57 }
 0x356   : > { %v1177_v32 = vadd.f32 1e-05, %v1145_v56 }
 0x357   : > { %v2862_v55 = vpop.eup %2861 }
 0x358   : > { %2867 = vrsqrt.f32 %v1177_v32  ;;  %v1104_v6 = vpop.xlane.xlu0 %1103  ;;  %v1261_v11 = vmul.f32 %v2862_v55, %v3976_v53  ;;  %v1260_v7 = vmul.f32 %v2862_v55, %v4716_v36 }
 0x359   : > { %v1146_v45 = vmul.f32 0.00390625, %v1104_v6 }
 0x35b   : > { %v2864_v47 = vpop.eup %2863  ;;  %v1178_v33 = vadd.f32 1e-05, %v1146_v45  ;;  %v1107_v20 = vpop.xlane.xlu1 %1106 }
 0x35c   : > { %v1147_v59 = vmul.f32 0.00390625, %v1107_v20  ;;  %v1263_v18 = vmul.f32 %v2864_v47, %v4715_v8  ;;  %v1262_v12 = vmul.f32 %v2864_v47, %v4717_v62 }
 0x35d   : > { %2869 = vrsqrt.f32 %v1178_v33 }
 0x35e   : > { %v1179_v15 = vadd.f32 1e-05, %v1147_v59  ;;  %v1303_v27 = vpack.c.bf16 %v1263_v18, %v1261_v11  ;;  %v1302_v49 = vpack.c.bf16 %v1262_v12, %v1260_v7  ;;  %v2866_v34 = vpop.eup %2865 }
 0x35f   : > { %v1265_v53 = vmul.f32 %v2866_v34, %v4718_v9  ;;  %v1264_v29 = vmul.f32 %v2866_v34, %v4719_v5 }
 0x360   : > { %2871 = vrsqrt.f32 %v1179_v15  ;;  %1567 = vmatprep.mubr.bf16.mxu1 %v1303_v27  ;;  %v1110_v17 = vpop.xlane.xlu0 %1109 }
 0x361   : > { %v1148_v2 = vmul.f32 0.00390625, %v1110_v17  ;;  %1568 = vmatmul.mubr.bf16.gmra.mrb[60].mxu1 %v1302_v49 }
 0x362   : > { %v2868_v54 = vpop.eup %2867 }
 0x363   : > { %v1180_v40 = vadd.f32 1e-05, %v1148_v2  ;;  %v1113_v25 = vpop.xlane.xlu1 %1112  ;;  %v1267_v35 = vmul.f32 %v2868_v54, %v4007_v10  ;;  %v1266_v31 = vmul.f32 %v2868_v54, %v4004_v43 }
 0x364   : > { %v1149_v26 = vmul.f32 0.00390625, %v1113_v25 }
 0x365   : > { %v1305_v60 = vpack.c.bf16 %v1267_v35, %v1265_v53  ;;  %v1304_v61 = vpack.c.bf16 %v1266_v31, %v1264_v29  ;;  %2873 = vrsqrt.f32 %v1180_v40 }
 0x366   : > { %v1181_v38 = vadd.f32 1e-05, %v1149_v26 }
 0x367   : > { %v2870_v14 = vpop.eup %2869  ;;  %1575 = vmatprep.mubr.bf16.mxu1 %v1305_v60 }
 0x368   : > { %2875 = vrsqrt.f32 %v1181_v38  ;;  %v1116_v37 = vpop.xlane.xlu0 %1115  ;;  %v1269_v50 = vmul.f32 %v2870_v14, %v4020_v3  ;;  %v1268_v43 = vmul.f32 %v2870_v14, %v4017_v22 }
 0x369   : > { %v1150_v21 = vmul.f32 0.00390625, %v1116_v37  ;;  %1576 = vmatmul.mubr.bf16.gmra.mrb[64].mxu1 %v1304_v61 }
 0x36a   : > { %v2872_v52 = vpop.eup %2871 }
 0x36b   : > { %v1182_v30 = vadd.f32 1e-05, %v1150_v21  ;;  %v1119_v10 = vpop.xlane.xlu1 %1118  ;;  %v1271_v58 = vmul.f32 %v2872_v52, %v4030_v39  ;;  %v1270_v13 = vmul.f32 %v2872_v52, %v4027_v1 }
 0x36c   : > { %v1151_v24 = vmul.f32 0.00390625, %v1119_v10 }
 0x36d   : > { %v1307_v16 = vpack.c.bf16 %v1271_v58, %v1269_v50  ;;  %v1306_v41 = vpack.c.bf16 %v1270_v13, %v1268_v43  ;;  %2877 = vrsqrt.f32 %v1182_v30 }
 0x36e   : > { %v1183_v0 = vadd.f32 1e-05, %v1151_v24 }
 0x36f   : > { %1583 = vmatprep.mubr.bf16.mxu1 %v1307_v16  ;;  %v2874_v19 = vpop.eup %2873 }
 0x370   : > { %2879 = vrsqrt.f32 %v1183_v0  ;;  %v1273_v3 = vmul.f32 %v2874_v19, %v4044_v46  ;;  %v1272_v39 = vmul.f32 %v2874_v19, %v4041_v48 }
 0x371   : > { %1584 = vmatmul.mubr.bf16.gmra.mrb[68].mxu1 %v1306_v41 }
 0x372   : > { %v2876_v57 = vpop.eup %2875 }
 0x373   : > { %v1275_v44 = vmul.f32 %v2876_v57, %v4054_v63  ;;  %v1274_v22 = vmul.f32 %v2876_v57, %v4051_v4  ;;  %v4139_v4 = vld [vmem:[%s4589_s4 + $0x2] ss:$0 sm:$0xff] }
 0x375   : > { %v1309_v56 = vpack.c.bf16 %v1275_v44, %v1273_v3  ;;  %v1308_v1 = vpack.c.bf16 %v1274_v22, %v1272_v39 }
 0x377   : > { %1591 = vmatprep.mubr.bf16.mxu1 %v1309_v56  ;;  %v2878_v32 = vpop.eup %2877 }
 0x378   : > { %v1277_v6 = vmul.f32 %v2878_v32, %v4068_v51  ;;  %v1276_v47 = vmul.f32 %v2878_v32, %v4065_v23 }
 0x379   : > { %1592 = vmatmul.mubr.bf16.gmra.mrb[72].mxu1 %v1308_v1 }
 0x37a   : > { %v2880_v55 = vpop.eup %2879 }
 0x37b   : > { %v1279_v45 = vmul.f32 %v2880_v55, %v4078_v42  ;;  %v1278_v46 = vmul.f32 %v2880_v55, %v4075_v28 }
 0x37d   : > { %v1311_v33 = vpack.c.bf16 %v1279_v45, %v1277_v6  ;;  %v1310_v63 = vpack.c.bf16 %v1278_v46, %v1276_v47 }
 0x37f   : > { %1599 = vmatprep.mubr.bf16.mxu1 %v1311_v33 }
 0x381   : > { %1600 = vmatmul.mubr.bf16.gmra.mrb[76].mxu1 %v1310_v63 }
 0x399   : > { %v2501_v48 = vpop.f32.mrb[16].mxu1 }
 0x39a   : > { %v2502_v20 = vpop.f32.mrb[17].mxu1 }
 0x39b   : > { %v2503_v11 = vadd.f32 %v2502_v20, %v2501_v48  ;;  %v2504_v59 = vpop.f32.mrb[18].mxu1 }
 0x39c   : > { %v2505_v51 = vpop.f32.mrb[19].mxu1 }
 0x39d   : > { %v1482_v42 = vadd.f32 %v2503_v11, %v4139_v4  ;;  %v2506_v8 = vadd.f32 %v2505_v51, %v2504_v59 }
 0x39f   : > { %v1485_v23 = vadd.f32 %v2506_v8, %v4139_v4  ;;  %v1608_v28 = vmul.f32 0.01, %v1482_v42 }
 0x3a1   : > { %v2507_v18 = vpop.f32.mrb[20].mxu1  ;;  %v4143_v36 = vmax.f32 %v1482_v42, %v1608_v28  ;;  %v1609_v7 = vmul.f32 0.01, %v1485_v23 }
 0x3a2   : > { %v2508_v62 = vpop.f32.mrb[21].mxu1 }
 0x3a3   : > { %v2509_v12 = vadd.f32 %v2508_v62, %v2507_v18  ;;  %v2510_v15 = vpop.f32.mrb[22].mxu1  ;;  %1672 = vadd.xlane.f32.xlu0 %v4143_v36  ;;  %v4146_v27 = vmax.f32 %v1485_v23, %v1609_v7 }
 0x3a4   : > { %v2511_v49 = vpop.f32.mrb[23].mxu1 }
 0x3a5   : > { %v1490_v34 = vadd.f32 %v2509_v12, %v4139_v4  ;;  %v2512_v17 = vadd.f32 %v2511_v49, %v2510_v15  ;;  %1674 = vadd.xlane.f32.xlu1 %v4146_v27 }
 0x3a7   : > { %v1493_v2 = vadd.f32 %v2512_v17, %v4139_v4  ;;  %v1610_v54 = vmul.f32 0.01, %v1490_v34 }
 0x3a9   : > { %v2513_v9 = vpop.f32.mrb[24].mxu1  ;;  %v4151_v53 = vmax.f32 %v1490_v34, %v1610_v54  ;;  %v1611_v40 = vmul.f32 0.01, %v1493_v2 }
 0x3aa   : > { %v2514_v25 = vpop.f32.mrb[25].mxu1 }
 0x3ab   : > { %v2515_v35 = vadd.f32 %v2514_v25, %v2513_v9  ;;  %v2516_v5 = vpop.f32.mrb[26].mxu1  ;;  %1676 = vadd.xlane.f32.xlu0 %v4151_v53  ;;  %v4154_v29 = vmax.f32 %v1493_v2, %v1611_v40 }
 0x3ac   : > { %v2517_v31 = vpop.f32.mrb[27].mxu1 }
 0x3ad   : > { %v1498_v26 = vadd.f32 %v2515_v35, %v4139_v4  ;;  %v2518_v60 = vadd.f32 %v2517_v31, %v2516_v5  ;;  %1678 = vadd.xlane.f32.xlu1 %v4154_v29 }
 0x3af   : > { %v1501_v61 = vadd.f32 %v2518_v60, %v4139_v4  ;;  %v1612_v38 = vmul.f32 0.01, %v1498_v26 }
 0x3b1   : > { %v2519_v14 = vpop.f32.mrb[28].mxu1  ;;  %v4159_v37 = vmax.f32 %v1498_v26, %v1612_v38  ;;  %v1613_v21 = vmul.f32 0.01, %v1501_v61 }
 0x3b2   : > { %v2520_v52 = vpop.f32.mrb[29].mxu1 }
 0x3b3   : > { %v2521_v50 = vadd.f32 %v2520_v52, %v2519_v14  ;;  %v2522_v30 = vpop.f32.mrb[30].mxu1  ;;  %1680 = vadd.xlane.f32.xlu0 %v4159_v37  ;;  %v4162_v10 = vmax.f32 %v1501_v61, %v1613_v21 }
 0x3b4   : > { %v2523_v58 = vpop.f32.mrb[31].mxu1 }
 0x3b5   : > { %v1506_v43 = vadd.f32 %v2521_v50, %v4139_v4  ;;  %v2524_v13 = vadd.f32 %v2523_v58, %v2522_v30  ;;  %1682 = vadd.xlane.f32.xlu1 %v4162_v10 }
 0x3b7   : > { %v1509_v24 = vadd.f32 %v2524_v13, %v4139_v4  ;;  %v1614_v16 = vmul.f32 0.01, %v1506_v43 }
 0x3b9   : > { %v2525_v41 = vpop.f32.mrb[32].mxu1  ;;  %v4167_v0 = vmax.f32 %v1506_v43, %v1614_v16  ;;  %v1615_v19 = vmul.f32 0.01, %v1509_v24 }
 0x3ba   : > { %v2526_v57 = vpop.f32.mrb[33].mxu1 }
 0x3bb   : > { %v2527_v3 = vadd.f32 %v2526_v57, %v2525_v41  ;;  %v2528_v44 = vpop.f32.mrb[34].mxu1  ;;  %1684 = vadd.xlane.f32.xlu0 %v4167_v0  ;;  %v4170_v39 = vmax.f32 %v1509_v24, %v1615_v19 }
 0x3bc   : > { %v2529_v22 = vpop.f32.mrb[35].mxu1 }
 0x3bd   : > { %v1514_v56 = vadd.f32 %v2527_v3, %v4139_v4  ;;  %v2530_v1 = vadd.f32 %v2529_v22, %v2528_v44  ;;  %1686 = vadd.xlane.f32.xlu1 %v4170_v39 }
 0x3bf   : > { %v1517_v32 = vadd.f32 %v2530_v1, %v4139_v4  ;;  %v1616_v55 = vmul.f32 0.01, %v1514_v56 }
 0x3c1   : > { %v2531_v6 = vpop.f32.mrb[36].mxu1  ;;  %v4175_v45 = vmax.f32 %v1514_v56, %v1616_v55  ;;  %v1617_v47 = vmul.f32 0.01, %v1517_v32 }
 0x3c2   : > { %v2532_v46 = vpop.f32.mrb[37].mxu1 }
 0x3c3   : > { %v2533_v33 = vadd.f32 %v2532_v46, %v2531_v6  ;;  %1688 = vadd.xlane.f32.xlu0 %v4175_v45  ;;  %v2534_v63 = vpop.f32.mrb[38].mxu1  ;;  %v4178_v48 = vmax.f32 %v1517_v32, %v1617_v47 }
 0x3c4   : > { %v2535_v20 = vpop.f32.mrb[39].mxu1 }
 0x3c5   : > { %v1522_v11 = vadd.f32 %v2533_v33, %v4139_v4  ;;  %v2536_v59 = vadd.f32 %v2535_v20, %v2534_v63  ;;  %1690 = vadd.xlane.f32.xlu1 %v4178_v48 }
 0x3c7   : > { %v1525_v51 = vadd.f32 %v2536_v59, %v4139_v4  ;;  %v1618_v42 = vmul.f32 0.01, %v1522_v11 }
 0x3c9   : > { %v2537_v8 = vpop.f32.mrb[40].mxu1  ;;  %v4183_v23 = vmax.f32 %v1522_v11, %v1618_v42  ;;  %v1619_v28 = vmul.f32 0.01, %v1525_v51 }
 0x3ca   : > { %v2538_v18 = vpop.f32.mrb[41].mxu1 }
 0x3cb   : > { %v2539_v7 = vadd.f32 %v2538_v18, %v2537_v8  ;;  %1692 = vadd.xlane.f32.xlu0 %v4183_v23  ;;  %v2540_v62 = vpop.f32.mrb[42].mxu1  ;;  %v4186_v12 = vmax.f32 %v1525_v51, %v1619_v28 }
 0x3cc   : > { %v2541_v15 = vpop.f32.mrb[43].mxu1 }
 0x3cd   : > { %v1530_v49 = vadd.f32 %v2539_v7, %v4139_v4  ;;  %v2542_v34 = vadd.f32 %v2541_v15, %v2540_v62  ;;  %1694 = vadd.xlane.f32.xlu1 %v4186_v12 }
 0x3cf   : > { %v1533_v17 = vadd.f32 %v2542_v34, %v4139_v4  ;;  %v1620_v2 = vmul.f32 0.01, %v1530_v49 }
 0x3d1   : > { %v2543_v54 = vpop.f32.mrb[44].mxu1  ;;  %v4191_v9 = vmax.f32 %v1530_v49, %v1620_v2  ;;  %v1621_v40 = vmul.f32 0.01, %v1533_v17 }
 0x3d2   : > { %v2544_v25 = vpop.f32.mrb[45].mxu1 }
 0x3d3   : > { %v2545_v35 = vadd.f32 %v2544_v25, %v2543_v54  ;;  %1696 = vadd.xlane.f32.xlu0 %v4191_v9  ;;  %v2546_v5 = vpop.f32.mrb[46].mxu1  ;;  %v4194_v31 = vmax.f32 %v1533_v17, %v1621_v40 }
 0x3d4   : > { %v2547_v26 = vpop.f32.mrb[47].mxu1 }
 0x3d5   : > { %v1538_v60 = vadd.f32 %v2545_v35, %v4139_v4  ;;  %v2548_v61 = vadd.f32 %v2547_v26, %v2546_v5  ;;  %1698 = vadd.xlane.f32.xlu1 %v4194_v31 }
 0x3d7   : > { %v1541_v38 = vadd.f32 %v2548_v61, %v4139_v4  ;;  %v1622_v14 = vmul.f32 0.01, %v1538_v60 }
 0x3d9   : > { %v2549_v21 = vpop.f32.mrb[48].mxu1  ;;  %v4199_v52 = vmax.f32 %v1538_v60, %v1622_v14  ;;  %v1623_v50 = vmul.f32 0.01, %v1541_v38 }
 0x3da   : > { %v2550_v30 = vpop.f32.mrb[49].mxu1 }
 0x3db   : > { %v2551_v58 = vadd.f32 %v2550_v30, %v2549_v21  ;;  %1700 = vadd.xlane.f32.xlu0 %v4199_v52  ;;  %v2552_v43 = vpop.f32.mrb[50].mxu1  ;;  %v4202_v13 = vmax.f32 %v1541_v38, %v1623_v50 }
 0x3dc   : > { %v2553_v24 = vpop.f32.mrb[51].mxu1 }
 0x3dd   : > { %v1546_v16 = vadd.f32 %v2551_v58, %v4139_v4  ;;  %v2554_v41 = vadd.f32 %v2553_v24, %v2552_v43  ;;  %1702 = vadd.xlane.f32.xlu1 %v4202_v13 }
 0x3df   : > { %v1549_v19 = vadd.f32 %v2554_v41, %v4139_v4  ;;  %v1624_v57 = vmul.f32 0.01, %v1546_v16 }
 0x3e1   : > { %v2555_v3 = vpop.f32.mrb[52].mxu1  ;;  %v4207_v44 = vmax.f32 %v1546_v16, %v1624_v57  ;;  %v1625_v22 = vmul.f32 0.01, %v1549_v19 }
 0x3e2   : > { %v2556_v56 = vpop.f32.mrb[53].mxu1 }
 0x3e3   : > { %v2557_v1 = vadd.f32 %v2556_v56, %v2555_v3  ;;  %1704 = vadd.xlane.f32.xlu0 %v4207_v44  ;;  %v2558_v32 = vpop.f32.mrb[54].mxu1  ;;  %v4210_v55 = vmax.f32 %v1549_v19, %v1625_v22 }
 0x3e4   : > { %v2559_v6 = vpop.f32.mrb[55].mxu1 }
 0x3e5   : > { %v1554_v47 = vadd.f32 %v2557_v1, %v4139_v4  ;;  %v2560_v46 = vadd.f32 %v2559_v6, %v2558_v32  ;;  %1706 = vadd.xlane.f32.xlu1 %v4210_v55 }
 0x3e7   : > { %v1557_v33 = vadd.f32 %v2560_v46, %v4139_v4  ;;  %v1626_v63 = vmul.f32 0.01, %v1554_v47 }
 0x3e9   : > { %v2561_v20 = vpop.f32.mrb[56].mxu1  ;;  %v4215_v11 = vmax.f32 %v1554_v47, %v1626_v63  ;;  %v1627_v59 = vmul.f32 0.01, %v1557_v33 }
 0x3ea   : > { %v2562_v51 = vpop.f32.mrb[57].mxu1 }
 0x3eb   : > { %v2563_v42 = vadd.f32 %v2562_v51, %v2561_v20  ;;  %1708 = vadd.xlane.f32.xlu0 %v4215_v11  ;;  %v2564_v8 = vpop.f32.mrb[58].mxu1  ;;  %v4218_v28 = vmax.f32 %v1557_v33, %v1627_v59 }
 0x3ec   : > { %v2565_v18 = vpop.f32.mrb[59].mxu1 }
 0x3ed   : > { %v1562_v7 = vadd.f32 %v2563_v42, %v4139_v4  ;;  %v2566_v62 = vadd.f32 %v2565_v18, %v2564_v8  ;;  %1710 = vadd.xlane.f32.xlu1 %v4218_v28 }
 0x3ef   : > { %v1565_v15 = vadd.f32 %v2566_v62, %v4139_v4  ;;  %v1628_v49 = vmul.f32 0.01, %v1562_v7 }
 0x3f1   : > { %v4223_v34 = vmax.f32 %v1562_v7, %v1628_v49  ;;  %v1629_v17 = vmul.f32 0.01, %v1565_v15 }
 0x3f3   : > { %1712 = vadd.xlane.f32.xlu0 %v4223_v34  ;;  %v4226_v2 = vmax.f32 %v1565_v15, %v1629_v17 }
 0x3f5   : > { %1714 = vadd.xlane.f32.xlu1 %v4226_v2 }
 0x434   : > { %v2567_v54 = vpop.f32.mrb[60].mxu1 }
 0x435   : > { %v2568_v40 = vpop.f32.mrb[61].mxu1 }
 0x436   : > { %v2569_v25 = vadd.f32 %v2568_v40, %v2567_v54  ;;  %v2570_v35 = vpop.f32.mrb[62].mxu1 }
 0x437   : > { %v2571_v5 = vpop.f32.mrb[63].mxu1 }
 0x438   : > { %v1570_v26 = vadd.f32 %v2569_v25, %v4139_v4  ;;  %v2572_v60 = vadd.f32 %v2571_v5, %v2570_v35 }
 0x43a   : > { %v1573_v61 = vadd.f32 %v2572_v60, %v4139_v4  ;;  %v1630_v38 = vmul.f32 0.01, %v1570_v26 }
 0x43c   : > { %v2573_v14 = vpop.f32.mrb[64].mxu1  ;;  %v4231_v21 = vmax.f32 %v1570_v26, %v1630_v38  ;;  %v1631_v50 = vmul.f32 0.01, %v1573_v61 }
 0x43d   : > { %v2574_v30 = vpop.f32.mrb[65].mxu1 }
 0x43e   : > { %v2575_v58 = vadd.f32 %v2574_v30, %v2573_v14  ;;  %1716 = vadd.xlane.f32.xlu0 %v4231_v21  ;;  %v2576_v43 = vpop.f32.mrb[66].mxu1  ;;  %v4234_v24 = vmax.f32 %v1573_v61, %v1631_v50  ;;  %v1673_v61 = vpop.xlane.xlu0 %1672 }
 0x43f   : > { %v2577_v16 = vpop.f32.mrb[67].mxu1 }
 0x440   : > { %v1578_v41 = vadd.f32 %v2575_v58, %v4139_v4  ;;  %v2578_v19 = vadd.f32 %v2577_v16, %v2576_v43  ;;  %1718 = vadd.xlane.f32.xlu1 %v4234_v24  ;;  %v1675_v58 = vpop.xlane.xlu1 %1674  ;;  %v1737_v16 = vmul.f32 0.0078125, %v1673_v61 }
 0x442   : > { %v1581_v57 = vadd.f32 %v2578_v19, %v4139_v4  ;;  %v1632_v3 = vmul.f32 0.01, %v1578_v41 }
 0x444   : > { %v2579_v22 = vpop.f32.mrb[68].mxu1  ;;  %v4239_v56 = vmax.f32 %v1578_v41, %v1632_v3  ;;  %v1633_v1 = vmul.f32 0.01, %v1581_v57  ;;  %v1738_v3 = vmul.f32 0.0078125, %v1675_v58 }
 0x445   : > { %v2580_v32 = vpop.f32.mrb[69].mxu1 }
 0x446   : > { %v2581_v6 = vadd.f32 %v2580_v32, %v2579_v22  ;;  %1720 = vadd.xlane.f32.xlu0 %v4239_v56  ;;  %v2582_v47 = vpop.f32.mrb[70].mxu1  ;;  %v4242_v46 = vmax.f32 %v1581_v57, %v1633_v1  ;;  %v1677_v57 = vpop.xlane.xlu0 %1676 }
 0x447   : > { %v2583_v33 = vpop.f32.mrb[71].mxu1  ;;  %v1679_v32 = vpop.xlane.xlu1 %1678 }
 0x448   : > { %v1586_v63 = vadd.f32 %v2581_v6, %v4139_v4  ;;  %v2584_v20 = vadd.f32 %v2583_v33, %v2582_v47  ;;  %1722 = vadd.xlane.f32.xlu1 %v4242_v46  ;;  %v4264_v6 = vsub.f32 %v4143_v36, %v1737_v16  ;;  %v1739_v47 = vmul.f32 0.0078125, %v1677_v57 }
 0x44a   : > { %v1589_v59 = vadd.f32 %v2584_v20, %v4139_v4  ;;  %v1634_v51 = vmul.f32 0.01, %v1586_v63  ;;  %v1681_v20 = vpop.xlane.xlu0 %1680  ;;  %v1801_v36 = vmul.f32 %v4264_v6, %v4264_v6 }
 0x44c   : > { %v2585_v42 = vpop.f32.mrb[72].mxu1  ;;  %v4247_v8 = vmax.f32 %v1586_v63, %v1634_v51  ;;  %v1635_v18 = vmul.f32 0.01, %v1589_v59  ;;  %v1740_v51 = vmul.f32 0.0078125, %v1679_v32 }
 0x44d   : > { %v2586_v7 = vpop.f32.mrb[73].mxu1 }
 0x44e   : > { %v2587_v62 = vadd.f32 %v2586_v7, %v2585_v42  ;;  %1724 = vadd.xlane.f32.xlu0 %v4247_v8  ;;  %v2588_v15 = vpop.f32.mrb[74].mxu1  ;;  %v4250_v49 = vmax.f32 %v1589_v59, %v1635_v18  ;;  %v4269_v59 = vsub.f32 %v4146_v27, %v1738_v3  ;;  %v1683_v18 = vpop.xlane.xlu1 %1682  ;;  %v1741_v7 = vmul.f32 0.0078125, %v1681_v20 }
 0x44f   : > { %v2589_v17 = vpop.f32.mrb[75].mxu1  ;;  %v1742_v27 = vmul.f32 0.0078125, %v1683_v18 }
 0x450   : > { %v1594_v54 = vadd.f32 %v2587_v62, %v4139_v4  ;;  %v2590_v40 = vadd.f32 %v2589_v17, %v2588_v15  ;;  %1726 = vadd.xlane.f32.xlu1 %v4250_v49  ;;  %v1685_v62 = vpop.xlane.xlu0 %1684  ;;  %v4281_v15 = vsub.f32 %v4154_v29, %v1740_v51  ;;  %v1802_v17 = vmul.f32 %v4269_v59, %v4269_v59 }
 0x452   : > { %v1597_v25 = vadd.f32 %v2590_v40, %v4139_v4  ;;  %v1636_v35 = vmul.f32 0.01, %v1594_v54  ;;  %v4286_v40 = vsub.f32 %v4159_v37, %v1741_v7 }
 0x454   : > { %v2591_v5 = vpop.f32.mrb[76].mxu1  ;;  %v4255_v26 = vmax.f32 %v1594_v54, %v1636_v35  ;;  %v1637_v60 = vmul.f32 0.01, %v1597_v25  ;;  %v1687_v54 = vpop.xlane.xlu1 %1686 }
 0x455   : > { %v2592_v38 = vpop.f32.mrb[77].mxu1  ;;  %v1689_v35 = vpop.xlane.xlu0 %1688  ;;  %v1744_v29 = vmul.f32 0.0078125, %v1687_v54 }
 0x456   : > { %v2593_v14 = vadd.f32 %v2592_v38, %v2591_v5  ;;  %1728 = vadd.xlane.f32.xlu0 %v4255_v26  ;;  %v2594_v50 = vpop.f32.mrb[78].mxu1  ;;  %v4258_v30 = vmax.f32 %v1597_v25, %v1637_v60  ;;  %v4291_v5 = vsub.f32 %v4162_v10, %v1742_v27  ;;  %v1804_v60 = vmul.f32 %v4281_v15, %v4281_v15  ;;  %v2809_v38 = vld [vmem:[#allocation8] sm:$0xff]   ;;  %v2812_v27 = vld [vmem:[#allocation8 + $0x18] sm:$0xff]  }
 0x457   : > { %v2595_v43 = vpop.f32.mrb[79].mxu1  ;;  %v1745_v37 = vmul.f32 0.0078125, %v1689_v35  ;;  %2621 = vmatprep.subr.bf16.mxu0 %v2809_v38  ;;  %v4301_v10 = vsub.f32 %v4170_v39, %v1744_v29 }
 0x458   : > { %v1602_v41 = vadd.f32 %v2593_v14, %v4139_v4  ;;  %v2596_v19 = vadd.f32 %v2595_v43, %v2594_v50  ;;  %1730 = vadd.xlane.f32.xlu1 %v4258_v30  ;;  %v1691_v61 = vpop.xlane.xlu1 %1690  ;;  %v1805_v50 = vmul.f32 %v4286_v40, %v4286_v40  ;;  %v1806_v16 = vmul.f32 %v4291_v5, %v4291_v5 }
 0x459   : > { %v1693_v58 = vpop.xlane.xlu0 %1692  ;;  %v1746_v43 = vmul.f32 0.0078125, %v1691_v61  ;;  %2622 = vmatpush3.bf16.msra.mxu0 %v2809_v38  ;;  %v1808_v32 = vmul.f32 %v4301_v10, %v4301_v10 }
 0x45a   : > { %v1605_v22 = vadd.f32 %v2596_v19, %v4139_v4  ;;  %v1638_v1 = vmul.f32 0.01, %v1602_v41  ;;  %v4275_v4 = vsub.f32 %v4151_v53, %v1739_v47  ;;  %v1743_v53 = vmul.f32 0.0078125, %v1685_v62  ;;  %v2810_v19 = vld [vmem:[#allocation8 + $0x8] sm:$0xff]  }
 0x45b   : > { %v1747_v57 = vmul.f32 0.0078125, %v1693_v58  ;;  %2623 = vmatprep.subr.bf16.mxu0 %v2810_v19  ;;  %v4311_v39 = vsub.f32 %v4178_v48, %v1746_v43 }
 0x45c   : > { %v4266_v33 = vmax.f32 %v1602_v41, %v1638_v1  ;;  %v1639_v63 = vmul.f32 0.01, %v1605_v22  ;;  %v1803_v25 = vmul.f32 %v4275_v4, %v4275_v4  ;;  %v4296_v14 = vsub.f32 %v4167_v0, %v1743_v53  ;;  %v1695_v41 = vpop.xlane.xlu1 %1694 }
 0x45d   : > { %v4306_v0 = vsub.f32 %v4175_v45, %v1745_v37  ;;  %v1748_v1 = vmul.f32 0.0078125, %v1695_v41  ;;  %2624 = vmatpush3.bf16.msra.mxu0 %v2810_v19  ;;  %v4316_v45 = vsub.f32 %v4183_v23, %v1747_v57 }
 0x45e   : > { %1732 = vadd.xlane.f32.xlu0 %v4266_v33  ;;  %v4272_v42 = vmax.f32 %v1605_v22, %v1639_v63  ;;  %v1807_v3 = vmul.f32 %v4296_v14, %v4296_v14  ;;  %v2811_v63 = vld [vmem:[#allocation8 + $0x10] sm:$0xff]  }
 0x45f   : > { %v1809_v51 = vmul.f32 %v4306_v0, %v4306_v0  ;;  %2625 = vmatprep.subr.bf16.mxu0 %v2811_v63  ;;  %v4321_v48 = vsub.f32 %v4186_v12, %v1748_v1  ;;  %v1811_v54 = vmul.f32 %v4316_v45, %v4316_v45 }
 0x460   : > { %1734 = vadd.xlane.f32.xlu1 %v4272_v42  ;;  %v1697_v22 = vpop.xlane.xlu0 %1696 }
 0x461   : > { %v1749_v20 = vmul.f32 0.0078125, %v1697_v22  ;;  %2626 = vmatpush3.bf16.msra.mxu0 %v2811_v63  ;;  %v1812_v35 = vmul.f32 %v4321_v48, %v4321_v48  ;;  %v2815_v22 = vld [vmem:[#allocation8 + $0x30] sm:$0xff]  }
 0x462   : > { %1833 = vadd.xlane.f32.xlu0 %v1801_v36  ;;  %v1699_v47 = vpop.xlane.xlu1 %1698  ;;  %v1810_v36 = vmul.f32 %v4311_v39, %v4311_v39  ;;  %2627 = vmatprep.subr.bf16.mxu0 %v2812_v27 }
 0x463   : > { %v1750_v7 = vmul.f32 0.0078125, %v1699_v47  ;;  %v4326_v23 = vsub.f32 %v4191_v9, %v1749_v20 }
 0x464   : > { %1835 = vadd.xlane.f32.xlu1 %v1802_v17 }
 0x465   : > { %v4331_v12 = vsub.f32 %v4194_v31, %v1750_v7  ;;  %2628 = vmatpush3.bf16.msra.mxu0 %v2812_v27  ;;  %v1813_v38 = vmul.f32 %v4326_v23, %v4326_v23 }
 0x466   : > { %1837 = vadd.xlane.f32.xlu0 %v1803_v25 }
 0x467   : > { %v1814_v58 = vmul.f32 %v4331_v12, %v4331_v12 }
 0x468   : > { %1839 = vadd.xlane.f32.xlu1 %v1804_v60  ;;  %v1701_v18 = vpop.xlane.xlu0 %1700  ;;  %v2813_v60 = vld [vmem:[#allocation8 + $0x20] sm:$0xff]  }
 0x469   : > { %v1751_v17 = vmul.f32 0.0078125, %v1701_v18  ;;  %2629 = vmatprep.subr.bf16.mxu0 %v2813_v60  ;;  %v2816_v18 = vld [vmem:[#allocation8 + $0x38] sm:$0xff]  }
 0x46a   : > { %1841 = vadd.xlane.f32.xlu0 %v1805_v50  ;;  %v1703_v62 = vpop.xlane.xlu1 %1702  ;;  %2630 = vmatpush3.bf16.msra.mxu0 %v2813_v60 }
 0x46b   : > { %v1752_v25 = vmul.f32 0.0078125, %v1703_v62  ;;  %v4336_v9 = vsub.f32 %v4199_v52, %v1751_v17 }
 0x46c   : > { %1843 = vadd.xlane.f32.xlu1 %v1806_v16  ;;  %v2814_v16 = vld [vmem:[#allocation8 + $0x28] sm:$0xff]  }
 0x46d   : > { %v4341_v31 = vsub.f32 %v4202_v13, %v1752_v25  ;;  %v1815_v19 = vmul.f32 %v4336_v9, %v4336_v9  ;;  %2631 = vmatprep.subr.bf16.mxu0 %v2814_v16 }
 0x46e   : > { %1845 = vadd.xlane.f32.xlu0 %v1807_v3  ;;  %2632 = vmatpush3.bf16.msra.mxu0 %v2814_v16 }
 0x46f   : > { %v1816_v3 = vmul.f32 %v4341_v31, %v4341_v31  ;;  %2633 = vmatprep.subr.bf16.mxu0 %v2815_v22 }
 0x470   : > { %1847 = vadd.xlane.f32.xlu1 %v1808_v32  ;;  %v1705_v53 = vpop.xlane.xlu0 %1704 }
 0x471   : > { %v1753_v61 = vmul.f32 0.0078125, %v1705_v53 }
 0x472   : > { %1849 = vadd.xlane.f32.xlu0 %v1809_v51  ;;  %v1707_v29 = vpop.xlane.xlu1 %1706  ;;  %2634 = vmatpush3.bf16.msra.mxu0 %v2815_v22 }
 0x473   : > { %v1754_v50 = vmul.f32 0.0078125, %v1707_v29  ;;  %v4346_v52 = vsub.f32 %v4207_v44, %v1753_v61  ;;  %2635 = vmatprep.subr.bf16.mxu0 %v2816_v18 }
 0x474   : > { %1851 = vadd.xlane.f32.xlu1 %v1810_v36 }
 0x475   : > { %v4351_v13 = vsub.f32 %v4210_v55, %v1754_v50  ;;  %v1817_v32 = vmul.f32 %v4346_v52, %v4346_v52 }
 0x476   : > { %1853 = vadd.xlane.f32.xlu0 %v1811_v54  ;;  %2636 = vmatpush3.bf16.msra.mxu0 %v2816_v18 }
 0x477   : > { %v1818_v20 = vmul.f32 %v4351_v13, %v4351_v13 }
 0x478   : > { %1855 = vadd.xlane.f32.xlu1 %v1812_v35  ;;  %v1709_v37 = vpop.xlane.xlu0 %1708 }
 0x479   : > { %v1755_v41 = vmul.f32 0.0078125, %v1709_v37 }
 0x47a   : > { %1857 = vadd.xlane.f32.xlu0 %v1813_v38  ;;  %v1711_v43 = vpop.xlane.xlu1 %1710 }
 0x47b   : > { %v1756_v57 = vmul.f32 0.0078125, %v1711_v43  ;;  %v4356_v1 = vsub.f32 %v4215_v11, %v1755_v41 }
 0x47c   : > { %1859 = vadd.xlane.f32.xlu1 %v1814_v58 }
 0x47d   : > { %v4361_v55 = vsub.f32 %v4218_v28, %v1756_v57  ;;  %v1819_v7 = vmul.f32 %v4356_v1, %v4356_v1 }
 0x47e   : > { %1861 = vadd.xlane.f32.xlu0 %v1815_v19 }
 0x47f   : > { %v1820_v28 = vmul.f32 %v4361_v55, %v4361_v55 }
 0x480   : > { %1863 = vadd.xlane.f32.xlu1 %v1816_v3  ;;  %v1713_v44 = vpop.xlane.xlu0 %1712 }
 0x481   : > { %v1757_v47 = vmul.f32 0.0078125, %v1713_v44 }
 0x482   : > { %1865 = vadd.xlane.f32.xlu0 %v1817_v32  ;;  %v1715_v63 = vpop.xlane.xlu1 %1714 }
 0x483   : > { %v1758_v51 = vmul.f32 0.0078125, %v1715_v63  ;;  %v4366_v11 = vsub.f32 %v4223_v34, %v1757_v47 }
 0x484   : > { %1867 = vadd.xlane.f32.xlu1 %v1818_v20 }
 0x485   : > { %v4371_v36 = vsub.f32 %v4226_v2, %v1758_v51  ;;  %v1821_v62 = vmul.f32 %v4366_v11, %v4366_v11 }
 0x486   : > { %1869 = vadd.xlane.f32.xlu0 %v1819_v7 }
 0x487   : > { %v1822_v34 = vmul.f32 %v4371_v36, %v4371_v36 }
 0x488   : > { %1871 = vadd.xlane.f32.xlu1 %v1820_v28 }
 0x48a   : > { %1873 = vadd.xlane.f32.xlu0 %v1821_v62 }
 0x48c   : > { %1875 = vadd.xlane.f32.xlu1 %v1822_v34 }
 0x4cb   : > { %v1717_v27 = vpop.xlane.xlu0 %1716 }
 0x4cc   : > { %v1759_v17 = vmul.f32 0.0078125, %v1717_v27 }
 0x4cd   : > { %v1719_v54 = vpop.xlane.xlu1 %1718 }
 0x4ce   : > { %v4380_v2 = vsub.f32 %v4231_v21, %v1759_v17  ;;  %v1760_v53 = vmul.f32 0.0078125, %v1719_v54 }
 0x4d0   : > { %v4383_v25 = vsub.f32 %v4234_v24, %v1760_v53  ;;  %v1823_v35 = vmul.f32 %v4380_v2, %v4380_v2 }
 0x4d2   : > { %1877 = vadd.xlane.f32.xlu0 %v1823_v35  ;;  %v1824_v29 = vmul.f32 %v4383_v25, %v4383_v25 }
 0x4d3   : > { %v1721_v60 = vpop.xlane.xlu0 %1720 }
 0x4d4   : > { %v1761_v61 = vmul.f32 0.0078125, %v1721_v60  ;;  %1879 = vadd.xlane.f32.xlu1 %v1824_v29 }
 0x4d5   : > { %v1723_v38 = vpop.xlane.xlu1 %1722 }
 0x4d6   : > { %v4390_v37 = vsub.f32 %v4239_v56, %v1761_v61  ;;  %v1762_v21 = vmul.f32 0.0078125, %v1723_v38 }
 0x4d8   : > { %v4393_v50 = vsub.f32 %v4242_v46, %v1762_v21  ;;  %v1825_v24 = vmul.f32 %v4390_v37, %v4390_v37 }
 0x4da   : > { %1881 = vadd.xlane.f32.xlu0 %v1825_v24  ;;  %v1826_v58 = vmul.f32 %v4393_v50, %v4393_v50 }
 0x4db   : > { %v1725_v43 = vpop.xlane.xlu0 %1724 }
 0x4dc   : > { %v1763_v16 = vmul.f32 0.0078125, %v1725_v43  ;;  %1883 = vadd.xlane.f32.xlu1 %v1826_v58 }
 0x4dd   : > { %v1727_v41 = vpop.xlane.xlu1 %1726 }
 0x4de   : > { %v4400_v19 = vsub.f32 %v4247_v8, %v1763_v16  ;;  %v1764_v56 = vmul.f32 0.0078125, %v1727_v41 }
 0x4e0   : > { %v4403_v57 = vsub.f32 %v4250_v49, %v1764_v56  ;;  %v1827_v46 = vmul.f32 %v4400_v19, %v4400_v19 }
 0x4e2   : > { %1885 = vadd.xlane.f32.xlu0 %v1827_v46  ;;  %v1828_v3 = vmul.f32 %v4403_v57, %v4403_v57 }
 0x4e3   : > { %v1729_v22 = vpop.xlane.xlu0 %1728 }
 0x4e4   : > { %v1765_v44 = vmul.f32 0.0078125, %v1729_v22  ;;  %1887 = vadd.xlane.f32.xlu1 %v1828_v3 }
 0x4e5   : > { %v1731_v32 = vpop.xlane.xlu1 %1730 }
 0x4e6   : > { %v4410_v47 = vsub.f32 %v4255_v26, %v1765_v44  ;;  %v1766_v8 = vmul.f32 0.0078125, %v1731_v32 }
 0x4e8   : > { %v4413_v63 = vsub.f32 %v4258_v30, %v1766_v8  ;;  %v1829_v49 = vmul.f32 %v4410_v47, %v4410_v47 }
 0x4ea   : > { %1889 = vadd.xlane.f32.xlu0 %v1829_v49  ;;  %v1830_v20 = vmul.f32 %v4413_v63, %v4413_v63 }
 0x4eb   : > { %v1733_v51 = vpop.xlane.xlu0 %1732 }
 0x4ec   : > { %v1767_v18 = vmul.f32 0.0078125, %v1733_v51  ;;  %1891 = vadd.xlane.f32.xlu1 %v1830_v20 }
 0x4ed   : > { %v1735_v7 = vpop.xlane.xlu1 %1734 }
 0x4ee   : > { %v4420_v28 = vsub.f32 %v4266_v33, %v1767_v18  ;;  %v1768_v26 = vmul.f32 0.0078125, %v1735_v7 }
 0x4ef   : > { %v1834_v62 = vpop.xlane.xlu0 %1833 }
 0x4f0   : > { %v4423_v34 = vsub.f32 %v4272_v42, %v1768_v26  ;;  %v1897_v30 = vmul.f32 0.0078125, %v1834_v62  ;;  %v1831_v27 = vmul.f32 %v4420_v28, %v4420_v28 }
 0x4f1   : > { %v1836_v17 = vpop.xlane.xlu1 %1835 }
 0x4f2   : > { %v1929_v54 = vadd.f32 1e-05, %v1897_v30  ;;  %v1898_v53 = vmul.f32 0.0078125, %v1836_v17  ;;  %1893 = vadd.xlane.f32.xlu0 %v1831_v27  ;;  %v1832_v35 = vmul.f32 %v4423_v34, %v4423_v34 }
 0x4f3   : > { %v1838_v29 = vpop.xlane.xlu0 %1837 }
 0x4f4   : > { %2881 = vrsqrt.f32 %v1929_v54  ;;  %v1930_v33 = vadd.f32 1e-05, %v1898_v53  ;;  %v1899_v60 = vmul.f32 0.0078125, %v1838_v29  ;;  %1895 = vadd.xlane.f32.xlu1 %v1832_v35 }
 0x4f5   : > { %v1840_v61 = vpop.xlane.xlu1 %1839 }
 0x4f6   : > { %2883 = vrsqrt.f32 %v1930_v33  ;;  %v1931_v42 = vadd.f32 1e-05, %v1899_v60  ;;  %v1900_v38 = vmul.f32 0.0078125, %v1840_v61 }
 0x4f7   : > { %v1842_v21 = vpop.xlane.xlu0 %1841 }
 0x4f8   : > { %2885 = vrsqrt.f32 %v1931_v42  ;;  %v1932_v24 = vadd.f32 1e-05, %v1900_v38  ;;  %v1901_v58 = vmul.f32 0.0078125, %v1842_v21 }
 0x4f9   : > { %v1844_v43 = vpop.xlane.xlu1 %1843 }
 0x4fa   : > { %2887 = vrsqrt.f32 %v1932_v24  ;;  %v1933_v16 = vadd.f32 1e-05, %v1901_v58  ;;  %v1902_v41 = vmul.f32 0.0078125, %v1844_v43 }
 0x4fb   : > { %v1846_v56 = vpop.xlane.xlu0 %1845 }
 0x4fc   : > { %2889 = vrsqrt.f32 %v1933_v16  ;;  %v1934_v46 = vadd.f32 1e-05, %v1902_v41  ;;  %v1903_v3 = vmul.f32 0.0078125, %v1846_v56 }
 0x4fd   : > { %v1848_v22 = vpop.xlane.xlu1 %1847 }
 0x4fe   : > { %v2882_v44 = vpop.eup %2881  ;;  %2891 = vrsqrt.f32 %v1934_v46  ;;  %v1935_v32 = vadd.f32 1e-05, %v1903_v3  ;;  %v1904_v8 = vmul.f32 0.0078125, %v1848_v22 }
 0x4ff   : > { %v1850_v49 = vpop.xlane.xlu0 %1849  ;;  %v1993_v26 = vmul.f32 %v2882_v44, %v4264_v6 }
 0x500   : > { %v2884_v20 = vpop.eup %2883  ;;  %2893 = vrsqrt.f32 %v1935_v32  ;;  %v1936_v51 = vadd.f32 1e-05, %v1904_v8  ;;  %v1905_v18 = vmul.f32 0.0078125, %v1850_v49 }
 0x501   : > { %v1852_v7 = vpop.xlane.xlu1 %1851  ;;  %v1994_v62 = vmul.f32 %v2884_v20, %v4269_v59 }
 0x502   : > { %v2886_v30 = vpop.eup %2885  ;;  %2895 = vrsqrt.f32 %v1936_v51  ;;  %v1937_v27 = vadd.f32 1e-05, %v1905_v18  ;;  %v1906_v17 = vmul.f32 0.0078125, %v1852_v7 }
 0x503   : > { %v1854_v54 = vpop.xlane.xlu0 %1853  ;;  %v2025_v53 = vpack.c.bf16 %v1994_v62, %v1993_v26  ;;  %v1995_v60 = vmul.f32 %v2886_v30, %v4275_v4 }
 0x504   : > { %v2888_v35 = vpop.eup %2887  ;;  %2897 = vrsqrt.f32 %v1937_v27  ;;  %v1938_v29 = vadd.f32 1e-05, %v1906_v17  ;;  %v1907_v33 = vmul.f32 0.0078125, %v1854_v54 }
 0x505   : > { %v1996_v61 = vmul.f32 %v2888_v35, %v4281_v15  ;;  %v1856_v42 = vpop.xlane.xlu1 %1855  ;;  %2637 = vmatprep.mubr.bf16.mxu0 %v2025_v53 }
 0x506   : > { %v2890_v38 = vpop.eup %2889  ;;  %2899 = vrsqrt.f32 %v1938_v29  ;;  %v1939_v6 = vadd.f32 1e-05, %v1907_v33  ;;  %v1908_v59 = vmul.f32 0.0078125, %v1856_v42 }
 0x507   : > { %v1858_v21 = vpop.xlane.xlu0 %1857  ;;  %v2026_v24 = vpack.c.bf16 %v1996_v61, %v1995_v60  ;;  %v1997_v56 = vmul.f32 %v2890_v38, %v4286_v40 }
 0x508   : > { %v2892_v58 = vpop.eup %2891  ;;  %2901 = vrsqrt.f32 %v1939_v6  ;;  %v1940_v43 = vadd.f32 1e-05, %v1908_v59  ;;  %v1909_v16 = vmul.f32 0.0078125, %v1858_v21 }
 0x509   : > { %v1860_v41 = vpop.xlane.xlu1 %1859  ;;  %2638 = vmatmul.mubr.bf16.vlgmr.msra.gmra.mrb[48].mxu0 %v2026_v24  ;;  %v1998_v4 = vmul.f32 %v2892_v58, %v4291_v5 }
 0x50a   : > { %v2894_v46 = vpop.eup %2893  ;;  %2903 = vrsqrt.f32 %v1940_v43  ;;  %v1941_v15 = vadd.f32 1e-05, %v1909_v16  ;;  %v1910_v3 = vmul.f32 0.0078125, %v1860_v41 }
 0x50b   : > { %v1862_v22 = vpop.xlane.xlu0 %1861  ;;  %v2027_v44 = vpack.c.bf16 %v1998_v4, %v1997_v56  ;;  %v1999_v51 = vmul.f32 %v2894_v46, %v4296_v14 }
 0x50c   : > { %v2896_v32 = vpop.eup %2895  ;;  %2905 = vrsqrt.f32 %v1941_v15  ;;  %v1942_v8 = vadd.f32 1e-05, %v1910_v3  ;;  %v1911_v49 = vmul.f32 0.0078125, %v1862_v22 }
 0x50d   : > { %v1864_v20 = vpop.xlane.xlu1 %1863  ;;  %2641 = vmatprep.mubr.bf16.mxu0 %v2027_v44  ;;  %v2000_v18 = vmul.f32 %v2896_v32, %v4301_v10 }
 0x50e   : > { %v2898_v7 = vpop.eup %2897  ;;  %2907 = vrsqrt.f32 %v1942_v8  ;;  %v1943_v40 = vadd.f32 1e-05, %v1911_v49  ;;  %v1912_v5 = vmul.f32 0.0078125, %v1864_v20 }
 0x50f   : > { %v1866_v26 = vpop.xlane.xlu0 %1865  ;;  %v2028_v62 = vpack.c.bf16 %v2000_v18, %v1999_v51  ;;  %v2001_v53 = vmul.f32 %v2898_v7, %v4306_v0 }
 0x510   : > { %v2900_v30 = vpop.eup %2899  ;;  %2909 = vrsqrt.f32 %v1943_v40  ;;  %v1944_v27 = vadd.f32 1e-05, %v1912_v5  ;;  %v1913_v17 = vmul.f32 0.0078125, %v1866_v26 }
 0x511   : > { %v1868_v54 = vpop.xlane.xlu1 %1867  ;;  %2642 = vmatmul.mubr.bf16.gmra.mrb[52].mxu0 %v2028_v62  ;;  %v2002_v35 = vmul.f32 %v2900_v30, %v4311_v39 }
 0x512   : > { %v2902_v29 = vpop.eup %2901  ;;  %2911 = vrsqrt.f32 %v1944_v27  ;;  %v1945_v14 = vadd.f32 1e-05, %v1913_v17  ;;  %v1914_v10 = vmul.f32 0.0078125, %v1868_v54 }
 0x513   : > { %v1870_v33 = vpop.xlane.xlu0 %1869  ;;  %v2029_v60 = vpack.c.bf16 %v2002_v35, %v2001_v53  ;;  %v2003_v59 = vmul.f32 %v2902_v29, %v4316_v45 }
 0x514   : > { %v2904_v61 = vpop.eup %2903  ;;  %2913 = vrsqrt.f32 %v1945_v14  ;;  %v1946_v42 = vadd.f32 1e-05, %v1914_v10  ;;  %v1915_v38 = vmul.f32 0.0078125, %v1870_v33 }
 0x515   : > { %v1872_v6 = vpop.xlane.xlu1 %1871  ;;  %2645 = vmatprep.mubr.bf16.mxu0 %v2029_v60  ;;  %v2004_v21 = vmul.f32 %v2904_v61, %v4321_v48 }
 0x516   : > { %v2906_v24 = vpop.eup %2905  ;;  %2915 = vrsqrt.f32 %v1946_v42  ;;  %v1947_v0 = vadd.f32 1e-05, %v1915_v38  ;;  %v1916_v39 = vmul.f32 0.0078125, %v1872_v6 }
 0x517   : > { %v1874_v58 = vpop.xlane.xlu0 %1873  ;;  %v2030_v43 = vpack.c.bf16 %v2004_v21, %v2003_v59  ;;  %v2005_v46 = vmul.f32 %v2906_v24, %v4326_v23 }
 0x518   : > { %v2908_v16 = vpop.eup %2907  ;;  %2917 = vrsqrt.f32 %v1947_v0  ;;  %v1948_v41 = vadd.f32 1e-05, %v1916_v39  ;;  %v1917_v56 = vmul.f32 0.0078125, %v1874_v58 }
 0x519   : > { %v1876_v4 = vpop.xlane.xlu1 %1875  ;;  %2646 = vmatmul.mubr.bf16.gmra.mrb[56].mxu0 %v2030_v43  ;;  %v2006_v15 = vmul.f32 %v2908_v16, %v4331_v12 }
 0x51a   : > { %v2910_v3 = vpop.eup %2909  ;;  %2919 = vrsqrt.f32 %v1948_v41  ;;  %v1949_v45 = vadd.f32 1e-05, %v1917_v56  ;;  %v1918_v48 = vmul.f32 0.0078125, %v1876_v4 }
 0x51b   : > { %v2031_v22 = vpack.c.bf16 %v2006_v15, %v2005_v46  ;;  %v2007_v8 = vmul.f32 %v2910_v3, %v4336_v9 }
 0x51c   : > { %v2912_v44 = vpop.eup %2911  ;;  %2921 = vrsqrt.f32 %v1949_v45  ;;  %v1950_v32 = vadd.f32 1e-05, %v1918_v48 }
 0x51d   : > { %2649 = vmatprep.mubr.bf16.mxu0 %v2031_v22  ;;  %v2008_v49 = vmul.f32 %v2912_v44, %v4341_v31 }
 0x51e   : > { %v2914_v20 = vpop.eup %2913  ;;  %2923 = vrsqrt.f32 %v1950_v32 }
 0x51f   : > { %v2032_v51 = vpack.c.bf16 %v2008_v49, %v2007_v8  ;;  %v2009_v23 = vmul.f32 %v2914_v20, %v4346_v52 }
 0x520   : > { %v2916_v18 = vpop.eup %2915 }
 0x521   : > { %2650 = vmatmul.mubr.bf16.gmra.mrb[60].mxu0 %v2032_v51  ;;  %v2010_v12 = vmul.f32 %v2916_v18, %v4351_v13 }
 0x522   : > { %v2918_v7 = vpop.eup %2917 }
 0x523   : > { %v2033_v40 = vpack.c.bf16 %v2010_v12, %v2009_v23  ;;  %v2011_v26 = vmul.f32 %v2918_v7, %v4356_v1 }
 0x524   : > { %v2920_v5 = vpop.eup %2919 }
 0x525   : > { %2653 = vmatprep.mubr.bf16.mxu0 %v2033_v40  ;;  %v2012_v62 = vmul.f32 %v2920_v5, %v4361_v55 }
 0x526   : > { %v2922_v9 = vpop.eup %2921 }
 0x527   : > { %v2034_v30 = vpack.c.bf16 %v2012_v62, %v2011_v26  ;;  %v2013_v27 = vmul.f32 %v2922_v9, %v4366_v11 }
 0x528   : > { %v2924_v31 = vpop.eup %2923 }
 0x529   : > { %2654 = vmatmul.mubr.bf16.gmra.mrb[64].mxu0 %v2034_v30  ;;  %v2014_v17 = vmul.f32 %v2924_v31, %v4371_v36  ;;  %v4464_v30 = vld [vmem:[%s4589_s4 + $0x3] ss:$0 sm:$0xff] }
 0x52b   : > { %v2035_v54 = vpack.c.bf16 %v2014_v17, %v2013_v27 }
 0x52d   : > { %2657 = vmatprep.mubr.bf16.mxu0 %v2035_v54 }
 0x55f   : > { %v1878_v52 = vpop.xlane.xlu0 %1877 }
 0x560   : > { %v1919_v13 = vmul.f32 0.0078125, %v1878_v52 }
 0x561   : > { %v1880_v53 = vpop.xlane.xlu1 %1879 }
 0x562   : > { %v1951_v35 = vadd.f32 1e-05, %v1919_v13  ;;  %v1920_v29 = vmul.f32 0.0078125, %v1880_v53 }
 0x564   : > { %2925 = vrsqrt.f32 %v1951_v35  ;;  %v1952_v14 = vadd.f32 1e-05, %v1920_v29 }
 0x566   : > { %2927 = vrsqrt.f32 %v1952_v14 }
 0x567   : > { %v1882_v1 = vpop.xlane.xlu0 %1881 }
 0x568   : > { %v1921_v55 = vmul.f32 0.0078125, %v1882_v1 }
 0x569   : > { %v1884_v10 = vpop.xlane.xlu1 %1883 }
 0x56a   : > { %v1953_v33 = vadd.f32 1e-05, %v1921_v55  ;;  %v1922_v60 = vmul.f32 0.0078125, %v1884_v10 }
 0x56c   : > { %2929 = vrsqrt.f32 %v1953_v33  ;;  %v1954_v61 = vadd.f32 1e-05, %v1922_v60 }
 0x56e   : > { %v2926_v11 = vpop.eup %2925  ;;  %2931 = vrsqrt.f32 %v1954_v61 }
 0x56f   : > { %v1886_v36 = vpop.xlane.xlu0 %1885  ;;  %v2015_v59 = vmul.f32 %v2926_v11, %v4380_v2 }
 0x570   : > { %v2928_v42 = vpop.eup %2927  ;;  %v1923_v38 = vmul.f32 0.0078125, %v1886_v36 }
 0x571   : > { %v1888_v6 = vpop.xlane.xlu1 %1887  ;;  %v2016_v21 = vmul.f32 %v2928_v42, %v4383_v25 }
 0x572   : > { %v1955_v24 = vadd.f32 1e-05, %v1923_v38  ;;  %v1924_v0 = vmul.f32 0.0078125, %v1888_v6 }
 0x573   : > { %v2036_v39 = vpack.c.bf16 %v2016_v21, %v2015_v59 }
 0x574   : > { %2933 = vrsqrt.f32 %v1955_v24  ;;  %v1956_v58 = vadd.f32 1e-05, %v1924_v0 }
 0x575   : > { %2658 = vmatmul.mubr.bf16.gmra.mrb[68].mxu0 %v2036_v39 }
 0x576   : > { %v2930_v43 = vpop.eup %2929  ;;  %2935 = vrsqrt.f32 %v1956_v58 }
 0x577   : > { %v1890_v16 = vpop.xlane.xlu0 %1889  ;;  %v2017_v46 = vmul.f32 %v2930_v43, %v4390_v37 }
 0x578   : > { %v2932_v41 = vpop.eup %2931  ;;  %v1925_v56 = vmul.f32 0.0078125, %v1890_v16 }
 0x579   : > { %v1892_v4 = vpop.xlane.xlu1 %1891  ;;  %v2018_v15 = vmul.f32 %v2932_v41, %v4393_v50 }
 0x57a   : > { %v1957_v3 = vadd.f32 1e-05, %v1925_v56  ;;  %v1926_v2 = vmul.f32 0.0078125, %v1892_v4 }
 0x57b   : > { %v2037_v45 = vpack.c.bf16 %v2018_v15, %v2017_v46 }
 0x57c   : > { %2937 = vrsqrt.f32 %v1957_v3  ;;  %v1958_v25 = vadd.f32 1e-05, %v1926_v2 }
 0x57d   : > { %2661 = vmatprep.mubr.bf16.mxu0 %v2037_v45 }
 0x57e   : > { %v2934_v48 = vpop.eup %2933  ;;  %2939 = vrsqrt.f32 %v1958_v25 }
 0x57f   : > { %v1894_v22 = vpop.xlane.xlu0 %1893  ;;  %v2019_v49 = vmul.f32 %v2934_v48, %v4400_v19 }
 0x580   : > { %v2936_v44 = vpop.eup %2935  ;;  %v1927_v32 = vmul.f32 0.0078125, %v1894_v22 }
 0x581   : > { %v1896_v8 = vpop.xlane.xlu1 %1895  ;;  %v2020_v20 = vmul.f32 %v2936_v44, %v4403_v57 }
 0x582   : > { %v1959_v51 = vadd.f32 1e-05, %v1927_v32  ;;  %v1928_v37 = vmul.f32 0.0078125, %v1896_v8 }
 0x583   : > { %v2038_v18 = vpack.c.bf16 %v2020_v20, %v2019_v49 }
 0x584   : > { %2941 = vrsqrt.f32 %v1959_v51  ;;  %v1960_v50 = vadd.f32 1e-05, %v1928_v37 }
 0x585   : > { %2662 = vmatmul.mubr.bf16.gmra.mrb[72].mxu0 %v2038_v18 }
 0x586   : > { %v2938_v23 = vpop.eup %2937  ;;  %2943 = vrsqrt.f32 %v1960_v50 }
 0x587   : > { %v2021_v7 = vmul.f32 %v2938_v23, %v4410_v47 }
 0x588   : > { %v2940_v12 = vpop.eup %2939 }
 0x589   : > { %v2022_v40 = vmul.f32 %v2940_v12, %v4413_v63 }
 0x58b   : > { %v2039_v5 = vpack.c.bf16 %v2022_v40, %v2021_v7 }
 0x58d   : > { %2665 = vmatprep.mubr.bf16.mxu0 %v2039_v5 }
 0x58e   : > { %v2942_v26 = vpop.eup %2941 }
 0x58f   : > { %v2023_v57 = vmul.f32 %v2942_v26, %v4420_v28 }
 0x590   : > { %v2944_v19 = vpop.eup %2943 }
 0x591   : > { %v2024_v62 = vmul.f32 %v2944_v19, %v4423_v34 }
 0x593   : > { %v2040_v9 = vpack.c.bf16 %v2024_v62, %v2023_v57 }
 0x595   : > { %2666 = vmatmul.mubr.bf16.gmra.mrb[76].mxu0 %v2040_v9 }
 0x5dc   : > { %v2639_v31 = vpop.f32.mrb[48].mxu0 }
 0x5dd   : > { %v2155_v47 = vadd.f32 %v2639_v31, %v4464_v30  ;;  %v2146_v27 = vpop.f32.mrb[49].mxu0 }
 0x5de   : > { %v2147_v63 = vadd.f32 %v4464_v30, %v2146_v27  ;;  %v2640_v17 = vpop.f32.mrb[50].mxu0 }
 0x5df   : > { %2275 = vst [vmem:[%s4470_s30 + $0x10] sm:$0xff] %v2155_v47  ;;  %v2158_v28 = vadd.f32 %v2640_v17, %v4464_v30  ;;  %v2149_v34 = vpop.f32.mrb[51].mxu0 }
 0x5e0   : > { %2273 = vst [vmem:[%s4470_s30] sm:$0xff] %v2147_v63  ;;  %v2150_v54 = vadd.f32 %v4464_v30, %v2149_v34 }
 0x5e1   : > { %2276 = vst [vmem:[%s4470_s30 + $0x18] sm:$0xff] %v2158_v28 }
 0x5e2   : > { %2274 = vst [vmem:[%s4470_s30 + $0x8] sm:$0xff] %v2150_v54 }
 0x5e4   : > { %v2643_v52 = vpop.f32.mrb[52].mxu0 }
 0x5e5   : > { %v2171_v13 = vadd.f32 %v2643_v52, %v4464_v30  ;;  %v2162_v53 = vpop.f32.mrb[53].mxu0 }
 0x5e6   : > { %v2163_v35 = vadd.f32 %v4464_v30, %v2162_v53  ;;  %v2644_v29 = vpop.f32.mrb[54].mxu0 }
 0x5e7   : > { %2279 = vst [vmem:[%s4470_s30 + $0x30] sm:$0xff] %v2171_v13  ;;  %v2174_v14 = vadd.f32 %v2644_v29, %v4464_v30  ;;  %v2165_v1 = vpop.f32.mrb[55].mxu0 }
 0x5e8   : > { %2277 = vst [vmem:[%s4470_s30 + $0x20] sm:$0xff] %v2163_v35  ;;  %v2166_v55 = vadd.f32 %v4464_v30, %v2165_v1 }
 0x5e9   : > { %2280 = vst [vmem:[%s4470_s30 + $0x38] sm:$0xff] %v2174_v14 }
 0x5ea   : > { %2278 = vst [vmem:[%s4470_s30 + $0x28] sm:$0xff] %v2166_v55 }
 0x5ec   : > { %v2647_v10 = vpop.f32.mrb[56].mxu0 }
 0x5ed   : > { %v2187_v33 = vadd.f32 %v2647_v10, %v4464_v30  ;;  %v2178_v60 = vpop.f32.mrb[57].mxu0 }
 0x5ee   : > { %v2179_v61 = vadd.f32 %v4464_v30, %v2178_v60  ;;  %v2648_v11 = vpop.f32.mrb[58].mxu0 }
 0x5ef   : > { %2283 = vst [vmem:[%s4470_s30 + $0x50] sm:$0xff] %v2187_v33  ;;  %v2190_v36 = vadd.f32 %v2648_v11, %v4464_v30  ;;  %v2181_v42 = vpop.f32.mrb[59].mxu0 }
 0x5f0   : > { %2281 = vst [vmem:[%s4470_s30 + $0x40] sm:$0xff] %v2179_v61  ;;  %v2182_v38 = vadd.f32 %v4464_v30, %v2181_v42 }
 0x5f1   : > { %2284 = vst [vmem:[%s4470_s30 + $0x58] sm:$0xff] %v2190_v36 }
 0x5f2   : > { %2282 = vst [vmem:[%s4470_s30 + $0x48] sm:$0xff] %v2182_v38 }
 0x5f4   : > { %v2651_v6 = vpop.f32.mrb[60].mxu0 }
 0x5f5   : > { %v2203_v59 = vadd.f32 %v2651_v6, %v4464_v30  ;;  %v2194_v21 = vpop.f32.mrb[61].mxu0 }
 0x5f6   : > { %v2195_v24 = vadd.f32 %v4464_v30, %v2194_v21  ;;  %v2652_v0 = vpop.f32.mrb[62].mxu0 }
 0x5f7   : > { %2287 = vst [vmem:[%s4470_s30 + $0x70] sm:$0xff] %v2203_v59  ;;  %v2206_v39 = vadd.f32 %v2652_v0, %v4464_v30  ;;  %v2197_v58 = vpop.f32.mrb[63].mxu0 }
 0x5f8   : > { %2285 = vst [vmem:[%s4470_s30 + $0x60] sm:$0xff] %v2195_v24  ;;  %v2198_v43 = vadd.f32 %v4464_v30, %v2197_v58 }
 0x5f9   : > { %2288 = vst [vmem:[%s4470_s30 + $0x78] sm:$0xff] %v2206_v39 }
 0x5fa   : > { %2286 = vst [vmem:[%s4470_s30 + $0x68] sm:$0xff] %v2198_v43 }
 0x5fc   : > { %v2655_v16 = vpop.f32.mrb[64].mxu0 }
 0x5fd   : > { %v2219_v41 = vadd.f32 %v2655_v16, %v4464_v30  ;;  %v2210_v56 = vpop.f32.mrb[65].mxu0 }
 0x5fe   : > { %v2211_v4 = vadd.f32 %v4464_v30, %v2210_v56  ;;  %v2656_v46 = vpop.f32.mrb[66].mxu0 }
 0x5ff   : > { %2291 = vst [vmem:[%s4470_s30 + $0x90] sm:$0xff] %v2219_v41  ;;  %v2222_v15 = vadd.f32 %v2656_v46, %v4464_v30  ;;  %v2213_v3 = vpop.f32.mrb[67].mxu0 }
 0x600   : > { %2289 = vst [vmem:[%s4470_s30 + $0x80] sm:$0xff] %v2211_v4  ;;  %v2214_v2 = vadd.f32 %v4464_v30, %v2213_v3 }
 0x601   : > { %2292 = vst [vmem:[%s4470_s30 + $0x98] sm:$0xff] %v2222_v15 }
 0x602   : > { %2290 = vst [vmem:[%s4470_s30 + $0x88] sm:$0xff] %v2214_v2 }
 0x648   : > { %v2659_v45 = vpop.f32.mrb[68].mxu0 }
 0x649   : > { %v2235_v25 = vadd.f32 %v2659_v45, %v4464_v30  ;;  %v2226_v48 = vpop.f32.mrb[69].mxu0 }
 0x64a   : > { %v2227_v22 = vadd.f32 %v4464_v30, %v2226_v48  ;;  %v2660_v44 = vpop.f32.mrb[70].mxu0 }
 0x64b   : > { %2295 = vst [vmem:[%s4470_s30 + $0xb0] sm:$0xff] %v2235_v25  ;;  %v2238_v32 = vadd.f32 %v2660_v44, %v4464_v30  ;;  %v2229_v8 = vpop.f32.mrb[71].mxu0 }
 0x64c   : > { %2293 = vst [vmem:[%s4470_s30 + $0xa0] sm:$0xff] %v2227_v22  ;;  %v2230_v49 = vadd.f32 %v4464_v30, %v2229_v8 }
 0x64d   : > { %2296 = vst [vmem:[%s4470_s30 + $0xb8] sm:$0xff] %v2238_v32 }
 0x64e   : > { %2294 = vst [vmem:[%s4470_s30 + $0xa8] sm:$0xff] %v2230_v49 }
 0x658   : > { %v2663_v20 = vpop.f32.mrb[72].mxu0 }
 0x659   : > { %v2251_v51 = vadd.f32 %v2663_v20, %v4464_v30  ;;  %v2242_v37 = vpop.f32.mrb[73].mxu0 }
 0x65a   : > { %v2243_v18 = vadd.f32 %v4464_v30, %v2242_v37  ;;  %v2664_v50 = vpop.f32.mrb[74].mxu0 }
 0x65b   : > { %2299 = vst [vmem:[%s4470_s30 + $0xd0] sm:$0xff] %v2251_v51  ;;  %v2254_v23 = vadd.f32 %v2664_v50, %v4464_v30  ;;  %v2245_v12 = vpop.f32.mrb[75].mxu0 }
 0x65c   : > { %2297 = vst [vmem:[%s4470_s30 + $0xc0] sm:$0xff] %v2243_v18  ;;  %v2246_v7 = vadd.f32 %v4464_v30, %v2245_v12 }
 0x65d   : > { %2300 = vst [vmem:[%s4470_s30 + $0xd8] sm:$0xff] %v2254_v23 }
 0x65e   : > { %2298 = vst [vmem:[%s4470_s30 + $0xc8] sm:$0xff] %v2246_v7 }
 0x668   : > { %v2667_v40 = vpop.f32.mrb[76].mxu0 }
 0x669   : > { %v2267_v5 = vadd.f32 %v2667_v40, %v4464_v30  ;;  %v2258_v26 = vpop.f32.mrb[77].mxu0 }
 0x66a   : > { %v2259_v19 = vadd.f32 %v4464_v30, %v2258_v26  ;;  %v2668_v57 = vpop.f32.mrb[78].mxu0 }
 0x66b   : > { %2303 = vst [vmem:[%s4470_s30 + $0xf0] sm:$0xff] %v2267_v5  ;;  %v2270_v62 = vadd.f32 %v2668_v57, %v4464_v30  ;;  %v2261_v9 = vpop.f32.mrb[79].mxu0 }
 0x66c   : > { %2301 = vst [vmem:[%s4470_s30 + $0xe0] sm:$0xff] %v2259_v19  ;;  %v2262_v31 = vadd.f32 %v4464_v30, %v2261_v9 }
 0x66d   : > { %2304 = vst [vmem:[%s4470_s30 + $0xf8] sm:$0xff] %v2270_v62 }
 0x66e   : > { %2302 = vst [vmem:[%s4470_s30 + $0xe8] sm:$0xff] %v2262_v31 }
 0x66f   : > { %3072 = shalt.err (!%p3069_p4)
}
 0x670   : > { %s3073_s26 = scalar_lea.hbm %s4535_s27, 4096  ;;  %s3077_s6 = scalar_lea.hbm %s4590_s5, 8192 }
 0x671   : > { %p3074_p9 = scmp.ne.s32.totalorder %s4535_s27, %s3073_s26  ;;  %p3078_p8 = scmp.lt.u32.totalorder %s4535_s27, %s4590_s5 }
 0x672   : > { %p3079_p13 = scmp.lt.u32.totalorder %s3077_s6, %s3073_s26  ;;  %p3081_p10 = scmp.lt.u32.totalorder %s3073_s26, %s4535_s27 }
 0x673   : > { %p3075_p0 = pnand %p3074_p9, %p3322_p5 }
 0x674   : > { %p3080_p6 = por %p3079_p13, %p3078_p8 }
 0x675   : > { %p3076_p11 = pneg %p3075_p0 }
 0x676   : > { %p3082_p3 = por %p3081_p10, %p3080_p6 }
 0x678   : > { %p3083_p7 = pnand %p3082_p3, %p3076_p11 }
 0x67a   : > { %3086 = shalt.err (!%p3083_p7)
}
 0x67b   : > { %s3145_s11 = smov 128   ;;  %s3146_s15 = smov 8  }
 0x67c   : > { %2699 = dma.vmem_to_hbm [thread:$0]  (%p3322_p5), %s4537_s13, 4096, %s4535_s27, %s2306_s22, %s3145_s11, %s3145_s11, %s3146_s15  }
 0x67d PF: > { %s2334_s23 = sand.u32 1, %s3121_s18   ;;  %p4720_p12 = scmp.ne.s32.totalorder %s4633_s25, 0 }
 0x67e   : > { %p4721_p1 = scmp.ge.s32.totalorder %s3133_s21, 2  ;;  %s2335_s16 = scalar_lea.sflag [#allocation4], %s2334_s23 }
 0x680   : > { %p2716_p2 = pnand %p4721_p1, %p4720_p12 }
 0x682   : > { %3116 = dma.done.wait (!%p2716_p2), %s2335_s16, 4096  }
 0x683   : > { %3118 = vsyncadd (!%p2716_p2), %s2335_s16, 4294963200  ;;  %p20_p4 = scmp.ge.s32.totalorder %s3290_s8, 4   ;;  %s4722_s18 = smov %s3125_s19 }
 0x684   : > { %s4723_s19 = smov %s3129_s20  ;;  %s4724_s20 = smov %s3318_s29 }
 0x685   : > { %s4725_s21 = smov %s3290_s8  ;;  %22 = sbr.rel (!%p20_p4) target bundleno = 7 (0x7), region = 97 }
 0x68c   :  { %2340 = vsyncpa [#allocation3], 1 }
 0x68d   :  { %2342 = vsyncpa [#allocation3 + $0x1], 1 }
 0x68e   :  { %2343 = vsyncpa [#allocation6], 1 }
 0x68f   :  { %2344 = vsyncpa [#allocation9], 1 }
 0x690   :  { %2345 = vsyncpa [#allocation4], 1 }
 0x691   :  { %2347 = vsyncpa [#allocation4 + $0x1], 1 }

</bundles_post_ra>
